<compile_context>
chip_gen: v6e
topology: v6e:2x2x1
jax: 0.10.0
libtpu: 0.0.40
codegen_flags: <defaults>
</compile_context>

<pallas_src>
import numpy as np

import jax
import jax.numpy as jnp
from jax.experimental import pallas as pl
from jax.experimental.pallas import tpu as pltpu

HIDDEN = 100                       # LSTM hidden size (as in the PyTorch module)
HID_PAD = 128                      # lane-padded hidden size used inside the LSTM kernel
VMEM_LIMIT = 48 * 1024 * 1024      # safe on v5e/v6e (128 MiB phys) and within v7x 64 MiB phys
_WQ_SCALE = float(1 << 20)         # fixed-point scale for vertical bilinear weights


def _round_up(x, m):
    return (x + m - 1) // m * m


def _vmem_spec():
    return pl.BlockSpec(memory_space=pltpu.MemorySpace.VMEM)


# ---------------------------------------------------------------------------
# Gridded matmul + bias + ReLU (backbone stand-in 1x1 conv).  bf16 operands, f32 accumulate,
# weights resident, M tiled & pipelined, M-axis marked "parallel" for megacore.
# ---------------------------------------------------------------------------
def _mm_bias_relu_kernel(x_ref, w_ref, b_ref, o_ref):
    acc = jnp.dot(x_ref[...], w_ref[...], preferred_element_type=jnp.float32)
    o_ref[...] = jnp.maximum(acc + b_ref[...], 0.0).astype(o_ref.dtype)


def matmul_bias_relu(x, w, b, *, block_m=256, out_dtype=jnp.bfloat16):
    m, k = x.shape
    n = w.shape[1]
    tm = min(block_m, _round_up(m, 16))          # 16: bf16 sublane granularity
    mp = _round_up(m, tm)
    if mp != m:
        x = jnp.pad(x, ((0, mp - m), (0, 0)))
    out = pl.pallas_call(
        _mm_bias_relu_kernel,
        out_shape=jax.ShapeDtypeStruct((mp, n), out_dtype),
        grid=(mp // tm,),
        in_specs=[pl.BlockSpec((tm, k), lambda i: (i, 0)),
                  pl.BlockSpec((k, n), lambda i: (0, 0)),
                  pl.BlockSpec((1, n), lambda i: (0, 0))],
        out_specs=pl.BlockSpec((tm, n), lambda i: (i, 0)),
        compiler_params=pltpu.CompilerParams(
            dimension_semantics=("parallel",),
            vmem_limit_bytes=VMEM_LIMIT),
        cost_estimate=pl.CostEstimate(
            flops=2 * mp * k * n,
            transcendentals=0,
            bytes_accessed=(mp * k * x.dtype.itemsize + k * n * w.dtype.itemsize
                            + n * 4 + mp * n * jnp.dtype(out_dtype).itemsize)),
    )(x, w, b)
    return out[:m] if mp != m else out


# ---------------------------------------------------------------------------
# Fused bilinear upsample (align_corners=True) + Conv2d(512,32,2,2) + ReLU.
#
#   conv_out[i, j, o] = sum_{kh,kw,c} up[2i+kh, 2j+kw, c] * W[o, c, kh, kw]
#   up[y, x, c]       = sum_{s,t} Uh[y, s] * Uw_full[x, t] * small[s, t, c]
#
# Per grid step (b, i):
#   V_kh  = (1 - a_kh) * small[y0_kh] + a_kh * small[y1_kh]          (VPU, (ws, 512))
#   P     = V_kh @ Wc[kh, kw]                                        (MXU, (ws, 32))
#   acc  += Uw[kw] @ P                                               (MXU, (wo, 32))
# Row indices / fixed-point blend weights come from scalar-prefetched SMEM; the small feature
# map block is constant along the i axis (fetched once per batch element).
# ---------------------------------------------------------------------------
def _upconv2x2_relu_kernel(rowsel_ref, rowwq_ref, small_ref, uw_ref, wc_ref, b_ref, o_ref):
    i = pl.program_id(1)
    wo = o_ref.shape[2]
    acc = jnp.zeros((wo, 32), jnp.float32)
    for kh in range(2):
        y0 = rowsel_ref[4 * i + 2 * kh]
        y1 = rowsel_ref[4 * i + 2 * kh + 1]
        a = rowwq_ref[2 * i + kh].astype(jnp.float32) * (1.0 / _WQ_SCALE)
        r0 = small_ref[0, y0].astype(jnp.float32)                    # (ws, 512)
        r1 = small_ref[0, y1].astype(jnp.float32)
        v = (r0 + (r1 - r0) * a).astype(jnp.bfloat16)                # vertical blend
        for kw in range(2):
            p = jnp.dot(v, wc_ref[kh, kw], preferred_element_type=jnp.float32)   # (ws, 32)
            acc = acc + jnp.dot(uw_ref[kw], p.astype(jnp.bfloat16),
                                preferred_element_type=jnp.float32)              # (wo, 32)
    o_ref[0, 0] = jnp.maximum(acc + b_ref[...], 0.0).astype(o_ref.dtype)


def _bilinear_tables(h_out, hs, w_out, ws):
    """Static (trace-time) bilinear tables: row indices / fixed-point weights + Uw matrices."""
    ys = np.linspace(0.0, hs - 1.0, h_out) if (hs > 1 and h_out > 1) else np.zeros((h_out,))
    y0 = np.clip(np.floor(ys).astype(np.int64), 0, hs - 1)
    y1 = np.minimum(y0 + 1, hs - 1)
    wy = (ys - y0).astype(np.float64)

    xs = np.linspace(0.0, ws - 1.0, w_out) if (ws > 1 and w_out > 1) else np.zeros((w_out,))
    x0 = np.clip(np.floor(xs).astype(np.int64), 0, ws - 1)
    x1 = np.minimum(x0 + 1, ws - 1)
    wx = (xs - x0).astype(np.float64)
    uw_full = np.zeros((w_out, ws), np.float32)
    uw_full[np.arange(w_out), x0] += (1.0 - wx).astype(np.float32)
    uw_full[np.arange(w_out), x1] += wx.astype(np.float32)

    # Re-group per conv output position (kernel=2, stride=2):
    # rowsel[4i + 2kh + {0,1}] = {y0, y1} of upsampled row 2i+kh ; rowwq[2i + kh] = wy (fixed pt).
    rowsel = np.stack([y0[0::2], y1[0::2], y0[1::2], y1[1::2]], axis=1).reshape(-1)
    roww = np.stack([wy[0::2], wy[1::2]], axis=1).reshape(-1)
    uw = np.stack([uw_full[0::2], uw_full[1::2]], axis=0)            # (2, wo, ws)
    return (rowsel.astype(np.int32),
            np.round(roww * _WQ_SCALE).astype(np.int32),
            uw)


def upsample_conv2x2_relu(small, wc, b, h, w):
    """small: (n, hs, ws, 512) bf16 stride-8 features; returns (n, h/2, w/2, 32) bf16."""
    n, hs, ws, c = small.shape
    assert h % 2 == 0 and w % 2 == 0
    ho, wo = h // 2, w // 2
    rowsel_np, rowwq_np, uw_np = _bilinear_tables(h, hs, w, ws)
    rowsel = jnp.asarray(rowsel_np)                       # (ho*4,) int32
    rowwq = jnp.asarray(rowwq_np)                         # (ho*2,) int32
    uw = jnp.asarray(uw_np, jnp.bfloat16)                 # (2, wo, ws) bf16

    flops = 2 * n * ho * 2 * 2 * (ws * c * 32 + wo * ws * 32)
    bytes_accessed = (small.size * small.dtype.itemsize + wc.size * wc.dtype.itemsize
                      + uw.size * 2 + c * 4 * 32 + n * ho * wo * 32 * 2)

    grid_spec = pltpu.PrefetchScalarGridSpec(
        num_scalar_prefetch=2,
        grid=(n, ho),
        in_specs=[
            # Whole small feature map of batch b stays resident across the row axis.
            pl.BlockSpec((1, hs, ws, c), lambda b_, i, rs, rw: (b_, 0, 0, 0)),
            pl.BlockSpec((2, wo, ws), lambda b_, i, rs, rw: (0, 0, 0)),
            pl.BlockSpec((2, 2, c, 32), lambda b_, i, rs, rw: (0, 0, 0, 0)),
            pl.BlockSpec((1, 32), lambda b_, i, rs, rw: (0, 0)),
        ],
        out_specs=pl.BlockSpec((1, 1, wo, 32), lambda b_, i, rs, rw: (b_, i, 0, 0)),
    )
    return pl.pallas_call(
        _upconv2x2_relu_kernel,
        out_shape=jax.ShapeDtypeStruct((n, ho, wo, 32), jnp.bfloat16),
        grid_spec=grid_spec,
        compiler_params=pltpu.CompilerParams(
            dimension_semantics=("parallel", "parallel"),
            vmem_limit_bytes=VMEM_LIMIT),
        cost_estimate=pl.CostEstimate(flops=int(flops), transcendentals=0,
                                      bytes_accessed=int(bytes_accessed)),
    )(rowsel, rowwq, small, uw, wc, b)


# ---------------------------------------------------------------------------
# Fused LSTM (batch=1, PyTorch gate order [i, f, g, o]) + MLP head, single pallas_call.
# Gate blocks are lane-padded to HID_PAD=128 with zeros (padded h/c lanes provably stay 0).
# The input projection seq @ Wih is done once for all timesteps (M=T matmul) before the loop.
# TODO(synk): for the real input_size (=336608) Wih would not fit resident in VMEM; the
# seq @ Wih projection would then need a K-gridded accumulating pipeline.
# ---------------------------------------------------------------------------
def _lstm_head_kernel(seq_ref, wih_ref, whh_ref, b_ref,
                      w1_ref, b1_ref, w2_ref, b2_ref,
                      wo0_ref, bo0_ref, wo1_ref, bo1_ref,
                      o0_ref, o1_ref):
    hp = whh_ref.shape[0]            # HID_PAD
    seq_len = seq_ref.shape[0]       # 5

    # Hoisted input projection: one (T, K) x (K, 4*hp) matmul instead of T serial M=1 matmuls.
    gx = jnp.dot(seq_ref[...], wih_ref[...],
                 preferred_element_type=jnp.float32) + b_ref[...]        # (T, 4*hp) f32

    h = jnp.zeros((1, hp), jnp.float32)
    c = jnp.zeros((1, hp), jnp.float32)
    for t in range(seq_len):         # tiny static trip count -> unrolled recurrence
        g = gx[t:t + 1, :] + jnp.dot(h.astype(jnp.bfloat16), whh_ref[...],
                                     preferred_element_type=jnp.float32)
        i = jax.nn.sigmoid(g[:, 0 * hp:1 * hp])
        f = jax.nn.sigmoid(g[:, 1 * hp:2 * hp])
        gg = jnp.tanh(g[:, 2 * hp:3 * hp])
        o = jax.nn.sigmoid(g[:, 3 * hp:4 * hp])
        c = f * c + i * gg
        h = o * jnp.tanh(c)

    # MLP head (nn.Dropout is the identity in eval mode).
    p = jnp.maximum(
        jnp.dot(h.astype(jnp.bfloat16), w1_ref[...],
                preferred_element_type=jnp.float32) + b1_ref[...], 0.0)
    p = jnp.maximum(
        jnp.dot(p.astype(jnp.bfloat16), w2_ref[...],
                preferred_element_type=jnp.float32) + b2_ref[...], 0.0)
    pb = p.astype(jnp.bfloat16)
    o0_ref[...] = jnp.dot(pb, wo0_ref[...], preferred_element_type=jnp.float32) + bo0_ref[...]
    o1_ref[...] = jnp.dot(pb, wo1_ref[...], preferred_element_type=jnp.float32) + bo1_ref[...]


def lstm_head(seq, pp):
    t, k = seq.shape
    hp = HID_PAD
    args = (seq.astype(jnp.bfloat16), pp["lstm_wih"], pp["lstm_whh"], pp["lstm_b"],
            pp["fc1_w"], pp["fc1_b"], pp["fc2_w"], pp["fc2_b"],
            pp["out0_w"], pp["out0_b"], pp["out1_w"], pp["out1_b"])
    bytes_accessed = sum(int(a.size) * a.dtype.itemsize for a in args) + 2 * 3 * 4
    flops = 2 * t * k * 4 * hp + 2 * t * hp * 4 * hp + 3 * 2 * hp * hp
    return pl.pallas_call(
        _lstm_head_kernel,
        out_shape=(jax.ShapeDtypeStruct((1, 3), jnp.float32),
                   jax.ShapeDtypeStruct((1, 3), jnp.float32)),
        in_specs=[_vmem_spec()] * 12,
        out_specs=(_vmem_spec(), _vmem_spec()),
        compiler_params=pltpu.CompilerParams(vmem_limit_bytes=VMEM_LIMIT),
        cost_estimate=pl.CostEstimate(flops=flops, transcendentals=t * 5 * hp,
                                      bytes_accessed=int(bytes_accessed)),
    )(*args)


# ---------------------------------------------------------------------------
# Parameter init / one-time layout prep.
# ---------------------------------------------------------------------------
def _pad_gate_cols(w, hidden, hp):
    """(K, 4*hidden) -> (K, 4*hp), zero-padded inside each gate block (PyTorch order i,f,g,o)."""
    k = w.shape[0]
    return jnp.pad(w.reshape(k, 4, hidden), ((0, 0), (0, 0), (0, hp - hidden))).reshape(k, 4 * hp)


def init_params(key, input_size, hidden=HIDDEN):
    ks = jax.random.split(key, 16)

    def nrm(k, shape, scale=0.05):
        return scale * jax.random.normal(k, shape, jnp.float32)

    return {
        # backbone stand-in (3 -> 512 pointwise conv at output stride 8)
        "backbone_w": nrm(ks[0], (3, 512)),
        "backbone_b": nrm(ks[1], (512,)),
        # nn.Conv2d(512, 32, kernel_size=(2,2), stride=(2,2)), PyTorch OIHW layout
        "conv_w": nrm(ks[2], (32, 512, 2, 2)),
        "conv_b": nrm(ks[3], (32,)),
        # nn.LSTM(input_size, 100): stored transposed (weight_ih_l0.T, weight_hh_l0.T),
        # Wih rows in PyTorch's (C, H, W) flatten order.
        "lstm_wih": nrm(ks[4], (input_size, 4 * hidden)),
        "lstm_whh": nrm(ks[5], (hidden, 4 * hidden)),
        "lstm_b": nrm(ks[6], (4 * hidden,)),          # bias_ih_l0 + bias_hh_l0 combined
        "fc1_w": nrm(ks[7], (hidden, 100)), "fc1_b": nrm(ks[8], (100,)),
        "fc2_w": nrm(ks[9], (100, 100)), "fc2_b": nrm(ks[10], (100,)),
        "out0_w": nrm(ks[11], (100, 3)), "out0_b": nrm(ks[12], (3,)),
        "out1_w": nrm(ks[13], (100, 3)), "out1_b": nrm(ks[14], (3,)),
    }


def prepare_params(params, ho, wo):
    """One-time weight layout / padding / bf16 prep (kept out of the per-call forward)."""
    hidden = HIDDEN
    input_size = params["lstm_wih"].shape[0]
    assert input_size == 32 * ho * wo

    # Backbone 1x1 conv: pad contraction dim (3 -> 8) with zero rows; bf16 operand.
    cin = params["backbone_w"].shape[0]
    kpad = max(8, _round_up(cin, 8))
    bb_w = jnp.pad(params["backbone_w"], ((0, kpad - cin), (0, 0))).astype(jnp.bfloat16)

    # Conv2d(512,32,2,2): OIHW -> (kh, kw, c, o) so the fused kernel takes per-(kh,kw) (512,32).
    conv_w = jnp.transpose(params["conv_w"], (2, 3, 1, 0)).astype(jnp.bfloat16)   # (2,2,512,32)

    # LSTM: permute Wih rows (C,H,W) -> (H,W,C) so seq needs no transpose, then pad gate blocks.
    wih = params["lstm_wih"].reshape(32, ho, wo, 4 * hidden).transpose(1, 2, 0, 3)
    wih = wih.reshape(input_size, 4 * hidden)
    wih_p = _pad_gate_cols(wih, hidden, HID_PAD).astype(jnp.bfloat16)
    whh_p = _pad_gate_cols(params["lstm_whh"], hidden, HID_PAD)
    whh_p = jnp.pad(whh_p, ((0, HID_PAD - hidden), (0, 0))).astype(jnp.bfloat16)
    b_p = _pad_gate_cols(params["lstm_b"].reshape(1, -1), hidden, HID_PAD).astype(jnp.float32)

    def pad_sq(w):
        return jnp.pad(w, ((0, HID_PAD - w.shape[0]),
                           (0, HID_PAD - w.shape[1]))).astype(jnp.bfloat16)

    def pad_vec(b):
        return jnp.pad(b.reshape(1, -1), ((0, 0), (0, HID_PAD - b.shape[0]))).astype(jnp.float32)

    return {
        "backbone_w": bb_w,
        "backbone_b": params["backbone_b"].reshape(1, -1).astype(jnp.float32),
        "conv_w": conv_w,
        "conv_b": params["conv_b"].reshape(1, -1).astype(jnp.float32),
        "lstm_wih": wih_p, "lstm_whh": whh_p, "lstm_b": b_p,
        "fc1_w": pad_sq(params["fc1_w"]), "fc1_b": pad_vec(params["fc1_b"]),
        "fc2_w": pad_sq(params["fc2_w"]), "fc2_b": pad_vec(params["fc2_b"]),
        "out0_w": jnp.pad(params["out0_w"], ((0, HID_PAD - hidden), (0, 0))).astype(jnp.bfloat16),
        "out0_b": params["out0_b"].reshape(1, -1).astype(jnp.float32),
        "out1_w": jnp.pad(params["out1_w"], ((0, HID_PAD - hidden), (0, 0))).astype(jnp.bfloat16),
        "out1_b": params["out1_b"].reshape(1, -1).astype(jnp.float32),
    }


# ---------------------------------------------------------------------------
# End2End.forward
# ---------------------------------------------------------------------------
def end2end_forward(pp, x_nchw):
    n, cin, h, w = x_nchw.shape
    assert h % 2 == 0 and w % 2 == 0
    x = jnp.transpose(x_nchw, (0, 2, 3, 1)).astype(jnp.float32)       # NCHW -> NHWC

    # --- self.resnet.forward_unfc(x) ---
    # TODO(synk): the pretrained ResNet18-8s backbone (custom torchvision fork + .pth checkpoint)
    # is not replicated; stand-in = stride-8 subsample + Pallas 1x1 conv (3->512) + ReLU.  The
    # module's bilinear upsample (align_corners=True) back to the input size is fused into the
    # conv kernel below, so no full-resolution 512-channel tensor ever hits HBM.
    xs = x[:, ::8, ::8, :]
    ns, hs, ws, _ = xs.shape
    kp = pp["backbone_w"].shape[0]
    xr = jnp.pad(xs.reshape(ns * hs * ws, cin), ((0, 0), (0, kp - cin))).astype(jnp.bfloat16)
    feat = matmul_bias_relu(xr, pp["backbone_w"], pp["backbone_b"])   # (rows, 512) bf16
    small = feat.reshape(ns, hs, ws, 512)                             # stride-8 feature map

    # --- F.upsample(..., align_corners=True) + self.conv (2x2/s2) + ReLU, fused in one kernel ---
    y = upsample_conv2x2_relu(small, pp["conv_w"], pp["conv_b"], h, w)  # (n, h/2, w/2, 32) bf16

    # --- x.contiguous().view(5, 1, -1) + LSTM + MLP head (one fused pallas_call) ---
    # Wih rows were pre-permuted to (H, W, C) order, so the flatten is a free reshape.
    seq = y.reshape(n, (h // 2) * (w // 2) * 32)
    return lstm_head(seq, pp)


if __name__ == "__main__":
    key = jax.random.PRNGKey(0)
    kx, kparam = jax.random.split(key)

    # 5 frames (-> view(5, 1, -1)), 3-channel 16x16 images.
    N, C, H, W = 5, 3, 16, 16
    x = jax.random.normal(kx, (N, C, H, W), jnp.float32)

    ho, wo = H // 2, W // 2
    input_size = 32 * ho * wo                     # 2048 at these small shapes
    params = init_params(kparam, input_size)
    prepped = prepare_params(params, ho, wo)      # one-time weight layout / pad / bf16 prep

    out0, out1 = jax.jit(end2end_forward)(prepped, x)
    jax.block_until_ready((out0, out1))
    assert out0.shape == (1, 3) and out1.shape == (1, 3)
    assert jnp.all(jnp.isfinite(out0)) and jnp.all(jnp.isfinite(out1))
    print("KERNEL_OK")
</pallas_src>

<mosaic_0001>
module attributes {stable_mosaic.version = 11 : i64} {
  func.func @_mm_bias_relu_kernel(%arg0: i32, %arg1: memref<32x8xbf16, #tpu.memory_space<vmem>>, %arg2: memref<8x512xbf16, #tpu.memory_space<vmem>>, %arg3: memref<1x512xf32, #tpu.memory_space<vmem>>, %arg4: memref<32x512xbf16, #tpu.memory_space<vmem>>) attributes {dimension_semantics = [#tpu.dimension_semantics<parallel>], iteration_bounds = array<i64: 1>, scalar_prefetch = 0 : i64, scratch_operands = 0 : i64, tpu.core_type = #tpu.core_type<tc>, window_params = [{transform_indices = @transform_0, window_bounds = array<i64: 32, 8>}, {pipeline_mode = #tpu.pipeline_mode<synchronous>, transform_indices = @transform_1, window_bounds = array<i64: 8, 512>}, {pipeline_mode = #tpu.pipeline_mode<synchronous>, transform_indices = @transform_2, window_bounds = array<i64: 1, 512>}, {transform_indices = @transform_3, window_bounds = array<i64: 32, 512>}]} {
    %c0 = arith.constant 0 : index
    %c0_0 = arith.constant 0 : index
    %0 = vector.load %arg1[%c0, %c0_0] : memref<32x8xbf16, #tpu.memory_space<vmem>>, vector<32x8xbf16>
    %c0_1 = arith.constant 0 : index
    %c0_2 = arith.constant 0 : index
    %1 = vector.load %arg2[%c0_1, %c0_2] : memref<8x512xbf16, #tpu.memory_space<vmem>>, vector<8x512xbf16>
    %cst = arith.constant dense<0.000000e+00> : vector<32x512xf32>
    %2 = tpu.matmul %0, %1, %cst {dimension_numbers = #tpu.dot_dimension_numbers<[1], [0], [0], [1], [0, 0, 1, 1], [], []>} : vector<32x8xbf16>, vector<8x512xbf16>, vector<32x512xf32> -> vector<32x512xf32>
    %c0_3 = arith.constant 0 : index
    %c0_4 = arith.constant 0 : index
    %3 = vector.load %arg3[%c0_3, %c0_4] : memref<1x512xf32, #tpu.memory_space<vmem>>, vector<1x512xf32>
    %4 = vector.broadcast %3 : vector<1x512xf32> to vector<32x512xf32>
    %5 = arith.addf %2, %4 : vector<32x512xf32>
    %cst_5 = arith.constant 0.000000e+00 : f32
    %6 = vector.broadcast %cst_5 : f32 to vector<32x512xf32>
    %7 = arith.maximumf %5, %6 : vector<32x512xf32>
    %8 = arith.truncf %7 : vector<32x512xf32> to vector<32x512xbf16>
    %c0_6 = arith.constant 0 : index
    %c0_7 = arith.constant 0 : index
    %9 = vector.load %arg4[%c0_6, %c0_7] : memref<32x512xbf16, #tpu.memory_space<vmem>>, vector<32x512xbf16>
    tpu.vector_store %arg4[%c0_6, %c0_7], %8 {strides = array<i32>} : memref<32x512xbf16, #tpu.memory_space<vmem>>, vector<32x512xbf16>,
    return
  }
  func.func @transform_0(%arg0: i32) -> (i32, i32) {
    %c0_i32 = arith.constant 0 : i32
    %c0_i32_0 = arith.constant 0 : i32
    return %arg0, %c0_i32 : i32, i32
  }
  func.func @transform_1(%arg0: i32) -> (i32, i32) {
    %c0_i32 = arith.constant 0 : i32
    %c0_i32_0 = arith.constant 0 : i32
    %c0_i32_1 = arith.constant 0 : i32
    return %c0_i32, %c0_i32_0 : i32, i32
  }
  func.func @transform_2(%arg0: i32) -> (i32, i32) {
    %c0_i32 = arith.constant 0 : i32
    %c0_i32_0 = arith.constant 0 : i32
    %c0_i32_1 = arith.constant 0 : i32
    return %c0_i32, %c0_i32_0 : i32, i32
  }
  func.func @transform_3(%arg0: i32) -> (i32, i32) {
    %c0_i32 = arith.constant 0 : i32
    %c0_i32_0 = arith.constant 0 : i32
    return %arg0, %c0_i32 : i32, i32
  }
}

module attributes {stable_mosaic.version = 11 : i64} {
  func.func @_upconv2x2_relu_kernel(%arg0: i32, %arg1: i32, %arg2: memref<32xi32, #tpu.memory_space<smem>>, %arg3: memref<16xi32, #tpu.memory_space<smem>>, %arg4: memref<1x2x2x512xbf16, #tpu.memory_space<vmem>>, %arg5: memref<2x8x2xbf16, #tpu.memory_space<vmem>>, %arg6: memref<2x2x512x32xbf16, #tpu.memory_space<vmem>>, %arg7: memref<1x32xf32, #tpu.memory_space<vmem>>, %arg8: memref<1x1x8x32xbf16, #tpu.memory_space<vmem>>) attributes {dimension_semantics = [#tpu.dimension_semantics<parallel>, #tpu.dimension_semantics<parallel>], iteration_bounds = array<i64: 5, 8>, scalar_prefetch = 2 : i64, scratch_operands = 0 : i64, tpu.core_type = #tpu.core_type<tc>, window_params = [{transform_indices = @transform_0, window_bounds = array<i64: 1, 2, 2, 512>}, {pipeline_mode = #tpu.pipeline_mode<synchronous>, transform_indices = @transform_1, window_bounds = array<i64: 2, 8, 2>}, {pipeline_mode = #tpu.pipeline_mode<synchronous>, transform_indices = @transform_2, window_bounds = array<i64: 2, 2, 512, 32>}, {pipeline_mode = #tpu.pipeline_mode<synchronous>, transform_indices = @transform_3, window_bounds = array<i64: 1, 32>}, {transform_indices = @transform_4, window_bounds = array<i64: 1, 1, 8, 32>}]} {
    %cst = arith.constant 0.000000e+00 : f32
    %0 = vector.broadcast %cst : f32 to vector<8x32xf32>
    %c4_i32 = arith.constant 4 : i32
    %1 = arith.muli %c4_i32, %arg1 : i32
    %c0_i32 = arith.constant 0 : i32
    %2 = arith.addi %1, %c0_i32 : i32
    %3 = arith.index_cast %2 : i32 to index
    %4 = memref.load %arg2[%3] : memref<32xi32, #tpu.memory_space<smem>>
    %c4_i32_0 = arith.constant 4 : i32
    %5 = arith.muli %c4_i32_0, %arg1 : i32
    %c0_i32_1 = arith.constant 0 : i32
    %6 = arith.addi %5, %c0_i32_1 : i32
    %c1_i32 = arith.constant 1 : i32
    %7 = arith.addi %6, %c1_i32 : i32
    %8 = arith.index_cast %7 : i32 to index
    %9 = memref.load %arg2[%8] : memref<32xi32, #tpu.memory_space<smem>>
    %c2_i32 = arith.constant 2 : i32
    %10 = arith.muli %c2_i32, %arg1 : i32
    %c0_i32_2 = arith.constant 0 : i32
    %11 = arith.addi %10, %c0_i32_2 : i32
    %12 = arith.index_cast %11 : i32 to index
    %13 = memref.load %arg3[%12] : memref<16xi32, #tpu.memory_space<smem>>
    %14 = arith.sitofp %13 : i32 to f32
    %cst_3 = arith.constant 9.53674316E-7 : f32
    %15 = arith.mulf %14, %cst_3 : f32
    %c0 = arith.constant 0 : index
    %16 = arith.index_cast %4 : i32 to index
    %c0_4 = arith.constant 0 : index
    %c0_5 = arith.constant 0 : index
    %17 = vector.load %arg4[%c0, %16, %c0_4, %c0_5] : memref<1x2x2x512xbf16, #tpu.memory_space<vmem>>, vector<1x1x2x512xbf16>
    %18 = vector.shape_cast %17 : vector<1x1x2x512xbf16> to vector<2x512xbf16>
    %19 = arith.extf %18 : vector<2x512xbf16> to vector<2x512xf32>
    %c0_6 = arith.constant 0 : index
    %20 = arith.index_cast %9 : i32 to index
    %c0_7 = arith.constant 0 : index
    %c0_8 = arith.constant 0 : index
    %21 = vector.load %arg4[%c0_6, %20, %c0_7, %c0_8] : memref<1x2x2x512xbf16, #tpu.memory_space<vmem>>, vector<1x1x2x512xbf16>
    %22 = vector.shape_cast %21 : vector<1x1x2x512xbf16> to vector<2x512xbf16>
    %23 = arith.extf %22 : vector<2x512xbf16> to vector<2x512xf32>
    %24 = arith.subf %23, %19 : vector<2x512xf32>
    %25 = vector.broadcast %15 : f32 to vector<2x512xf32>
    %26 = arith.mulf %24, %25 : vector<2x512xf32>
    %27 = arith.addf %19, %26 : vector<2x512xf32>
    %28 = arith.truncf %27 : vector<2x512xf32> to vector<2x512xbf16>
    %c0_9 = arith.constant 0 : index
    %c0_10 = arith.constant 0 : index
    %c0_11 = arith.constant 0 : index
    %c0_12 = arith.constant 0 : index
    %29 = vector.load %arg6[%c0_9, %c0_10, %c0_11, %c0_12] : memref<2x2x512x32xbf16, #tpu.memory_space<vmem>>, vector<1x1x512x32xbf16>
    %30 = vector.shape_cast %29 : vector<1x1x512x32xbf16> to vector<512x32xbf16>
    %cst_13 = arith.constant dense<0.000000e+00> : vector<2x32xf32>
    %31 = tpu.matmul %28, %30, %cst_13 {dimension_numbers = #tpu.dot_dimension_numbers<[1], [0], [0], [1], [0, 0, 1, 1], [], []>} : vector<2x512xbf16>, vector<512x32xbf16>, vector<2x32xf32> -> vector<2x32xf32>
    %c0_14 = arith.constant 0 : index
    %c0_15 = arith.constant 0 : index
    %c0_16 = arith.constant 0 : index
    %32 = vector.load %arg5[%c0_14, %c0_15, %c0_16] : memref<2x8x2xbf16, #tpu.memory_space<vmem>>, vector<1x8x2xbf16>
    %33 = vector.shape_cast %32 : vector<1x8x2xbf16> to vector<8x2xbf16>
    %34 = arith.truncf %31 : vector<2x32xf32> to vector<2x32xbf16>
    %cst_17 = arith.constant dense<0.000000e+00> : vector<8x32xf32>
    %35 = tpu.matmul %33, %34, %cst_17 {dimension_numbers = #tpu.dot_dimension_numbers<[1], [0], [0], [1], [0, 0, 1, 1], [], []>} : vector<8x2xbf16>, vector<2x32xbf16>, vector<8x32xf32> -> vector<8x32xf32>
    %36 = arith.addf %0, %35 : vector<8x32xf32>
    %c0_18 = arith.constant 0 : index
    %c1 = arith.constant 1 : index
    %c0_19 = arith.constant 0 : index
    %c0_20 = arith.constant 0 : index
    %37 = vector.load %arg6[%c0_18, %c1, %c0_19, %c0_20] : memref<2x2x512x32xbf16, #tpu.memory_space<vmem>>, vector<1x1x512x32xbf16>
    %38 = vector.shape_cast %37 : vector<1x1x512x32xbf16> to vector<512x32xbf16>
    %cst_21 = arith.constant dense<0.000000e+00> : vector<2x32xf32>
    %39 = tpu.matmul %28, %38, %cst_21 {dimension_numbers = #tpu.dot_dimension_numbers<[1], [0], [0], [1], [0, 0, 1, 1], [], []>} : vector<2x512xbf16>, vector<512x32xbf16>, vector<2x32xf32> -> vector<2x32xf32>
    %c1_22 = arith.constant 1 : index
    %c0_23 = arith.constant 0 : index
    %c0_24 = arith.constant 0 : index
    %40 = vector.load %arg5[%c1_22, %c0_23, %c0_24] : memref<2x8x2xbf16, #tpu.memory_space<vmem>>, vector<1x8x2xbf16>
    %41 = vector.shape_cast %40 : vector<1x8x2xbf16> to vector<8x2xbf16>
    %42 = arith.truncf %39 : vector<2x32xf32> to vector<2x32xbf16>
    %cst_25 = arith.constant dense<0.000000e+00> : vector<8x32xf32>
    %43 = tpu.matmul %41, %42, %cst_25 {dimension_numbers = #tpu.dot_dimension_numbers<[1], [0], [0], [1], [0, 0, 1, 1], [], []>} : vector<8x2xbf16>, vector<2x32xbf16>, vector<8x32xf32> -> vector<8x32xf32>
    %44 = arith.addf %36, %43 : vector<8x32xf32>
    %c4_i32_26 = arith.constant 4 : i32
    %45 = arith.muli %c4_i32_26, %arg1 : i32
    %c2_i32_27 = arith.constant 2 : i32
    %46 = arith.addi %45, %c2_i32_27 : i32
    %47 = arith.index_cast %46 : i32 to index
    %48 = memref.load %arg2[%47] : memref<32xi32, #tpu.memory_space<smem>>
    %c4_i32_28 = arith.constant 4 : i32
    %49 = arith.muli %c4_i32_28, %arg1 : i32
    %c2_i32_29 = arith.constant 2 : i32
    %50 = arith.addi %49, %c2_i32_29 : i32
    %c1_i32_30 = arith.constant 1 : i32
    %51 = arith.addi %50, %c1_i32_30 : i32
    %52 = arith.index_cast %51 : i32 to index
    %53 = memref.load %arg2[%52] : memref<32xi32, #tpu.memory_space<smem>>
    %c2_i32_31 = arith.constant 2 : i32
    %54 = arith.muli %c2_i32_31, %arg1 : i32
    %c1_i32_32 = arith.constant 1 : i32
    %55 = arith.addi %54, %c1_i32_32 : i32
    %56 = arith.index_cast %55 : i32 to index
    %57 = memref.load %arg3[%56] : memref<16xi32, #tpu.memory_space<smem>>
    %58 = arith.sitofp %57 : i32 to f32
    %cst_33 = arith.constant 9.53674316E-7 : f32
    %59 = arith.mulf %58, %cst_33 : f32
    %c0_34 = arith.constant 0 : index
    %60 = arith.index_cast %48 : i32 to index
    %c0_35 = arith.constant 0 : index
    %c0_36 = arith.constant 0 : index
    %61 = vector.load %arg4[%c0_34, %60, %c0_35, %c0_36] : memref<1x2x2x512xbf16, #tpu.memory_space<vmem>>, vector<1x1x2x512xbf16>
    %62 = vector.shape_cast %61 : vector<1x1x2x512xbf16> to vector<2x512xbf16>
    %63 = arith.extf %62 : vector<2x512xbf16> to vector<2x512xf32>
    %c0_37 = arith.constant 0 : index
    %64 = arith.index_cast %53 : i32 to index
    %c0_38 = arith.constant 0 : index
    %c0_39 = arith.constant 0 : index
    %65 = vector.load %arg4[%c0_37, %64, %c0_38, %c0_39] : memref<1x2x2x512xbf16, #tpu.memory_space<vmem>>, vector<1x1x2x512xbf16>
    %66 = vector.shape_cast %65 : vector<1x1x2x512xbf16> to vector<2x512xbf16>
    %67 = arith.extf %66 : vector<2x512xbf16> to vector<2x512xf32>
    %68 = arith.subf %67, %63 : vector<2x512xf32>
    %69 = vector.broadcast %59 : f32 to vector<2x512xf32>
    %70 = arith.mulf %68, %69 : vector<2x512xf32>
    %71 = arith.addf %63, %70 : vector<2x512xf32>
    %72 = arith.truncf %71 : vector<2x512xf32> to vector<2x512xbf16>
    %c1_40 = arith.constant 1 : index
    %c0_41 = arith.constant 0 : index
    %c0_42 = arith.constant 0 : index
    %c0_43 = arith.constant 0 : index
    %73 = vector.load %arg6[%c1_40, %c0_41, %c0_42, %c0_43] : memref<2x2x512x32xbf16, #tpu.memory_space<vmem>>, vector<1x1x512x32xbf16>
    %74 = vector.shape_cast %73 : vector<1x1x512x32xbf16> to vector<512x32xbf16>
    %cst_44 = arith.constant dense<0.000000e+00> : vector<2x32xf32>
    %75 = tpu.matmul %72, %74, %cst_44 {dimension_numbers = #tpu.dot_dimension_numbers<[1], [0], [0], [1], [0, 0, 1, 1], [], []>} : vector<2x512xbf16>, vector<512x32xbf16>, vector<2x32xf32> -> vector<2x32xf32>
    %c0_45 = arith.constant 0 : index
    %c0_46 = arith.constant 0 : index
    %c0_47 = arith.constant 0 : index
    %76 = vector.load %arg5[%c0_45, %c0_46, %c0_47] : memref<2x8x2xbf16, #tpu.memory_space<vmem>>, vector<1x8x2xbf16>
    %77 = vector.shape_cast %76 : vector<1x8x2xbf16> to vector<8x2xbf16>
    %78 = arith.truncf %75 : vector<2x32xf32> to vector<2x32xbf16>
    %cst_48 = arith.constant dense<0.000000e+00> : vector<8x32xf32>
    %79 = tpu.matmul %77, %78, %cst_48 {dimension_numbers = #tpu.dot_dimension_numbers<[1], [0], [0], [1], [0, 0, 1, 1], [], []>} : vector<8x2xbf16>, vector<2x32xbf16>, vector<8x32xf32> -> vector<8x32xf32>
    %80 = arith.addf %44, %79 : vector<8x32xf32>
    %c1_49 = arith.constant 1 : index
    %c1_50 = arith.constant 1 : index
    %c0_51 = arith.constant 0 : index
    %c0_52 = arith.constant 0 : index
    %81 = vector.load %arg6[%c1_49, %c1_50, %c0_51, %c0_52] : memref<2x2x512x32xbf16, #tpu.memory_space<vmem>>, vector<1x1x512x32xbf16>
    %82 = vector.shape_cast %81 : vector<1x1x512x32xbf16> to vector<512x32xbf16>
    %cst_53 = arith.constant dense<0.000000e+00> : vector<2x32xf32>
    %83 = tpu.matmul %72, %82, %cst_53 {dimension_numbers = #tpu.dot_dimension_numbers<[1], [0], [0], [1], [0, 0, 1, 1], [], []>} : vector<2x512xbf16>, vector<512x32xbf16>, vector<2x32xf32> -> vector<2x32xf32>
    %c1_54 = arith.constant 1 : index
    %c0_55 = arith.constant 0 : index
    %c0_56 = arith.constant 0 : index
    %84 = vector.load %arg5[%c1_54, %c0_55, %c0_56] : memref<2x8x2xbf16, #tpu.memory_space<vmem>>, vector<1x8x2xbf16>
    %85 = vector.shape_cast %84 : vector<1x8x2xbf16> to vector<8x2xbf16>
    %86 = arith.truncf %83 : vector<2x32xf32> to vector<2x32xbf16>
    %cst_57 = arith.constant dense<0.000000e+00> : vector<8x32xf32>
    %87 = tpu.matmul %85, %86, %cst_57 {dimension_numbers = #tpu.dot_dimension_numbers<[1], [0], [0], [1], [0, 0, 1, 1], [], []>} : vector<8x2xbf16>, vector<2x32xbf16>, vector<8x32xf32> -> vector<8x32xf32>
    %88 = arith.addf %80, %87 : vector<8x32xf32>
    %c0_58 = arith.constant 0 : index
    %c0_59 = arith.constant 0 : index
    %89 = vector.load %arg7[%c0_58, %c0_59] : memref<1x32xf32, #tpu.memory_space<vmem>>, vector<1x32xf32>
    %90 = vector.broadcast %89 : vector<1x32xf32> to vector<8x32xf32>
    %91 = arith.addf %88, %90 : vector<8x32xf32>
    %cst_60 = arith.constant 0.000000e+00 : f32
    %92 = vector.broadcast %cst_60 : f32 to vector<8x32xf32>
    %93 = arith.maximumf %91, %92 : vector<8x32xf32>
    %94 = arith.truncf %93 : vector<8x32xf32> to vector<8x32xbf16>
    %c0_61 = arith.constant 0 : index
    %c0_62 = arith.constant 0 : index
    %c0_63 = arith.constant 0 : index
    %c0_64 = arith.constant 0 : index
    %95 = vector.load %arg8[%c0_61, %c0_62, %c0_63, %c0_64] : memref<1x1x8x32xbf16, #tpu.memory_space<vmem>>, vector<1x1x8x32xbf16>
    %96 = vector.shape_cast %95 : vector<1x1x8x32xbf16> to vector<8x32xbf16>
    %97 = vector.shape_cast %94 : vector<8x32xbf16> to vector<1x1x8x32xbf16>
    tpu.vector_store %arg8[%c0_61, %c0_62, %c0_63, %c0_64], %97 {strides = array<i32>} : memref<1x1x8x32xbf16, #tpu.memory_space<vmem>>, vector<1x1x8x32xbf16>,
    return
  }
  func.func @transform_0(%arg0: i32, %arg1: i32, %arg2: memref<32xi32, #tpu.memory_space<smem>>, %arg3: memref<16xi32, #tpu.memory_space<smem>>) -> (i32, i32, i32, i32) {
    %c0_i32 = arith.constant 0 : i32
    %c0_i32_0 = arith.constant 0 : i32
    %c0_i32_1 = arith.constant 0 : i32
    %c0_i32_2 = arith.constant 0 : i32
    return %arg0, %c0_i32, %c0_i32_0, %c0_i32_1 : i32, i32, i32, i32
  }
  func.func @transform_1(%arg0: i32, %arg1: i32, %arg2: memref<32xi32, #tpu.memory_space<smem>>, %arg3: memref<16xi32, #tpu.memory_space<smem>>) -> (i32, i32, i32) {
    %c0_i32 = arith.constant 0 : i32
    %c0_i32_0 = arith.constant 0 : i32
    %c0_i32_1 = arith.constant 0 : i32
    %c0_i32_2 = arith.constant 0 : i32
    return %c0_i32, %c0_i32_0, %c0_i32_1 : i32, i32, i32
  }
  func.func @transform_2(%arg0: i32, %arg1: i32, %arg2: memref<32xi32, #tpu.memory_space<smem>>, %arg3: memref<16xi32, #tpu.memory_space<smem>>) -> (i32, i32, i32, i32) {
    %c0_i32 = arith.constant 0 : i32
    %c0_i32_0 = arith.constant 0 : i32
    %c0_i32_1 = arith.constant 0 : i32
    %c0_i32_2 = arith.constant 0 : i32
    %c0_i32_3 = arith.constant 0 : i32
    return %c0_i32, %c0_i32_0, %c0_i32_1, %c0_i32_2 : i32, i32, i32, i32
  }
  func.func @transform_3(%arg0: i32, %arg1: i32, %arg2: memref<32xi32, #tpu.memory_space<smem>>, %arg3: memref<16xi32, #tpu.memory_space<smem>>) -> (i32, i32) {
    %c0_i32 = arith.constant 0 : i32
    %c0_i32_0 = arith.constant 0 : i32
    %c0_i32_1 = arith.constant 0 : i32
    return %c0_i32, %c0_i32_0 : i32, i32
  }
  func.func @transform_4(%arg0: i32, %arg1: i32, %arg2: memref<32xi32, #tpu.memory_space<smem>>, %arg3: memref<16xi32, #tpu.memory_space<smem>>) -> (i32, i32, i32, i32) {
    %c0_i32 = arith.constant 0 : i32
    %c0_i32_0 = arith.constant 0 : i32
    %c0_i32_1 = arith.constant 0 : i32
    return %arg0, %arg1, %c0_i32, %c0_i32_0 : i32, i32, i32, i32
  }
}

module attributes {stable_mosaic.version = 11 : i64} {
  func.func @_lstm_head_kernel(%arg0: memref<5x2048xbf16, #tpu.memory_space<vmem>>, %arg1: memref<2048x512xbf16, #tpu.memory_space<vmem>>, %arg2: memref<128x512xbf16, #tpu.memory_space<vmem>>, %arg3: memref<1x512xf32, #tpu.memory_space<vmem>>, %arg4: memref<128x128xbf16, #tpu.memory_space<vmem>>, %arg5: memref<1x128xf32, #tpu.memory_space<vmem>>, %arg6: memref<128x128xbf16, #tpu.memory_space<vmem>>, %arg7: memref<1x128xf32, #tpu.memory_space<vmem>>, %arg8: memref<128x3xbf16, #tpu.memory_space<vmem>>, %arg9: memref<1x3xf32, #tpu.memory_space<vmem>>, %arg10: memref<128x3xbf16, #tpu.memory_space<vmem>>, %arg11: memref<1x3xf32, #tpu.memory_space<vmem>>, %arg12: memref<1x3xf32, #tpu.memory_space<vmem>>, %arg13: memref<1x3xf32, #tpu.memory_space<vmem>>) attributes {dimension_semantics = [], scalar_prefetch = 0 : i64, scratch_operands = 0 : i64, tpu.core_type = #tpu.core_type<tc>} {
    %c0 = arith.constant 0 : index
    %c0_0 = arith.constant 0 : index
    %0 = vector.load %arg0[%c0, %c0_0] : memref<5x2048xbf16, #tpu.memory_space<vmem>>, vector<5x2048xbf16>
    %c0_1 = arith.constant 0 : index
    %c0_2 = arith.constant 0 : index
    %1 = vector.load %arg1[%c0_1, %c0_2] : memref<2048x512xbf16, #tpu.memory_space<vmem>>, vector<2048x512xbf16>
    %cst = arith.constant dense<0.000000e+00> : vector<5x512xf32>
    %2 = tpu.matmul %0, %1, %cst {dimension_numbers = #tpu.dot_dimension_numbers<[1], [0], [0], [1], [0, 0, 1, 1], [], []>} : vector<5x2048xbf16>, vector<2048x512xbf16>, vector<5x512xf32> -> vector<5x512xf32>
    %c0_3 = arith.constant 0 : index
    %c0_4 = arith.constant 0 : index
    %3 = vector.load %arg3[%c0_3, %c0_4] : memref<1x512xf32, #tpu.memory_space<vmem>>, vector<1x512xf32>
    %4 = vector.broadcast %3 : vector<1x512xf32> to vector<5x512xf32>
    %5 = arith.addf %2, %4 : vector<5x512xf32>
    %cst_5 = arith.constant 0.000000e+00 : f32
    %6 = vector.broadcast %cst_5 : f32 to vector<1x128xf32>
    %cst_6 = arith.constant 0.000000e+00 : f32
    %7 = vector.broadcast %cst_6 : f32 to vector<1x128xf32>
    %8 = vector.extract_strided_slice %5 {offsets = [0, 0], sizes = [1, 512], strides = [1, 1]} : vector<5x512xf32> to vector<1x512xf32>
    %9 = arith.truncf %6 : vector<1x128xf32> to vector<1x128xbf16>
    %c0_7 = arith.constant 0 : index
    %c0_8 = arith.constant 0 : index
    %10 = vector.load %arg2[%c0_7, %c0_8] : memref<128x512xbf16, #tpu.memory_space<vmem>>, vector<128x512xbf16>
    %cst_9 = arith.constant dense<0.000000e+00> : vector<1x512xf32>
    %11 = tpu.matmul %9, %10, %cst_9 {dimension_numbers = #tpu.dot_dimension_numbers<[1], [0], [0], [1], [0, 0, 1, 1], [], []>} : vector<1x128xbf16>, vector<128x512xbf16>, vector<1x512xf32> -> vector<1x512xf32>
    %12 = arith.addf %8, %11 : vector<1x512xf32>
    %13 = vector.extract_strided_slice %12 {offsets = [0, 0], sizes = [1, 128], strides = [1, 1]} : vector<1x512xf32> to vector<1x128xf32>
    %14 = arith.negf %13 : vector<1x128xf32>
    %15 = math.exp %14 : vector<1x128xf32>
    %cst_10 = arith.constant 1.000000e+00 : f32
    %16 = vector.broadcast %cst_10 : f32 to vector<1x128xf32>
    %17 = arith.addf %16, %15 : vector<1x128xf32>
    %18 = arith.divf %16, %17 : vector<1x128xf32>
    %19 = vector.extract_strided_slice %12 {offsets = [0, 128], sizes = [1, 128], strides = [1, 1]} : vector<1x512xf32> to vector<1x128xf32>
    %20 = arith.negf %19 : vector<1x128xf32>
    %21 = math.exp %20 : vector<1x128xf32>
    %cst_11 = arith.constant 1.000000e+00 : f32
    %22 = vector.broadcast %cst_11 : f32 to vector<1x128xf32>
    %23 = arith.addf %22, %21 : vector<1x128xf32>
    %24 = arith.divf %22, %23 : vector<1x128xf32>
    %25 = vector.extract_strided_slice %12 {offsets = [0, 256], sizes = [1, 128], strides = [1, 1]} : vector<1x512xf32> to vector<1x128xf32>
    %26 = math.tanh %25 : vector<1x128xf32>
    %27 = vector.extract_strided_slice %12 {offsets = [0, 384], sizes = [1, 128], strides = [1, 1]} : vector<1x512xf32> to vector<1x128xf32>
    %28 = arith.negf %27 : vector<1x128xf32>
    %29 = math.exp %28 : vector<1x128xf32>
    %cst_12 = arith.constant 1.000000e+00 : f32
    %30 = vector.broadcast %cst_12 : f32 to vector<1x128xf32>
    %31 = arith.addf %30, %29 : vector<1x128xf32>
    %32 = arith.divf %30, %31 : vector<1x128xf32>
    %33 = arith.mulf %24, %7 : vector<1x128xf32>
    %34 = arith.mulf %18, %26 : vector<1x128xf32>
    %35 = arith.addf %33, %34 : vector<1x128xf32>
    %36 = math.tanh %35 : vector<1x128xf32>
    %37 = arith.mulf %32, %36 : vector<1x128xf32>
    %38 = vector.extract_strided_slice %5 {offsets = [1, 0], sizes = [1, 512], strides = [1, 1]} : vector<5x512xf32> to vector<1x512xf32>
    %39 = arith.truncf %37 : vector<1x128xf32> to vector<1x128xbf16>
    %c0_13 = arith.constant 0 : index
    %c0_14 = arith.constant 0 : index
    %40 = vector.load %arg2[%c0_13, %c0_14] : memref<128x512xbf16, #tpu.memory_space<vmem>>, vector<128x512xbf16>
    %cst_15 = arith.constant dense<0.000000e+00> : vector<1x512xf32>
    %41 = tpu.matmul %39, %40, %cst_15 {dimension_numbers = #tpu.dot_dimension_numbers<[1], [0], [0], [1], [0, 0, 1, 1], [], []>} : vector<1x128xbf16>, vector<128x512xbf16>, vector<1x512xf32> -> vector<1x512xf32>
    %42 = arith.addf %38, %41 : vector<1x512xf32>
    %43 = vector.extract_strided_slice %42 {offsets = [0, 0], sizes = [1, 128], strides = [1, 1]} : vector<1x512xf32> to vector<1x128xf32>
    %44 = arith.negf %43 : vector<1x128xf32>
    %45 = math.exp %44 : vector<1x128xf32>
    %cst_16 = arith.constant 1.000000e+00 : f32
    %46 = vector.broadcast %cst_16 : f32 to vector<1x128xf32>
    %47 = arith.addf %46, %45 : vector<1x128xf32>
    %48 = arith.divf %46, %47 : vector<1x128xf32>
    %49 = vector.extract_strided_slice %42 {offsets = [0, 128], sizes = [1, 128], strides = [1, 1]} : vector<1x512xf32> to vector<1x128xf32>
    %50 = arith.negf %49 : vector<1x128xf32>
    %51 = math.exp %50 : vector<1x128xf32>
    %cst_17 = arith.constant 1.000000e+00 : f32
    %52 = vector.broadcast %cst_17 : f32 to vector<1x128xf32>
    %53 = arith.addf %52, %51 : vector<1x128xf32>
    %54 = arith.divf %52, %53 : vector<1x128xf32>
    %55 = vector.extract_strided_slice %42 {offsets = [0, 256], sizes = [1, 128], strides = [1, 1]} : vector<1x512xf32> to vector<1x128xf32>
    %56 = math.tanh %55 : vector<1x128xf32>
    %57 = vector.extract_strided_slice %42 {offsets = [0, 384], sizes = [1, 128], strides = [1, 1]} : vector<1x512xf32> to vector<1x128xf32>
    %58 = arith.negf %57 : vector<1x128xf32>
    %59 = math.exp %58 : vector<1x128xf32>
    %cst_18 = arith.constant 1.000000e+00 : f32
    %60 = vector.broadcast %cst_18 : f32 to vector<1x128xf32>
    %61 = arith.addf %60, %59 : vector<1x128xf32>
    %62 = arith.divf %60, %61 : vector<1x128xf32>
    %63 = arith.mulf %54, %35 : vector<1x128xf32>
    %64 = arith.mulf %48, %56 : vector<1x128xf32>
    %65 = arith.addf %63, %64 : vector<1x128xf32>
    %66 = math.tanh %65 : vector<1x128xf32>
    %67 = arith.mulf %62, %66 : vector<1x128xf32>
    %68 = vector.extract_strided_slice %5 {offsets = [2, 0], sizes = [1, 512], strides = [1, 1]} : vector<5x512xf32> to vector<1x512xf32>
    %69 = arith.truncf %67 : vector<1x128xf32> to vector<1x128xbf16>
    %c0_19 = arith.constant 0 : index
    %c0_20 = arith.constant 0 : index
    %70 = vector.load %arg2[%c0_19, %c0_20] : memref<128x512xbf16, #tpu.memory_space<vmem>>, vector<128x512xbf16>
    %cst_21 = arith.constant dense<0.000000e+00> : vector<1x512xf32>
    %71 = tpu.matmul %69, %70, %cst_21 {dimension_numbers = #tpu.dot_dimension_numbers<[1], [0], [0], [1], [0, 0, 1, 1], [], []>} : vector<1x128xbf16>, vector<128x512xbf16>, vector<1x512xf32> -> vector<1x512xf32>
    %72 = arith.addf %68, %71 : vector<1x512xf32>
    %73 = vector.extract_strided_slice %72 {offsets = [0, 0], sizes = [1, 128], strides = [1, 1]} : vector<1x512xf32> to vector<1x128xf32>
    %74 = arith.negf %73 : vector<1x128xf32>
    %75 = math.exp %74 : vector<1x128xf32>
    %cst_22 = arith.constant 1.000000e+00 : f32
    %76 = vector.broadcast %cst_22 : f32 to vector<1x128xf32>
    %77 = arith.addf %76, %75 : vector<1x128xf32>
    %78 = arith.divf %76, %77 : vector<1x128xf32>
    %79 = vector.extract_strided_slice %72 {offsets = [0, 128], sizes = [1, 128], strides = [1, 1]} : vector<1x512xf32> to vector<1x128xf32>
    %80 = arith.negf %79 : vector<1x128xf32>
    %81 = math.exp %80 : vector<1x128xf32>
    %cst_23 = arith.constant 1.000000e+00 : f32
    %82 = vector.broadcast %cst_23 : f32 to vector<1x128xf32>
    %83 = arith.addf %82, %81 : vector<1x128xf32>
    %84 = arith.divf %82, %83 : vector<1x128xf32>
    %85 = vector.extract_strided_slice %72 {offsets = [0, 256], sizes = [1, 128], strides = [1, 1]} : vector<1x512xf32> to vector<1x128xf32>
    %86 = math.tanh %85 : vector<1x128xf32>
    %87 = vector.extract_strided_slice %72 {offsets = [0, 384], sizes = [1, 128], strides = [1, 1]} : vector<1x512xf32> to vector<1x128xf32>
    %88 = arith.negf %87 : vector<1x128xf32>
    %89 = math.exp %88 : vector<1x128xf32>
    %cst_24 = arith.constant 1.000000e+00 : f32
    %90 = vector.broadcast %cst_24 : f32 to vector<1x128xf32>
    %91 = arith.addf %90, %89 : vector<1x128xf32>
    %92 = arith.divf %90, %91 : vector<1x128xf32>
    %93 = arith.mulf %84, %65 : vector<1x128xf32>
    %94 = arith.mulf %78, %86 : vector<1x128xf32>
    %95 = arith.addf %93, %94 : vector<1x128xf32>
    %96 = math.tanh %95 : vector<1x128xf32>
    %97 = arith.mulf %92, %96 : vector<1x128xf32>
    %98 = vector.extract_strided_slice %5 {offsets = [3, 0], sizes = [1, 512], strides = [1, 1]} : vector<5x512xf32> to vector<1x512xf32>
    %99 = arith.truncf %97 : vector<1x128xf32> to vector<1x128xbf16>
    %c0_25 = arith.constant 0 : index
    %c0_26 = arith.constant 0 : index
    %100 = vector.load %arg2[%c0_25, %c0_26] : memref<128x512xbf16, #tpu.memory_space<vmem>>, vector<128x512xbf16>
    %cst_27 = arith.constant dense<0.000000e+00> : vector<1x512xf32>
    %101 = tpu.matmul %99, %100, %cst_27 {dimension_numbers = #tpu.dot_dimension_numbers<[1], [0], [0], [1], [0, 0, 1, 1], [], []>} : vector<1x128xbf16>, vector<128x512xbf16>, vector<1x512xf32> -> vector<1x512xf32>
    %102 = arith.addf %98, %101 : vector<1x512xf32>
    %103 = vector.extract_strided_slice %102 {offsets = [0, 0], sizes = [1, 128], strides = [1, 1]} : vector<1x512xf32> to vector<1x128xf32>
    %104 = arith.negf %103 : vector<1x128xf32>
    %105 = math.exp %104 : vector<1x128xf32>
    %cst_28 = arith.constant 1.000000e+00 : f32
    %106 = vector.broadcast %cst_28 : f32 to vector<1x128xf32>
    %107 = arith.addf %106, %105 : vector<1x128xf32>
    %108 = arith.divf %106, %107 : vector<1x128xf32>
    %109 = vector.extract_strided_slice %102 {offsets = [0, 128], sizes = [1, 128], strides = [1, 1]} : vector<1x512xf32> to vector<1x128xf32>
    %110 = arith.negf %109 : vector<1x128xf32>
    %111 = math.exp %110 : vector<1x128xf32>
    %cst_29 = arith.constant 1.000000e+00 : f32
    %112 = vector.broadcast %cst_29 : f32 to vector<1x128xf32>
    %113 = arith.addf %112, %111 : vector<1x128xf32>
    %114 = arith.divf %112, %113 : vector<1x128xf32>
    %115 = vector.extract_strided_slice %102 {offsets = [0, 256], sizes = [1, 128], strides = [1, 1]} : vector<1x512xf32> to vector<1x128xf32>
    %116 = math.tanh %115 : vector<1x128xf32>
    %117 = vector.extract_strided_slice %102 {offsets = [0, 384], sizes = [1, 128], strides = [1, 1]} : vector<1x512xf32> to vector<1x128xf32>
    %118 = arith.negf %117 : vector<1x128xf32>
    %119 = math.exp %118 : vector<1x128xf32>
    %cst_30 = arith.constant 1.000000e+00 : f32
    %120 = vector.broadcast %cst_30 : f32 to vector<1x128xf32>
    %121 = arith.addf %120, %119 : vector<1x128xf32>
    %122 = arith.divf %120, %121 : vector<1x128xf32>
    %123 = arith.mulf %114, %95 : vector<1x128xf32>
    %124 = arith.mulf %108, %116 : vector<1x128xf32>
    %125 = arith.addf %123, %124 : vector<1x128xf32>
    %126 = math.tanh %125 : vector<1x128xf32>
    %127 = arith.mulf %122, %126 : vector<1x128xf32>
    %128 = vector.extract_strided_slice %5 {offsets = [4, 0], sizes = [1, 512], strides = [1, 1]} : vector<5x512xf32> to vector<1x512xf32>
    %129 = arith.truncf %127 : vector<1x128xf32> to vector<1x128xbf16>
    %c0_31 = arith.constant 0 : index
    %c0_32 = arith.constant 0 : index
    %130 = vector.load %arg2[%c0_31, %c0_32] : memref<128x512xbf16, #tpu.memory_space<vmem>>, vector<128x512xbf16>
    %cst_33 = arith.constant dense<0.000000e+00> : vector<1x512xf32>
    %131 = tpu.matmul %129, %130, %cst_33 {dimension_numbers = #tpu.dot_dimension_numbers<[1], [0], [0], [1], [0, 0, 1, 1], [], []>} : vector<1x128xbf16>, vector<128x512xbf16>, vector<1x512xf32> -> vector<1x512xf32>
    %132 = arith.addf %128, %131 : vector<1x512xf32>
    %133 = vector.extract_strided_slice %132 {offsets = [0, 0], sizes = [1, 128], strides = [1, 1]} : vector<1x512xf32> to vector<1x128xf32>
    %134 = arith.negf %133 : vector<1x128xf32>
    %135 = math.exp %134 : vector<1x128xf32>
    %cst_34 = arith.constant 1.000000e+00 : f32
    %136 = vector.broadcast %cst_34 : f32 to vector<1x128xf32>
    %137 = arith.addf %136, %135 : vector<1x128xf32>
    %138 = arith.divf %136, %137 : vector<1x128xf32>
    %139 = vector.extract_strided_slice %132 {offsets = [0, 128], sizes = [1, 128], strides = [1, 1]} : vector<1x512xf32> to vector<1x128xf32>
    %140 = arith.negf %139 : vector<1x128xf32>
    %141 = math.exp %140 : vector<1x128xf32>
    %cst_35 = arith.constant 1.000000e+00 : f32
    %142 = vector.broadcast %cst_35 : f32 to vector<1x128xf32>
    %143 = arith.addf %142, %141 : vector<1x128xf32>
    %144 = arith.divf %142, %143 : vector<1x128xf32>
    %145 = vector.extract_strided_slice %132 {offsets = [0, 256], sizes = [1, 128], strides = [1, 1]} : vector<1x512xf32> to vector<1x128xf32>
    %146 = math.tanh %145 : vector<1x128xf32>
    %147 = vector.extract_strided_slice %132 {offsets = [0, 384], sizes = [1, 128], strides = [1, 1]} : vector<1x512xf32> to vector<1x128xf32>
    %148 = arith.negf %147 : vector<1x128xf32>
    %149 = math.exp %148 : vector<1x128xf32>
    %cst_36 = arith.constant 1.000000e+00 : f32
    %150 = vector.broadcast %cst_36 : f32 to vector<1x128xf32>
    %151 = arith.addf %150, %149 : vector<1x128xf32>
    %152 = arith.divf %150, %151 : vector<1x128xf32>
    %153 = arith.mulf %144, %125 : vector<1x128xf32>
    %154 = arith.mulf %138, %146 : vector<1x128xf32>
    %155 = arith.addf %153, %154 : vector<1x128xf32>
    %156 = math.tanh %155 : vector<1x128xf32>
    %157 = arith.mulf %152, %156 : vector<1x128xf32>
    %158 = arith.truncf %157 : vector<1x128xf32> to vector<1x128xbf16>
    %c0_37 = arith.constant 0 : index
    %c0_38 = arith.constant 0 : index
    %159 = vector.load %arg4[%c0_37, %c0_38] : memref<128x128xbf16, #tpu.memory_space<vmem>>, vector<128x128xbf16>
    %cst_39 = arith.constant dense<0.000000e+00> : vector<1x128xf32>
    %160 = tpu.matmul %158, %159, %cst_39 {dimension_numbers = #tpu.dot_dimension_numbers<[1], [0], [0], [1], [0, 0, 1, 1], [], []>} : vector<1x128xbf16>, vector<128x128xbf16>, vector<1x128xf32> -> vector<1x128xf32>
    %c0_40 = arith.constant 0 : index
    %c0_41 = arith.constant 0 : index
    %161 = vector.load %arg5[%c0_40, %c0_41] : memref<1x128xf32, #tpu.memory_space<vmem>>, vector<1x128xf32>
    %162 = arith.addf %160, %161 : vector<1x128xf32>
    %cst_42 = arith.constant 0.000000e+00 : f32
    %163 = vector.broadcast %cst_42 : f32 to vector<1x128xf32>
    %164 = arith.maximumf %162, %163 : vector<1x128xf32>
    %165 = arith.truncf %164 : vector<1x128xf32> to vector<1x128xbf16>
    %c0_43 = arith.constant 0 : index
    %c0_44 = arith.constant 0 : index
    %166 = vector.load %arg6[%c0_43, %c0_44] : memref<128x128xbf16, #tpu.memory_space<vmem>>, vector<128x128xbf16>
    %cst_45 = arith.constant dense<0.000000e+00> : vector<1x128xf32>
    %167 = tpu.matmul %165, %166, %cst_45 {dimension_numbers = #tpu.dot_dimension_numbers<[1], [0], [0], [1], [0, 0, 1, 1], [], []>} : vector<1x128xbf16>, vector<128x128xbf16>, vector<1x128xf32> -> vector<1x128xf32>
    %c0_46 = arith.constant 0 : index
    %c0_47 = arith.constant 0 : index
    %168 = vector.load %arg7[%c0_46, %c0_47] : memref<1x128xf32, #tpu.memory_space<vmem>>, vector<1x128xf32>
    %169 = arith.addf %167, %168 : vector<1x128xf32>
    %cst_48 = arith.constant 0.000000e+00 : f32
    %170 = vector.broadcast %cst_48 : f32 to vector<1x128xf32>
    %171 = arith.maximumf %169, %170 : vector<1x128xf32>
    %172 = arith.truncf %171 : vector<1x128xf32> to vector<1x128xbf16>
    %c0_49 = arith.constant 0 : index
    %c0_50 = arith.constant 0 : index
    %173 = vector.load %arg8[%c0_49, %c0_50] : memref<128x3xbf16, #tpu.memory_space<vmem>>, vector<128x3xbf16>
    %cst_51 = arith.constant dense<0.000000e+00> : vector<1x3xf32>
    %174 = tpu.matmul %172, %173, %cst_51 {dimension_numbers = #tpu.dot_dimension_numbers<[1], [0], [0], [1], [0, 0, 1, 1], [], []>} : vector<1x128xbf16>, vector<128x3xbf16>, vector<1x3xf32> -> vector<1x3xf32>
    %c0_52 = arith.constant 0 : index
    %c0_53 = arith.constant 0 : index
    %175 = vector.load %arg9[%c0_52, %c0_53] : memref<1x3xf32, #tpu.memory_space<vmem>>, vector<1x3xf32>
    %176 = arith.addf %174, %175 : vector<1x3xf32>
    %c0_54 = arith.constant 0 : index
    %c0_55 = arith.constant 0 : index
    %177 = vector.load %arg12[%c0_54, %c0_55] : memref<1x3xf32, #tpu.memory_space<vmem>>, vector<1x3xf32>
    tpu.vector_store %arg12[%c0_54, %c0_55], %176 {strides = array<i32>} : memref<1x3xf32, #tpu.memory_space<vmem>>, vector<1x3xf32>,
    %c0_56 = arith.constant 0 : index
    %c0_57 = arith.constant 0 : index
    %178 = vector.load %arg10[%c0_56, %c0_57] : memref<128x3xbf16, #tpu.memory_space<vmem>>, vector<128x3xbf16>
    %cst_58 = arith.constant dense<0.000000e+00> : vector<1x3xf32>
    %179 = tpu.matmul %172, %178, %cst_58 {dimension_numbers = #tpu.dot_dimension_numbers<[1], [0], [0], [1], [0, 0, 1, 1], [], []>} : vector<1x128xbf16>, vector<128x3xbf16>, vector<1x3xf32> -> vector<1x3xf32>
    %c0_59 = arith.constant 0 : index
    %c0_60 = arith.constant 0 : index
    %180 = vector.load %arg11[%c0_59, %c0_60] : memref<1x3xf32, #tpu.memory_space<vmem>>, vector<1x3xf32>
    %181 = arith.addf %179, %180 : vector<1x3xf32>
    %c0_61 = arith.constant 0 : index
    %c0_62 = arith.constant 0 : index
    %182 = vector.load %arg13[%c0_61, %c0_62] : memref<1x3xf32, #tpu.memory_space<vmem>>, vector<1x3xf32>
    tpu.vector_store %arg13[%c0_61, %c0_62], %181 {strides = array<i32>} : memref<1x3xf32, #tpu.memory_space<vmem>>, vector<1x3xf32>,
    return
  }
}

</mosaic_0001>

<bundles_post_ra>
// kernel: end2end_forward.3
= control target key start
LH: loop header
LB: loop body
LE: loop exit
PB: predicated region body
PF: predicated region fallthrough
CT: control target
= control target key end

     0   :  { %8 = vsyncpa [#allocation3], 0  ;;  %s431_s0 = inlined_call_operand.vmem [shape: bf16[32,8], index: 0, kind: input, shape index: {}]   ;;  %s432_s1 = inlined_call_operand.hbm [shape: bf16[8,512], index: 1, kind: input, shape index: {}]   ;;  %s433_s2 = inlined_call_operand.hbm [shape: f32[1,512], index: 2, kind: input, shape index: {}]   ;;  %s434_s3 = inlined_call_operand.vmem [shape: bf16[32,512], index: 3, kind: output, shape index: {}]  }
   0x1   :  { %9 = vsyncpa [#allocation5], 0  ;;  %s372_s12 = smov [#allocation2]   ;;  %s373_s14 = smov [#allocation4]  }
   0x2   :  { %s18_s13 = sshll.u32 %s372_s12, 4  ;;  %s28_s15 = sshll.u32 %s373_s14, 4  ;;  %s19_s13 = int_to_ptr.vmem [resolvable:$true] %s18_s13  ;;  %s29_s15 = int_to_ptr.vmem [resolvable:$true] %s28_s15 }
   0x3   :  { %s336_s16 = scalar_lea.vmem %s19_s13, 256  ;;  %p341_p1 = scmp.lt.s32.totalorder %s19_s13, %s19_s13 }
   0x4   :  { %p337_p0 = scmp.ne.s32.totalorder %s19_s13, %s336_s16  ;;  %p342_p2 = scmp.lt.s32.totalorder %s336_s16, %s336_s16 }
   0x6   :  { %p343_p3 = por %p342_p2, %p341_p1 }
   0x8   :  { %p344_p4 = pnand %p343_p3, %p337_p0 }
   0xa   :  { %347 = shalt.err (!%p344_p4)
}
   0xb   :  { %21 = dma.hbm_to_vmem [thread:$0]  %s432_s1, 256, %s19_s13, [#allocation3]  }
   0xc   :  { %s356_s19 = scalar_lea.vmem %s29_s15, 64  ;;  %p361_p6 = scmp.lt.s32.totalorder %s29_s15, %s29_s15 }
   0xd   :  { %p357_p5 = scmp.ne.s32.totalorder %s29_s15, %s356_s19  ;;  %p362_p7 = scmp.lt.s32.totalorder %s356_s19, %s356_s19 }
   0xf   :  { %p363_p8 = por %p362_p7, %p361_p6 }
  0x11   :  { %p364_p9 = pnand %p363_p8, %p357_p5 }
  0x13   :  { %367 = shalt.err (!%p364_p9)
}
  0x14   :  { %31 = dma.hbm_to_vmem [thread:$0]  %s433_s2, 64, %s29_s15, [#allocation5]  }
  0x15   :  { %368 = dma.done.wait [#allocation3], 256  }
  0x16   :  { %369 = vsyncadd [#allocation3], 4294967040 }
  0x17   :  { %370 = dma.done.wait [#allocation5], 64  }
  0x18   :  { %371 = vsyncadd [#allocation5], 4294967232  ;;  %v374_v0 = vmov 0   ;;  %v43_v1 = vld [vmem:[#allocation2] sm:$0xff]  ;;  %vm94_vm0 = vcmask 1043456   ;;  %v44_v2 = vld [vmem:[#allocation2 + $0x8] sm:$0xff]  ;;  %v47_v11 = vlaneseq }
  0x19   :  { %139 = vmatprep.mubr.bf16.mxu0 %v374_v0  ;;  %192 = vmatprep.mubr.bf16.mxu1 %v374_v0  ;;  %v294_v3 = vcombine.high %v43_v1, %v43_v1  ;;  %v296_v4 = vcombine.high %v44_v2, %v44_v2  ;;  %v293_v5 = vcombine.low %v43_v1, %v43_v1  ;;  %v326_v9 = vld [vmem:[%s431_s0] sm:$0xff]   ;;  %vm87_vm1 = vcmask 64512   ;;  %v327_v10 = vld [vmem:[%s431_s0 + $0x8] sm:$0xff]   ;;  %v45_v15 = vld [vmem:[#allocation4] sm:$0xf] }
  0x1a   :  { %v295_v6 = vcombine.low %v44_v2, %v44_v2  ;;  %v48_v12 = vshrl.u32 %v47_v11, 7 }
  0x1b   :  { %297 = vmatprep.subr.msk.bf16.mxu0 %vm94_vm0, %v294_v3  ;;  %300 = vmatprep.subr.msk.bf16.mxu1 %vm94_vm0, %v296_v4  ;;  %v96_v7 = vsel %vm94_vm0, %v293_v5, 0 }
  0x1c   :  { %v102_v8 = vsel %vm94_vm0, %v295_v6, 0  ;;  %122 = vmatpush1.bf16.msra.mxu0 %v96_v7  ;;  %v49_v13 = vsub.s32 0, %v48_v12  ;;  %v57_v14 = vsub.s32 2, %v48_v12  ;;  %v53_v16 = vsub.s32 1, %v48_v12 }
  0x1d   :  { %175 = vmatpush1.bf16.msra.mxu1 %v102_v8  ;;  %v61_v17 = vsub.s32 3, %v48_v12 }
  0x1e   :  { %v50_v18 = vrot.slane %v45_v15, %v49_v13  ;;  %v58_v19 = vrot.slane %v45_v15, %v57_v14  ;;  %v54_v20 = vrot.slane %v45_v15, %v53_v16 }
  0x1f   :  { %298 = vmatmul.mubr.msk.bf16.vlgmr.msra.gmra.mxu0 %vm87_vm1, %v326_v9  ;;  %v62_v21 = vrot.slane %v45_v15, %v61_v17 }
  0x20   :  { %301 = vmatmul.mubr.msk.bf16.vlgmr.msra.gmra.mxu1 %vm87_vm1, %v326_v9  ;;  %149 = vmatprep.mubr.bf16.mxu0 %v374_v0 }
  0x21   :  { %202 = vmatprep.mubr.bf16.mxu1 %v374_v0 }
  0x27   :  { %299 = vmatmul.mubr.msk.bf16.gmra.mxu0 %vm87_vm1, %v327_v10 }
  0x28   :  { %302 = vmatmul.mubr.msk.bf16.gmra.mxu1 %vm87_vm1, %v327_v10 }
  0xdf   :  { %v141_v22 = vpop.f32.mrf.mxu0 }
  0xe0   :  { %v194_v23 = vpop.f32.mrf.mxu1  ;;  %v142_v24 = vadd.f32 %v141_v22, %v50_v18 }
  0xe1   :  { %v195_v25 = vadd.f32 %v194_v23, %v58_v19  ;;  %v143_v26 = vpop.f32.mrf.mxu0 }
  0xe2   :  { %v196_v27 = vpop.f32.mrf.mxu1  ;;  %v144_v28 = vadd.f32 %v143_v26, %v54_v20  ;;  %v213_v32 = vmax.f32 %v142_v24, 0.0 }
  0xe3   :  { %v197_v29 = vadd.f32 %v196_v27, %v62_v21  ;;  %v145_v30 = vpop.f32.mrf.mxu0  ;;  %v215_v33 = vmax.f32 %v195_v25, 0.0 }
  0xe4   :  { %v198_v31 = vpop.f32.mrf.mxu1  ;;  %v214_v34 = vmax.f32 %v144_v28, 0.0  ;;  %v146_v36 = vadd.f32 %v145_v30, %v50_v18 }
  0xe5   :  { %v216_v35 = vmax.f32 %v197_v29, 0.0  ;;  %v199_v37 = vadd.f32 %v198_v31, %v58_v19  ;;  %v147_v38 = vpop.f32.mrf.mxu0 }
  0xe6   :  { %v200_v39 = vpop.f32.mrf.mxu1  ;;  %v311_v40 = vpack.c.bf16 %v214_v34, %v213_v32  ;;  %v148_v42 = vadd.f32 %v147_v38, %v54_v20  ;;  %v217_v48 = vmax.f32 %v146_v36, 0.0 }
  0xe7   :  { %v312_v41 = vpack.c.bf16 %v216_v35, %v215_v33  ;;  %v201_v43 = vadd.f32 %v200_v39, %v62_v21  ;;  %v151_v44 = vpop.f32.mrf.mxu0  ;;  %v219_v49 = vmax.f32 %v199_v37, 0.0 }
  0xe8   :  { %v204_v45 = vpop.f32.mrf.mxu1  ;;  %277 = vst [vmem:[%s434_s3] sm:$0xff] %v311_v40  ;;  %v152_v46 = vadd.f32 %v151_v44, %v50_v18  ;;  %v218_v50 = vmax.f32 %v148_v42, 0.0 }
  0xe9   :  { %278 = vst [vmem:[%s434_s3 + $0x8] sm:$0xff] %v312_v41  ;;  %v205_v47 = vadd.f32 %v204_v45, %v58_v19  ;;  %v220_v51 = vmax.f32 %v201_v43, 0.0  ;;  %v153_v52 = vpop.f32.mrf.mxu0 }
  0xea   :  { %v206_v53 = vpop.f32.mrf.mxu1  ;;  %v154_v54 = vadd.f32 %v153_v52, %v54_v20  ;;  %v313_v56 = vpack.c.bf16 %v218_v50, %v217_v48  ;;  %v221_v60 = vmax.f32 %v152_v46, 0.0 }
  0xeb   :  { %v207_v55 = vadd.f32 %v206_v53, %v62_v21  ;;  %v314_v57 = vpack.c.bf16 %v220_v51, %v219_v49  ;;  %v155_v58 = vpop.f32.mrf.mxu0  ;;  %v223_v61 = vmax.f32 %v205_v47, 0.0 }
  0xec   :  { %v208_v59 = vpop.f32.mrf.mxu1  ;;  %v222_v62 = vmax.f32 %v154_v54, 0.0  ;;  %279 = vst [vmem:[%s434_s3 + $0x10] sm:$0xff] %v313_v56  ;;  %v156_v0 = vadd.f32 %v155_v58, %v50_v18 }
  0xed   :  { %v224_v63 = vmax.f32 %v207_v55, 0.0  ;;  %280 = vst [vmem:[%s434_s3 + $0x18] sm:$0xff] %v314_v57  ;;  %v209_v1 = vadd.f32 %v208_v59, %v58_v19  ;;  %v157_v2 = vpop.f32.mrf.mxu0 }
  0xee   :  { %v210_v3 = vpop.f32.mrf.mxu1  ;;  %v315_v4 = vpack.c.bf16 %v222_v62, %v221_v60  ;;  %v158_v6 = vadd.f32 %v157_v2, %v54_v20  ;;  %v225_v8 = vmax.f32 %v156_v0, 0.0 }
  0xef   :  { %v316_v5 = vpack.c.bf16 %v224_v63, %v223_v61  ;;  %v211_v7 = vadd.f32 %v210_v3, %v62_v21  ;;  %v227_v9 = vmax.f32 %v209_v1, 0.0 }
  0xf0   :  { %281 = vst [vmem:[%s434_s3 + $0x20] sm:$0xff] %v315_v4  ;;  %v226_v10 = vmax.f32 %v158_v6, 0.0 }
  0xf1   :  { %282 = vst [vmem:[%s434_s3 + $0x28] sm:$0xff] %v316_v5  ;;  %v228_v11 = vmax.f32 %v211_v7, 0.0 }
  0xf2   :  { %v317_v12 = vpack.c.bf16 %v226_v10, %v225_v8 }
  0xf3   :  { %v318_v13 = vpack.c.bf16 %v228_v11, %v227_v9 }
  0xf4   :  { %283 = vst [vmem:[%s434_s3 + $0x30] sm:$0xff] %v317_v12 }
  0xf5   :  { %284 = vst [vmem:[%s434_s3 + $0x38] sm:$0xff] %v318_v13 }
  0xf6   :  { %289 = vsyncpa [#allocation3], 1 }
  0xf7   :  { %290 = vsyncpa [#allocation5], 1 }

// kernel: end2end_forward.4
= control target key start
LH: loop header
LB: loop body
LE: loop exit
PB: predicated region body
PF: predicated region fallthrough
CT: control target
= control target key end

     0   :  { %s2870_s21 = smov [#allocation3]   ;;  %s2871_s24 = smov [#allocation4]   ;;  %s3500_s0 = inlined_call_operand.hbm [shape: s32[32], index: 0, kind: input, shape index: {}]   ;;  %s3501_s2 = inlined_call_operand.vmem [shape: bf16[5,2,2,512], index: 2, kind: input, shape index: {}]   ;;  %s3502_s3 = inlined_call_operand.hbm [shape: bf16[2,8,2], index: 3, kind: input, shape index: {}]   ;;  %s3503_s4 = inlined_call_operand.vmem [shape: bf16[2,2,512,32], index: 4, kind: input, shape index: {}]   ;;  %s3504_s5 = inlined_call_operand.hbm [shape: f32[1,32], index: 5, kind: input, shape index: {}]   ;;  %s3505_s6 = inlined_call_operand.vmem [shape: bf16[5,8,8,32], index: 6, kind: output, shape index: {}]   ;;  %s3506_s1 = inlined_call_operand.hbm [shape: s32[16], index: 1, kind: input, shape index: {}]  }
   0x1   :  { %12 = dma.hbm_to_smem %s3500_s0, 16, %s2870_s21, [#allocation2] }
   0x2   :  { %14 = dma.hbm_to_smem %s3506_s1, 16, %s2871_s24, [#allocation2] }
   0x3   :  { %2840 = dma.done.wait [#allocation2], 32 }
   0x4   :  { %2841 = vsyncadd [#allocation2], 4294967264 }
   0x5   :  { %16 = sfence }
   0x6   :  { %17 = vsyncpa [#allocation6], 0 }
   0x7   :  { %18 = vsyncpa [#allocation8], 0  ;;  %s2920_s27 = smov 0   ;;  %s2922_s28 = smov 0  }
   0x8   :  { %s2924_s29 = smov 0   ;;  %s2926_s30 = smov 0  }
   0x9   :  { %s2928_s7 = smov 0  }
   0xa LB: > { %s2003_s0 = sadd.s32 4294967295, %s2868_s7   ;;  %s33_s1 = sadd.s32 1, %s2860_s29  ;;  %s2868_s7 = sphi %s2928_s7, %s24_s7   ;;  %s2864_s30 = sphi %s2926_s30, %s3513_s30   ;;  %s2860_s29 = sphi %s2924_s29, %s3512_s29   ;;  %s2856_s28 = sphi %s2922_s28, %s3511_s28   ;;  %s2852_s27 = sphi %s2920_s27, %s3510_s27  }
   0xb   : > { %p34_p0 = scmp.ge.s32.totalorder %s33_s1, 8  ;;  %s36_s8 = sadd.s32 1, %s2864_s30 }
   0xc   : > { %p2005_p1 = scmp.ge.s32.totalorder %s2868_s7, 1  ;;  %p158_p2 = scmp.lt.s32.totalorder %s2868_s7, 41 }
   0xd   : > { %s3515_s1 = smov (%p34_p0, %s33_s1), 0  ;;  %s3517_s8 = smov (!%p34_p0, %s36_s8), %s2864_s30 }
   0xe   : > { %p2953_p3 = pnand %p2005_p1, %p158_p2  ;;  %p38_p4 = scmp.ge.s32.totalorder %s3517_s8, 5 }
   0xf   : > { %p2957_p5 = scmp.eq.s32.totalorder %s2003_s0, 0  ;;  %s2872_s11 = smov [#allocation5]  }
  0x10   : > { %p2564_p6 = pneg %p2953_p3  ;;  %s3519_s8 = smov (%p38_p4, %s3517_s8), 0 }
  0x11   : > { %s170_s12 = sshll.u32 %s2872_s11, 4  ;;  %s171_s12 = int_to_ptr.vmem [resolvable:$true] %s170_s12 }
  0x12   : > { %p2967_p7 = pnand %p2957_p5, %p2564_p6  ;;  %s2779_s14 = scalar_lea.vmem %s171_s12, 128 }
  0x13   : > { %p2780_p9 = scmp.ne.s32.totalorder %s171_s12, %s2779_s14  ;;  %p2787_p12 = scmp.lt.s32.totalorder %s171_s12, %s171_s12 }
  0x14   : > { %p2770_p8 = pneg %p2967_p7  ;;  %p2788_p13 = scmp.lt.s32.totalorder %s2779_s14, %s2779_s14 }
  0x16   : > { %p2782_p10 = pnand %p2780_p9, %p2770_p8  ;;  %p2789_p0 = por %p2788_p13, %p2787_p12 }
  0x18   : > { %p2783_p11 = pneg %p2782_p10 }
  0x1a   : > { %p2790_p1 = pnand %p2789_p0, %p2783_p11 }
  0x1c   : > { %2793 = shalt.err (!%p2790_p1)
}
  0x1d   : > { %s2873_s15 = smov 64   ;;  %s2874_s16 = smov 4  }
  0x1e   : > { %2567 = dma.hbm_to_vmem [thread:$0]  (!%p2967_p7), %s3502_s3, 128, %s171_s12, [#allocation6], %s2873_s15, %s2873_s15, %s2874_s16  }
  0x1f   : > { %s2875_s19 = smov [#allocation7]  }
  0x20   : > { %s187_s20 = sshll.u32 %s2875_s19, 4  ;;  %s188_s20 = int_to_ptr.vmem [resolvable:$true] %s187_s20 }
  0x21   : > { %s2805_s21 = scalar_lea.vmem %s188_s20, 16  ;;  %s2812_s22 = scalar_lea.vmem %s188_s20, 32 }
  0x22   : > { %p2806_p2 = scmp.ne.s32.totalorder %s188_s20, %s2805_s21  ;;  %p2813_p9 = scmp.lt.s32.totalorder %s188_s20, %s188_s20 }
  0x23   : > { %p2814_p10 = scmp.lt.s32.totalorder %s2812_s22, %s2805_s21 }
  0x24   : > { %p2808_p4 = pnand %p2806_p2, %p2770_p8 }
  0x25   : > { %p2815_p11 = por %p2814_p10, %p2813_p9 }
  0x26   : > { %p2809_p6 = pneg %p2808_p4 }
  0x28   : > { %p2816_p12 = pnand %p2815_p11, %p2809_p6 }
  0x2a   : > { %2819 = shalt.err (!%p2816_p12)
}
  0x2b   : > { %2570 = dma.hbm_to_vmem [thread:$0]  (!%p2967_p7), %s3504_s5, 16, %s188_s20, [#allocation8]  }
  0x2c   : > { %207 = sbr.rel (%p2953_p3) target bundleno = 1000 (0x3e8), region = 36 }
  0x31   : > { %2843 = dma.done.wait (%p2957_p5), [#allocation6], 128  }
  0x32   : > { %2845 = vsyncadd (%p2957_p5), [#allocation6], 4294967168 }
  0x33   : > { %2847 = dma.done.wait (%p2957_p5), [#allocation8], 16  }
  0x34   : > { %2849 = vsyncadd (%p2957_p5), [#allocation8], 4294967280  ;;  %v2624_v0 = vld [vmem:[%s3503_s4 + $0x78] sm:$0xff]   ;;  %v2628_v4 = vld [vmem:[%s3503_s4 + $0x70] sm:$0xff]   ;;  %p239_p3 = scmp.lt.s32.totalorder %s2856_s28, 4  ;;  %s3037_s12 = sshll.u32 %s2852_s27, 2  ;;  %v277_v32 = vlaneseq }
  0x35   : > { %v2625_v1 = vld [vmem:[%s3503_s4 + $0xf8] sm:$0xff]   ;;  %2348 = vmatprep.subr.bf16.mxu0 %v2624_v0  ;;  %v2629_v5 = vld [vmem:[%s3503_s4 + $0xf0] sm:$0xff]   ;;  %v2632_v8 = vld [vmem:[%s3503_s4 + $0x68] sm:$0xff]   ;;  %s2016_s16 = sshll.u32 %s2852_s27, 1  ;;  %s254_s19 = sadd.s32 1, %s3037_s12  ;;  %vm2878_vm0 = vmmov 0  }
  0x36   : > { %v2626_v2 = vld [vmem:[%s3503_s4 + $0x38] sm:$0xff]   ;;  %2370 = vmatprep.subr.bf16.mxu1 %v2625_v1  ;;  %v2630_v6 = vld [vmem:[%s3503_s4 + $0x30] sm:$0xff]   ;;  %v2633_v9 = vld [vmem:[%s3503_s4 + $0xe8] sm:$0xff]   ;;  %s3521_s28 = smov (!%p239_p3, %s2856_s28), 4  ;;  %s3062_s24 = sld [smem:[#allocation3 + %s3037_s12]]  ;;  %v278_v40 = vshrl.u32 %v277_v32, 7 }
  0x37   : > { %v2627_v3 = vld [vmem:[%s3503_s4 + $0xb8] sm:$0xff]   ;;  %2349 = vmatpush3.bf16.msra.mxu0 %v2626_v2  ;;  %v2631_v7 = vld [vmem:[%s3503_s4 + $0xb0] sm:$0xff]   ;;  %v2634_v10 = vld [vmem:[%s3503_s4 + $0x28] sm:$0xff]   ;;  %s3067_s0 = sld [smem:[#allocation3 + %s254_s19]]  ;;  %s2012_s22 = sshll.u32 %s3521_s28, 3  ;;  %vm980_vm1 = vcmask 1040384  }
  0x38   : > { %2371 = vmatpush3.bf16.msra.mxu1 %v2627_v3  ;;  %2350 = vmatprep.subr.bf16.mxu0 %v2628_v4  ;;  %v2635_v11 = vld [vmem:[%s3503_s4 + $0xa8] sm:$0xff]   ;;  %v2636_v12 = vld [vmem:[%s3503_s4 + $0x60] sm:$0xff]   ;;  %v2640_v16 = vld [vmem:[%s3503_s4 + $0x58] sm:$0xff]   ;;  %s3074_s13 = sld [smem:[#allocation4 + %s2016_s16]]  ;;  %s3103_s17 = scalar_lea.vmem %s3501_s2, %s2012_s22  ;;  %v2876_v30 = vmov 1983009808  }
  0x39   : > { %2372 = vmatprep.subr.bf16.mxu1 %v2629_v5  ;;  %v2637_v13 = vld [vmem:[%s3503_s4 + $0xe0] sm:$0xff]   ;;  %v2641_v17 = vld [vmem:[%s3503_s4 + $0xd8] sm:$0xff]   ;;  %v2644_v20 = vld [vmem:[%s3503_s4 + $0x50] sm:$0xff]   ;;  %v275_v31 = vunpack.c.l.s4 %v2876_v30  ;;  %s1072_s11 = sadd.s32 3, %s3037_s12  ;;  %s1070_s9 = sadd.s32 2, %s3037_s12  ;;  %vm976_vm2 = vcmask 15360  }
  0x3a   : > { %v2638_v14 = vld [vmem:[%s3503_s4 + $0x20] sm:$0xff]   ;;  %v2642_v18 = vld [vmem:[%s3503_s4 + $0x18] sm:$0xff]   ;;  %v2645_v21 = vld [vmem:[%s3503_s4 + $0xd0] sm:$0xff]   ;;  %s1073_s14 = sld [smem:[#allocation3 + %s1072_s11]]  ;;  %p245_p5 = scmp.lt.s32.totalorder %s2852_s27, 7  ;;  %vm1890_vm3 = vcmask 257024  }
  0x3b   : > { %2351 = vmatpush3.bf16.msra.mxu0 %v2630_v6  ;;  %v2639_v15 = vld [vmem:[%s3503_s4 + $0xa0] sm:$0xff]   ;;  %v2643_v19 = vld [vmem:[%s3503_s4 + $0x98] sm:$0xff]   ;;  %v2646_v22 = vld [vmem:[%s3503_s4 + $0x10] sm:$0xff]   ;;  %v276_v39 = vunpack.c.0.s8 %v275_v31 }
  0x3c   : > { %2373 = vmatpush3.bf16.msra.mxu1 %v2631_v7  ;;  %2352 = vmatprep.subr.bf16.mxu0 %v2632_v8  ;;  %v2647_v23 = vld [vmem:[%s3503_s4 + $0x90] sm:$0xff]   ;;  %v2648_v24 = vld [vmem:[%s3503_s4 + $0x48] sm:$0xff]   ;;  %s2017_s18 = sshll.u32 %s3062_s24, 2  ;;  %v2652_v28 = vld [vmem:[%s3503_s4 + $0x40] sm:$0xff]   ;;  %s1071_s24 = sld [smem:[#allocation3 + %s1070_s9]] }
  0x3d   : > { %2374 = vmatprep.subr.bf16.mxu1 %v2633_v9  ;;  %v2649_v25 = vld [vmem:[%s3503_s4 + $0xc8] sm:$0xff]   ;;  %s2018_s23 = sshll.u32 %s3067_s0, 2  ;;  %v2653_v29 = vld [vmem:[%s3503_s4 + $0xc0] sm:$0xff]   ;;  %s261_s10 = scalar_lea.vmem %s3103_s17, %s2017_s18  ;;  %v2656_v41 = vld [vmem:[%s3503_s4 + $0x178] sm:$0xff]   ;;  %v3134_v46 = vsub.s32 %v276_v39, %v278_v40 }
  0x3e   : > { %v2650_v26 = vld [vmem:[%s3503_s4 + $0x8] sm:$0xff]   ;;  %s258_s21 = scvt.s32.f32 %s3074_s13  ;;  %s265_s15 = scalar_lea.vmem %s3103_s17, %s2018_s23  ;;  %v2654_v33 = vld [vmem:[%s3503_s4] sm:$0xff]   ;;  %v2657_v43 = vld [vmem:[%s3503_s4 + $0x1f8] sm:$0xff]  }
  0x3f   : > { %2353 = vmatpush3.bf16.msra.mxu0 %v2634_v10  ;;  %v2651_v27 = vld [vmem:[%s3503_s4 + $0x88] sm:$0xff]   ;;  %v2655_v34 = vld [vmem:[%s3503_s4 + $0x80] sm:$0xff]   ;;  %v2658_v53 = vld [vmem:[%s3503_s4 + $0x138] sm:$0xff]   ;;  %s3523_s27 = smov (!%p245_p5, %s2852_s27), 7 }
  0x40   : > { %2375 = vmatpush3.bf16.msra.mxu1 %v2635_v11  ;;  %2354 = vmatprep.subr.bf16.mxu0 %v2636_v12  ;;  %s259_s19 = smul.f32 9.536743e-07, %s258_s21  ;;  %v262_v35 = vld [vmem:[%s261_s10] sm:$0xf]  ;;  %v2659_v56 = vld [vmem:[%s3503_s4 + $0x1b8] sm:$0xff]   ;;  %v2660_v58 = vld [vmem:[%s3503_s4 + $0x170] sm:$0xff]   ;;  %s1074_s10 = sadd.s32 1, %s2016_s16 }
  0x41   : > { %2376 = vmatprep.subr.bf16.mxu1 %v2637_v13  ;;  %v266_v36 = vld [vmem:[%s265_s15] sm:$0xf]  ;;  %v263_v37 = vunpack.c.l.bf16 %v262_v35  ;;  %v2661_v60 = vld [vmem:[%s3503_s4 + $0x1f0] sm:$0xff]   ;;  %v2664_v63 = vld [vmem:[%s3503_s4 + $0x168] sm:$0xff]   ;;  %s1075_s15 = sld [smem:[#allocation4 + %s1074_s10]]  ;;  %s2150_s0 = sshll.u32 %s1073_s14, 2 }
  0x42   : > { %v267_v38 = vunpack.c.l.bf16 %v266_v36  ;;  %v269_v42 = vstv %s259_s19  ;;  %v2662_v61 = vld [vmem:[%s3503_s4 + $0x130] sm:$0xff]   ;;  %v2665_v0 = vld [vmem:[%s3503_s4 + $0x1e8] sm:$0xff]   ;;  %v2668_v3 = vld [vmem:[%s3503_s4 + $0x160] sm:$0xff]   ;;  %s2149_s13 = sshll.u32 %s1071_s24, 2  ;;  %s1083_s19 = scalar_lea.vmem %s3103_s17, %s2150_s0 }
  0x43   : > { %2355 = vmatpush3.bf16.msra.mxu0 %v2638_v14  ;;  %v2663_v62 = vld [vmem:[%s3503_s4 + $0x1b0] sm:$0xff]   ;;  %v2666_v1 = vld [vmem:[%s3503_s4 + $0x128] sm:$0xff]   ;;  %v2669_v4 = vld [vmem:[%s3503_s4 + $0x1e0] sm:$0xff]   ;;  %s1079_s20 = scalar_lea.vmem %s3103_s17, %s2149_s13  ;;  %s248_s17 = sadd.s32 %s2012_s22, %s3523_s27 }
  0x44   : > { %2377 = vmatpush3.bf16.msra.mxu1 %v2639_v15  ;;  %2356 = vmatprep.subr.bf16.mxu0 %v2640_v16  ;;  %v268_v44 = vsub.f32 %v267_v38, %v263_v37  ;;  %v2667_v2 = vld [vmem:[%s3503_s4 + $0x1a8] sm:$0xff]   ;;  %v2670_v5 = vld [vmem:[%s3503_s4 + $0x120] sm:$0xff]   ;;  %v2672_v7 = vld [vmem:[%s3503_s4 + $0x158] sm:$0xff]   ;;  %s2014_s23 = sshll.u32 %s248_s17, 2 }
  0x45   : > { %2378 = vmatprep.subr.bf16.mxu1 %v2641_v17  ;;  %v2671_v6 = vld [vmem:[%s3503_s4 + $0x1a0] sm:$0xff]   ;;  %v2673_v8 = vld [vmem:[%s3503_s4 + $0x1d8] sm:$0xff]   ;;  %v2676_v11 = vld [vmem:[%s3503_s4 + $0x150] sm:$0xff]   ;;  %s250_s11 = scalar_lea.vmem %s3505_s6, %s2014_s23 }
  0x46   : > { %v270_v45 = vmul.f32 %v269_v42, %v268_v44  ;;  %v2674_v9 = vld [vmem:[%s3503_s4 + $0x118] sm:$0xff]   ;;  %v2677_v12 = vld [vmem:[%s3503_s4 + $0x1d0] sm:$0xff]   ;;  %v2680_v14 = vld [vmem:[%s3503_s4 + $0x148] sm:$0xff]  }
  0x47   : > { %2357 = vmatpush3.bf16.msra.mxu0 %v2642_v18  ;;  %v2675_v10 = vld [vmem:[%s3503_s4 + $0x198] sm:$0xff]   ;;  %v2678_v13 = vld [vmem:[%s3503_s4 + $0x110] sm:$0xff]   ;;  %v2681_v16 = vld [vmem:[%s3503_s4 + $0x1c8] sm:$0xff]   ;;  %s1076_s25 = scvt.s32.f32 %s1075_s15 }
  0x48   : > { %2379 = vmatpush3.bf16.msra.mxu1 %v2643_v19  ;;  %2358 = vmatprep.subr.bf16.mxu0 %v2644_v20  ;;  %v271_v47 = vadd.f32 %v270_v45, %v263_v37  ;;  %v2679_v15 = vld [vmem:[%s3503_s4 + $0x190] sm:$0xff]   ;;  %v2682_v17 = vld [vmem:[%s3503_s4 + $0x108] sm:$0xff]   ;;  %v2684_v18 = vld [vmem:[%s3503_s4 + $0x140] sm:$0xff]  }
  0x49   : > { %2380 = vmatprep.subr.bf16.mxu1 %v2645_v21  ;;  %v2683_v19 = vld [vmem:[%s3503_s4 + $0x188] sm:$0xff]   ;;  %v2685_v20 = vld [vmem:[%s3503_s4 + $0x1c0] sm:$0xff]   ;;  %s1077_s18 = smul.f32 9.536743e-07, %s1076_s25 }
  0x4a   : > { %v280_v48 = vrot.slane %v271_v47, %v3134_v46  ;;  %v273_v49 = vcombine.high %v271_v47, %v271_v47  ;;  %v2686_v21 = vld [vmem:[%s3503_s4 + $0x100] sm:$0xff]  }
  0x4b   : > { %2359 = vmatpush3.bf16.msra.mxu0 %v2646_v22  ;;  %v2687_v22 = vld [vmem:[%s3503_s4 + $0x180] sm:$0xff]  }
  0x4c   : > { %2381 = vmatpush3.bf16.msra.mxu1 %v2647_v23  ;;  %2360 = vmatprep.subr.bf16.mxu0 %v2648_v24  ;;  %v288_v50 = vcombine.high %v280_v48, %v280_v48  ;;  %v287_v51 = vrot.slane %v273_v49, %v3134_v46  ;;  %v3138_v52 = vpack.c.bf16 %v280_v48, %v280_v48  ;;  %v2877_v23 = vmov 0.0   ;;  %v1080_v24 = vld [vmem:[%s1079_s20] sm:$0xf]  ;;  %v2688_v48 = vld [vmem:[%s3503_s4 + $0x2f8] sm:$0xff]  }
  0x4d   : > { %2382 = vmatprep.subr.bf16.mxu1 %v2649_v25  ;;  %v1084_v25 = vld [vmem:[%s1083_s19] sm:$0xf] }
  0x4e   : > { %v295_v54 = vpack.c.bf16 %v288_v50, %v288_v50  ;;  %v289_v55 = vcombine.high %v287_v51, %v287_v51  ;;  %v3146_v57 = vpack.c.bf16 %v287_v51, %v287_v51  ;;  %v3257_v50 = vld [vmem:[#allocation5] sm:$0xf]  ;;  %v2689_v51 = vld [vmem:[%s3503_s4 + $0x2b8] sm:$0xff]  }
  0x4f   : > { %2361 = vmatpush3.bf16.msra.mxu0 %v2650_v26  ;;  %v1081_v26 = vunpack.c.l.bf16 %v1080_v24  ;;  %v2697_v24 = vld [vmem:[%s3503_s4 + $0x230] sm:$0xff]  }
  0x50   : > { %2383 = vmatpush3.bf16.msra.mxu1 %v2651_v27  ;;  %2362 = vmatprep.subr.bf16.mxu0 %v2652_v28  ;;  %v297_v59 = vpack.c.bf16 %v289_v55, %v289_v55  ;;  %v1085_v27 = vunpack.c.l.bf16 %v1084_v25  ;;  %v2694_v55 = vld [vmem:[%s3503_s4 + $0x2e8] sm:$0xff]  }
  0x51   : > { %2384 = vmatprep.subr.bf16.mxu1 %v2653_v29  ;;  %586 = vmatprep.mubr.bf16.mxu0 %v295_v54  ;;  %v1087_v29 = vstv %s1077_s18  ;;  %v2700_v25 = vld [vmem:[%s3503_s4 + $0x268] sm:$0xff]  }
  0x52   : > { %626 = vmatprep.mubr.bf16.mxu1 %v297_v59  ;;  %v1086_v28 = vsub.f32 %v1085_v27, %v1081_v26  ;;  %v2704_v27 = vld [vmem:[%s3503_s4 + $0x260] sm:$0xff]  }
  0x53   : > { %2363 = vmatpush3.bf16.msra.mxu0 %v2654_v33 }
  0x54   : > { %2385 = vmatpush3.bf16.msra.mxu1 %v2655_v34  ;;  %2392 = vmatprep.subr.bf16.mxu0 %v2656_v41  ;;  %v1088_v30 = vmul.f32 %v1087_v29, %v1086_v28  ;;  %v2705_v28 = vld [vmem:[%s3503_s4 + $0x220] sm:$0xff]   ;;  %v2708_v29 = vld [vmem:[%s3503_s4 + $0x258] sm:$0xff]  }
  0x55   : > { %2414 = vmatprep.subr.bf16.mxu1 %v2657_v43 }
  0x56   : > { %587 = vmatmul.mubr.bf16.vlgmr.msra.gmra.mxu0 %v3138_v52  ;;  %v1089_v31 = vadd.f32 %v1088_v30, %v1081_v26  ;;  %v2701_v26 = vld [vmem:[%s3503_s4 + $0x228] sm:$0xff]   ;;  %v2709_v30 = vld [vmem:[%s3503_s4 + $0x218] sm:$0xff]  }
  0x57   : > { %2393 = vmatpush3.bf16.msra.mxu0 %v2658_v53  ;;  %627 = vmatmul.mubr.bf16.vlgmr.msra.gmra.mxu1 %v3146_v57  ;;  %v2690_v53 = vld [vmem:[%s3503_s4 + $0x2f0] sm:$0xff]  }
  0x58   : > { %2394 = vmatprep.subr.bf16.mxu0 %v2660_v58  ;;  %2415 = vmatpush3.bf16.msra.mxu1 %v2659_v56  ;;  %v1091_v33 = vcombine.high %v1089_v31, %v1089_v31  ;;  %v2695_v56 = vld [vmem:[%s3503_s4 + $0x2a8] sm:$0xff]   ;;  %v2699_v58 = vld [vmem:[%s3503_s4 + $0x2a0] sm:$0xff]  }
  0x59   : > { %925 = vmatprep.mubr.bf16.mxu0 %v295_v54  ;;  %2416 = vmatprep.subr.bf16.mxu1 %v2661_v60  ;;  %v2691_v54 = vld [vmem:[%s3503_s4 + $0x2b0] sm:$0xff]   ;;  %v2703_v60 = vld [vmem:[%s3503_s4 + $0x298] sm:$0xff]  }
  0x5a   : > { %965 = vmatprep.mubr.bf16.mxu1 %v297_v59  ;;  %v3249_v39 = vrot.slane %v1091_v33, %v3134_v46  ;;  %v2702_v59 = vld [vmem:[%s3503_s4 + $0x2d8] sm:$0xff]   ;;  %v2716_v33 = vld [vmem:[%s3503_s4 + $0x248] sm:$0xff]  }
  0x5b   : > { %2395 = vmatpush3.bf16.msra.mxu0 %v2662_v61  ;;  %v2706_v61 = vld [vmem:[%s3503_s4 + $0x2d0] sm:$0xff]  }
  0x5c   : > { %2396 = vmatprep.subr.bf16.mxu0 %v2664_v63  ;;  %2417 = vmatpush3.bf16.msra.mxu1 %v2663_v62  ;;  %v1107_v45 = vcombine.high %v3249_v39, %v3249_v39  ;;  %v2707_v63 = vld [vmem:[%s3503_s4 + $0x290] sm:$0xff]  }
  0x5d   : > { %2418 = vmatprep.subr.bf16.mxu1 %v2665_v0  ;;  %v2710_v0 = vld [vmem:[%s3503_s4 + $0x2c8] sm:$0xff]  }
  0x5f   : > { %2397 = vmatpush3.bf16.msra.mxu0 %v2666_v1 }
  0x60   : > { %2398 = vmatprep.subr.bf16.mxu0 %v2668_v3  ;;  %2419 = vmatpush3.bf16.msra.mxu1 %v2667_v2 }
  0x61   : > { %2420 = vmatprep.subr.bf16.mxu1 %v2669_v4 }
  0x63   : > { %2399 = vmatpush3.bf16.msra.mxu0 %v2670_v5 }
  0x64   : > { %2400 = vmatprep.subr.bf16.mxu0 %v2672_v7  ;;  %2421 = vmatpush3.bf16.msra.mxu1 %v2671_v6  ;;  %v2711_v6 = vld [vmem:[%s3503_s4 + $0x288] sm:$0xff]   ;;  %v1098_v7 = vrot.slane %v1089_v31, %v3134_v46  ;;  %v2692_v46 = vld [vmem:[%s3503_s4 + $0x278] sm:$0xff]   ;;  %v2712_v31 = vld [vmem:[%s3503_s4 + $0x250] sm:$0xff]  }
  0x65   : > { %2422 = vmatprep.subr.bf16.mxu1 %v2673_v8 }
  0x67   : > { %2401 = vmatpush3.bf16.msra.mxu0 %v2674_v9  ;;  %v2714_v9 = vld [vmem:[%s3503_s4 + $0x2c0] sm:$0xff]  }
  0x68   : > { %2402 = vmatprep.subr.bf16.mxu0 %v2676_v11  ;;  %2423 = vmatpush3.bf16.msra.mxu1 %v2675_v10 }
  0x69   : > { %2424 = vmatprep.subr.bf16.mxu1 %v2677_v12 }
  0x6b   : > { %2403 = vmatpush3.bf16.msra.mxu0 %v2678_v13 }
  0x6c   : > { %2404 = vmatprep.subr.bf16.mxu0 %v2680_v14  ;;  %2425 = vmatpush3.bf16.msra.mxu1 %v2679_v15  ;;  %v2715_v14 = vld [vmem:[%s3503_s4 + $0x280] sm:$0xff]   ;;  %v1106_v15 = vcombine.high %v1098_v7, %v1098_v7 }
  0x6d   : > { %2426 = vmatprep.subr.bf16.mxu1 %v2681_v16 }
  0x6f   : > { %2405 = vmatpush3.bf16.msra.mxu0 %v2682_v17 }
  0x70   : > { %2406 = vmatprep.subr.bf16.mxu0 %v2684_v18  ;;  %2427 = vmatpush3.bf16.msra.mxu1 %v2683_v19  ;;  %v3316_v18 = vpack.c.bf16 %v3249_v39, %v3249_v39  ;;  %v3318_v19 = vld [vmem:[#allocation5 + $0x4] sm:$0xf]  ;;  %v2721_v39 = vld [vmem:[%s3503_s4 + $0x338] sm:$0xff]  }
  0x71   : > { %2428 = vmatprep.subr.bf16.mxu1 %v2685_v20  ;;  %v2693_v20 = vld [vmem:[%s3503_s4 + $0x238] sm:$0xff]  }
  0x73   : > { %2407 = vmatpush3.bf16.msra.mxu0 %v2686_v21  ;;  %v1113_v21 = vpack.c.bf16 %v1106_v15, %v1106_v15  ;;  %v2725_v15 = vld [vmem:[%s3503_s4 + $0x3b8] sm:$0xff]  }
  0x74   : > { %2429 = vmatpush3.bf16.msra.mxu1 %v2687_v22  ;;  %2532 = vmatprep.subr.bf16.mxu0 %v2877_v23  ;;  %v2696_v22 = vld [vmem:[%s3503_s4 + $0x270] sm:$0xff]  }
  0x75   : > { %2538 = vmatprep.subr.bf16.mxu1 %v2877_v23 }
  0x76   : > { %926 = vmatmul.mubr.bf16.vlgmr.msra.gmra.mxu0 %v3138_v52  ;;  %v3262_v52 = vpack.c.bf16 %v1107_v45, %v1107_v45  ;;  %v2731_v45 = vld [vmem:[%s3503_s4 + $0x320] sm:$0xff]  }
  0x77   : > { %966 = vmatmul.mubr.bf16.vlgmr.msra.gmra.mxu1 %v3146_v57  ;;  %2534 = vmatprep.mubr.msk.bf16.mxu0 %vm2878_vm0, %v2877_v23  ;;  %v2698_v57 = vld [vmem:[%s3503_s4 + $0x2e0] sm:$0xff]  }
  0x78   : > { %2540 = vmatprep.mubr.msk.bf16.mxu1 %vm2878_vm0, %v2877_v23 }
 0x116   : > { %v2364_v32 = vpop.f32.mrf.mxu0 }
 0x117   : > { %v2386_v34 = vpop.f32.mrf.mxu1 }
 0x118   : > { %v2365_v35 = vpop.f32.mrf.mxu0 }
 0x119   : > { %v2366_v36 = vadd.f32 %v2365_v35, %v2364_v32  ;;  %v2387_v37 = vpop.f32.mrf.mxu1  ;;  %v2713_v32 = vld [vmem:[%s3503_s4 + $0x210] sm:$0xff]   ;;  %v2718_v35 = vld [vmem:[%s3503_s4 + $0x240] sm:$0xff]  }
 0x11a   : > { %v2367_v38 = vpop.f32.mrf.mxu0  ;;  %v2388_v40 = vadd.f32 %v2387_v37, %v2386_v34  ;;  %v2717_v34 = vld [vmem:[%s3503_s4 + $0x208] sm:$0xff]   ;;  %v1112_v37 = vpack.c.bf16 %v1098_v7, %v1098_v7 }
 0x11b   : > { %v2389_v41 = vpop.f32.mrf.mxu1  ;;  %v2720_v38 = vld [vmem:[%s3503_s4 + $0x378] sm:$0xff]  }
 0x11c   : > { %v2368_v42 = vpop.f32.mrf.mxu0  ;;  %v629_v43 = vadd.f32 %v2388_v40, %v2366_v36  ;;  %v2719_v36 = vld [vmem:[%s3503_s4 + $0x200] sm:$0xff]   ;;  %v2722_v40 = vld [vmem:[%s3503_s4 + $0x370] sm:$0xff]  }
 0x11d   : > { %v2390_v44 = vpop.f32.mrf.mxu1  ;;  %v2723_v41 = vld [vmem:[%s3503_s4 + $0x330] sm:$0xff]   ;;  %v2726_v42 = vld [vmem:[%s3503_s4 + $0x368] sm:$0xff]  }
 0x11e   : > { %v635_v47 = vpack.c.bf16 %v629_v43, %v629_v43  ;;  %v2727_v43 = vld [vmem:[%s3503_s4 + $0x328] sm:$0xff]   ;;  %v2730_v44 = vld [vmem:[%s3503_s4 + $0x360] sm:$0xff]  }
 0x120   : > { %v1028_v49 = vsel %vm980_vm1, %v635_v47, 0  ;;  %v2734_v47 = vld [vmem:[%s3503_s4 + $0x358] sm:$0xff]  }
 0x121   : > { %2539 = vmatpush3.bf16.msra.mxu1 %v1028_v49  ;;  %v2738_v49 = vld [vmem:[%s3503_s4 + $0x350] sm:$0xff]  }
 0x122   : > { %2462 = vmatprep.subr.bf16.mxu1 %v2688_v48  ;;  %v2735_v48 = vld [vmem:[%s3503_s4 + $0x318] sm:$0xff]  }
 0x124   : > { %2541 = vmatmul.mubr.msk.bf16.vlgmr.msra.gmra.mxu1 %vm976_vm2, %v3257_v50 }
 0x125   : > { %2463 = vmatpush3.bf16.msra.mxu1 %v2689_v51  ;;  %1445 = vmatprep.mubr.bf16.mxu1 %v3262_v52  ;;  %v2739_v51 = vld [vmem:[%s3503_s4 + $0x310] sm:$0xff]  }
 0x126   : > { %2464 = vmatprep.subr.bf16.mxu1 %v2690_v53  ;;  %v2742_v53 = vld [vmem:[%s3503_s4 + $0x348] sm:$0xff]  }
 0x129   : > { %2465 = vmatpush3.bf16.msra.mxu1 %v2691_v54  ;;  %v2743_v54 = vld [vmem:[%s3503_s4 + $0x308] sm:$0xff]  }
 0x12a   : > { %2466 = vmatprep.subr.bf16.mxu1 %v2694_v55  ;;  %v2746_v55 = vld [vmem:[%s3503_s4 + $0x340] sm:$0xff]  }
 0x12d   : > { %2467 = vmatpush3.bf16.msra.mxu1 %v2695_v56  ;;  %v2747_v56 = vld [vmem:[%s3503_s4 + $0x300] sm:$0xff]  }
 0x12e   : > { %2468 = vmatprep.subr.bf16.mxu1 %v2698_v57 }
 0x131   : > { %2469 = vmatpush3.bf16.msra.mxu1 %v2699_v58 }
 0x132   : > { %2470 = vmatprep.subr.bf16.mxu1 %v2702_v59 }
 0x135   : > { %2471 = vmatpush3.bf16.msra.mxu1 %v2703_v60 }
 0x136   : > { %v2408_v62 = vpop.f32.mrf.mxu0  ;;  %2472 = vmatprep.subr.bf16.mxu1 %v2706_v61 }
 0x137   : > { %v2430_v1 = vpop.f32.mrf.mxu1 }
 0x138   : > { %v2409_v2 = vpop.f32.mrf.mxu0 }
 0x139   : > { %v2410_v3 = vadd.f32 %v2409_v2, %v2408_v62  ;;  %v2431_v4 = vpop.f32.mrf.mxu1  ;;  %2473 = vmatpush3.bf16.msra.mxu1 %v2707_v63 }
 0x13a   : > { %v2411_v5 = vpop.f32.mrf.mxu0  ;;  %v2432_v8 = vadd.f32 %v2431_v4, %v2430_v1  ;;  %2474 = vmatprep.subr.bf16.mxu1 %v2710_v0 }
 0x13b   : > { %v2433_v10 = vpop.f32.mrf.mxu1 }
 0x13c   : > { %v2412_v11 = vpop.f32.mrf.mxu0  ;;  %v968_v12 = vadd.f32 %v2432_v8, %v2410_v3 }
 0x13d   : > { %v2434_v13 = vpop.f32.mrf.mxu1  ;;  %2475 = vmatpush3.bf16.msra.mxu1 %v2711_v6 }
 0x13e   : > { %v975_v16 = vpack.c.bf16 %v968_v12, %v968_v12  ;;  %2476 = vmatprep.subr.bf16.mxu1 %v2714_v9  ;;  %v2724_v13 = vld [vmem:[%s3503_s4 + $0x3f8] sm:$0xff]  }
 0x140   : > { %v982_v17 = vsel %vm980_vm1, %v975_v16, 0  ;;  %v2728_v16 = vld [vmem:[%s3503_s4 + $0x3f0] sm:$0xff]  }
 0x141   : > { %2533 = vmatpush3.bf16.msra.mxu0 %v982_v17  ;;  %2477 = vmatpush3.bf16.msra.mxu1 %v2715_v14  ;;  %v2732_v17 = vld [vmem:[%s3503_s4 + $0x3e8] sm:$0xff]  }
 0x142   : > { %2440 = vmatprep.subr.bf16.mxu0 %v2692_v46  ;;  %2486 = vmatprep.subr.bf16.mxu1 %v2720_v38  ;;  %v2729_v46 = vld [vmem:[%s3503_s4 + $0x3b0] sm:$0xff]  }
 0x144   : > { %2535 = vmatmul.mubr.msk.bf16.vlgmr.msra.gmra.mxu0 %vm976_vm2, %v3318_v19  ;;  %1446 = vmatmul.mubr.bf16.vlgmr.msra.gmra.mxu1 %v3316_v18 }
 0x145   : > { %2441 = vmatpush3.bf16.msra.mxu0 %v2693_v20  ;;  %1405 = vmatprep.mubr.bf16.mxu0 %v1113_v21  ;;  %v2733_v20 = vld [vmem:[%s3503_s4 + $0x3a8] sm:$0xff]  }
 0x146   : > { %2442 = vmatprep.subr.bf16.mxu0 %v2696_v22  ;;  %1787 = vmatprep.mubr.bf16.mxu1 %v1113_v21  ;;  %v2740_v21 = vld [vmem:[%s3503_s4 + $0x3d8] sm:$0xff]  }
 0x147   : > { %2487 = vmatpush3.bf16.msra.mxu1 %v2721_v39  ;;  %v2741_v22 = vld [vmem:[%s3503_s4 + $0x398] sm:$0xff]  }
 0x148   : > { %2488 = vmatprep.subr.bf16.mxu1 %v2722_v40 }
 0x149   : > { %2443 = vmatpush3.bf16.msra.mxu0 %v2697_v24  ;;  %v2744_v24 = vld [vmem:[%s3503_s4 + $0x3d0] sm:$0xff]  }
 0x14a   : > { %2444 = vmatprep.subr.bf16.mxu0 %v2700_v25  ;;  %v2745_v25 = vld [vmem:[%s3503_s4 + $0x390] sm:$0xff]  }
 0x14b   : > { %2489 = vmatpush3.bf16.msra.mxu1 %v2723_v41 }
 0x14c   : > { %2490 = vmatprep.subr.bf16.mxu1 %v2726_v42 }
 0x14d   : > { %2445 = vmatpush3.bf16.msra.mxu0 %v2701_v26  ;;  %v2748_v26 = vld [vmem:[%s3503_s4 + $0x3c8] sm:$0xff]  }
 0x14e   : > { %2446 = vmatprep.subr.bf16.mxu0 %v2704_v27  ;;  %v2749_v27 = vld [vmem:[%s3503_s4 + $0x388] sm:$0xff]  }
 0x14f   : > { %2491 = vmatpush3.bf16.msra.mxu1 %v2727_v43 }
 0x150   : > { %2492 = vmatprep.subr.bf16.mxu1 %v2730_v44 }
 0x151   : > { %2447 = vmatpush3.bf16.msra.mxu0 %v2705_v28  ;;  %v2750_v28 = vld [vmem:[%s3503_s4 + $0x3c0] sm:$0xff]  }
 0x152   : > { %2448 = vmatprep.subr.bf16.mxu0 %v2708_v29  ;;  %v2751_v29 = vld [vmem:[%s3503_s4 + $0x380] sm:$0xff]  }
 0x153   : > { %2493 = vmatpush3.bf16.msra.mxu1 %v2731_v45 }
 0x154   : > { %2494 = vmatprep.subr.bf16.mxu1 %v2734_v47 }
 0x155   : > { %2449 = vmatpush3.bf16.msra.mxu0 %v2709_v30 }
 0x156   : > { %2450 = vmatprep.subr.bf16.mxu0 %v2712_v31 }
 0x157   : > { %2495 = vmatpush3.bf16.msra.mxu1 %v2735_v48 }
 0x158   : > { %2496 = vmatprep.subr.bf16.mxu1 %v2738_v49  ;;  %v2345_v49 = vld [vmem:[#allocation7] ss:$0 sm:$0xff] }
 0x159   : > { %2451 = vmatpush3.bf16.msra.mxu0 %v2713_v32 }
 0x15a   : > { %2452 = vmatprep.subr.bf16.mxu0 %v2716_v33 }
 0x15b   : > { %2497 = vmatpush3.bf16.msra.mxu1 %v2739_v51 }
 0x15c   : > { %2498 = vmatprep.subr.bf16.mxu1 %v2742_v53 }
 0x15d   : > { %2453 = vmatpush3.bf16.msra.mxu0 %v2717_v34 }
 0x15e   : > { %2454 = vmatprep.subr.bf16.mxu0 %v2718_v35 }
 0x15f   : > { %2499 = vmatpush3.bf16.msra.mxu1 %v2743_v54 }
 0x160   : > { %2500 = vmatprep.subr.bf16.mxu1 %v2746_v55 }
 0x161   : > { %2455 = vmatpush3.bf16.msra.mxu0 %v2719_v36 }
 0x162   : > { %2544 = vmatprep.subr.bf16.mxu0 %v2877_v23 }
 0x163   : > { %2501 = vmatpush3.bf16.msra.mxu1 %v2747_v56 }
 0x164   : > { %1406 = vmatmul.mubr.bf16.vlgmr.msra.gmra.mxu0 %v1112_v37  ;;  %2550 = vmatprep.subr.bf16.mxu1 %v2877_v23 }
 0x165   : > { %2546 = vmatprep.mubr.msk.bf16.mxu0 %vm2878_vm0, %v2877_v23 }
 0x166   : > { %1788 = vmatmul.mubr.bf16.vlgmr.msra.gmra.mxu1 %v1112_v37 }
 0x167   : > { %2552 = vmatprep.mubr.msk.bf16.mxu1 %vm2878_vm0, %v2877_v23 }
 0x1e4   : > { %v1064_v57 = vpop.f32.mrf.mxu1 }
 0x1e6   : > { %v2542_v58 = vpop.f32.mrf.mxu1 }
 0x1e8   : > { %v1067_v59 = vpop.f32.mrf.mxu1 }
 0x1ea   : > { %v2543_v60 = vpop.f32.mrf.mxu1 }
 0x204   : > { %v1018_v61 = vpop.f32.mrf.mxu0  ;;  %v2478_v62 = vpop.f32.mrf.mxu1 }
 0x205   : > { %v1065_v63 = vadd.f32 %v1064_v57, %v1018_v61 }
 0x206   : > { %v2536_v0 = vpop.f32.mrf.mxu0  ;;  %v2479_v1 = vpop.f32.mrf.mxu1 }
 0x207   : > { %v2480_v8 = vadd.f32 %v2479_v1, %v2478_v62 }
 0x208   : > { %v1021_v2 = vpop.f32.mrf.mxu0  ;;  %v2481_v3 = vpop.f32.mrf.mxu1 }
 0x20a   : > { %v2537_v4 = vpop.f32.mrf.mxu0  ;;  %v2482_v5 = vpop.f32.mrf.mxu1 }
 0x224   : > { %v2456_v6 = vpop.f32.mrf.mxu0 }
 0x226   : > { %v2457_v7 = vpop.f32.mrf.mxu0  ;;  %v2502_v30 = vpop.f32.mrf.mxu1 }
 0x227   : > { %v2458_v9 = vadd.f32 %v2457_v7, %v2456_v6 }
 0x228   : > { %v2459_v10 = vpop.f32.mrf.mxu0  ;;  %v2503_v31 = vpop.f32.mrf.mxu1 }
 0x229   : > { %v1448_v11 = vadd.f32 %v2480_v8, %v2458_v9  ;;  %v2504_v32 = vadd.f32 %v2503_v31, %v2502_v30 }
 0x22a   : > { %v2460_v23 = vpop.f32.mrf.mxu0  ;;  %v2505_v33 = vpop.f32.mrf.mxu1 }
 0x22b   : > { %v1453_v12 = vpack.c.bf16 %v1448_v11, %v1448_v11 }
 0x22c   : > { %v2506_v34 = vpop.f32.mrf.mxu1 }
 0x22d   : > { %v1455_v14 = vsel %vm980_vm1, %v1453_v12, 0 }
 0x22e   : > { %2545 = vmatpush3.bf16.msra.mxu0 %v1455_v14 }
 0x22f   : > { %2508 = vmatprep.subr.bf16.mxu0 %v2724_v13 }
 0x231   : > { %2547 = vmatmul.mubr.msk.bf16.vlgmr.msra.gmra.mxu0 %vm976_vm2, %v3257_v50  ;;  %v2736_v50 = vld [vmem:[%s3503_s4 + $0x3e0] sm:$0xff]  }
 0x232   : > { %2509 = vmatpush3.bf16.msra.mxu0 %v2725_v15  ;;  %1827 = vmatprep.mubr.bf16.mxu0 %v3262_v52  ;;  %v2737_v52 = vld [vmem:[%s3503_s4 + $0x3a0] sm:$0xff]  }
 0x233   : > { %2510 = vmatprep.subr.bf16.mxu0 %v2728_v16 }
 0x236   : > { %2511 = vmatpush3.bf16.msra.mxu0 %v2729_v46 }
 0x237   : > { %2512 = vmatprep.subr.bf16.mxu0 %v2732_v17 }
 0x23a   : > { %2513 = vmatpush3.bf16.msra.mxu0 %v2733_v20 }
 0x23b   : > { %2514 = vmatprep.subr.bf16.mxu0 %v2736_v50 }
 0x23e   : > { %2515 = vmatpush3.bf16.msra.mxu0 %v2737_v52 }
 0x23f   : > { %2516 = vmatprep.subr.bf16.mxu0 %v2740_v21 }
 0x242   : > { %2517 = vmatpush3.bf16.msra.mxu0 %v2741_v22 }
 0x243   : > { %2518 = vmatprep.subr.bf16.mxu0 %v2744_v24 }
 0x246   : > { %2519 = vmatpush3.bf16.msra.mxu0 %v2745_v25 }
 0x247   : > { %2520 = vmatprep.subr.bf16.mxu0 %v2748_v26 }
 0x24a   : > { %2521 = vmatpush3.bf16.msra.mxu0 %v2749_v27 }
 0x24b   : > { %2522 = vmatprep.subr.bf16.mxu0 %v2750_v28 }
 0x24e   : > { %2523 = vmatpush3.bf16.msra.mxu0 %v2751_v29 }
 0x251   : > { %1828 = vmatmul.mubr.bf16.vlgmr.msra.gmra.mxu0 %v3316_v18 }
 0x2f1   : > { %v1491_v35 = vpop.f32.mrf.mxu0 }
 0x2f2   : > { %v1497_v36 = vadd.f32 %v1491_v35, %v1065_v63 }
 0x2f3   : > { %v2548_v37 = vpop.f32.mrf.mxu0 }
 0x2f5   : > { %v1494_v38 = vpop.f32.mrf.mxu0 }
 0x2f7   : > { %v2549_v39 = vpop.f32.mrf.mxu0 }
 0x311   : > { %v2524_v40 = vpop.f32.mrf.mxu0 }
 0x313   : > { %v2525_v41 = vpop.f32.mrf.mxu0 }
 0x314   : > { %v2526_v42 = vadd.f32 %v2525_v41, %v2524_v40 }
 0x315   : > { %v2527_v43 = vpop.f32.mrf.mxu0 }
 0x316   : > { %v1830_v44 = vadd.f32 %v2526_v42, %v2504_v32 }
 0x317   : > { %v2528_v45 = vpop.f32.mrf.mxu0 }
 0x318   : > { %v1835_v18 = vpack.c.bf16 %v1830_v44, %v1830_v44 }
 0x31a   : > { %v1837_v47 = vsel %vm980_vm1, %v1835_v18, 0 }
 0x31b   : > { %2551 = vmatpush3.bf16.msra.mxu1 %v1837_v47 }
 0x31e   : > { %2553 = vmatmul.mubr.msk.bf16.vlgmr.msra.gmra.mxu1 %vm976_vm2, %v3318_v19 }
 0x3de   : > { %v1873_v48 = vpop.f32.mrf.mxu1 }
 0x3df   : > { %v1879_v51 = vadd.f32 %v1873_v48, %v1497_v36 }
 0x3e0   : > { %v2554_v53 = vpop.f32.mrf.mxu1 }
 0x3e1   : > { %v1887_v54 = vadd.f32 %v2345_v49, %v1879_v51 }
 0x3e2   : > { %v1876_v55 = vpop.f32.mrf.mxu1 }
 0x3e3   : > { %v1888_v56 = vmax.f32 %v1887_v54, 0.0 }
 0x3e4   : > { %v2555_v57 = vpop.f32.mrf.mxu1 }
 0x3e5   : > { %v1889_v58 = vpack.c.bf16 %v1888_v56, %v1888_v56 }
 0x3e7   : > { %1891 = vst.msk [vmem:[%s250_s11] sm:$0xf] %vm1890_vm3, %v1889_v58 }
 0x3e8 PF: > { %s24_s7 = sadd.s32 1, %s2868_s7   ;;  %s3510_s27 = smov %s2860_s29 }
 0x3e9   : > { %p21_p7 = scmp.ge.s32.totalorder %s24_s7, 42   ;;  %s3511_s28 = smov %s2864_s30 }
 0x3ea   : > { %s3512_s29 = smov %s3515_s1  ;;  %s3513_s30 = smov %s3519_s8 }
 0x3eb   :  { %23 = sbr.rel (!%p21_p7) target bundleno = 10 (0xa), region = 83 }
 0x3f0   :  { %1919 = vsyncpa [#allocation6], 1 }
 0x3f1   :  { %1921 = vsyncpa [#allocation6 + $0x1], 1 }
 0x3f2   :  { %1922 = vsyncpa [#allocation8], 1 }

// kernel: end2end_forward.5
= control target key start
LH: loop header
LB: loop body
LE: loop exit
PB: predicated region body
PF: predicated region fallthrough
CT: control target
= control target key end

     0   :  { %19 = vsyncpa [#allocation3], 0  ;;  %s7823_s0 = inlined_call_operand.vmem [shape: bf16[5,2048], index: 0, kind: input, shape index: {}]   ;;  %s7824_s1 = inlined_call_operand.hbm [shape: bf16[2048,512], index: 1, kind: input, shape index: {}]   ;;  %s7825_s2 = inlined_call_operand.hbm [shape: bf16[128,512], index: 2, kind: input, shape index: {}]   ;;  %s7826_s3 = inlined_call_operand.hbm [shape: f32[1,512], index: 3, kind: input, shape index: {}]   ;;  %s7827_s4 = inlined_call_operand.hbm [shape: bf16[128,128], index: 4, kind: input, shape index: {}]   ;;  %s7828_s5 = inlined_call_operand.hbm [shape: f32[1,128], index: 5, kind: input, shape index: {}]   ;;  %s7829_s6 = inlined_call_operand.hbm [shape: bf16[128,128], index: 6, kind: input, shape index: {}]   ;;  %s7830_s7 = inlined_call_operand.hbm [shape: f32[1,128], index: 7, kind: input, shape index: {}]   ;;  %s7831_s8 = inlined_call_operand.vmem [shape: bf16[128,3], index: 8, kind: input, shape index: {}]   ;;  %s7832_s9 = inlined_call_operand.hbm [shape: f32[1,3], index: 9, kind: input, shape index: {}]   ;;  %s7833_s10 = inlined_call_operand.vmem [shape: bf16[128,3], index: 10, kind: input, shape index: {}]   ;;  %s7834_s11 = inlined_call_operand.hbm [shape: f32[1,3], index: 11, kind: input, shape index: {}]   ;;  %s7835_s12 = inlined_call_operand.hbm [shape: f32[1,3], index: 12, kind: output, shape index: {0}]   ;;  %s7836_s13 = inlined_call_operand.hbm [shape: f32[1,3], index: 13, kind: output, shape index: {1}]  }
   0x1   :  { %20 = vsyncpa [#allocation6], 0 }
   0x2   :  { %21 = vsyncpa [#allocation9], 0 }
   0x3   :  { %22 = vsyncpa [#allocation12], 0 }
   0x4   :  { %23 = vsyncpa [#allocation15], 0 }
   0x5   :  { %24 = vsyncpa [#allocation4], 0 }
   0x6   :  { %25 = vsyncpa [#allocation19], 0  ;;  %s7174_s25 = smov [#allocation5]   ;;  %s7175_s27 = smov [#allocation8]  }
   0x7   :  { %s45_s26 = sshll.u32 %s7174_s25, 4  ;;  %s67_s28 = sshll.u32 %s7175_s27, 4  ;;  %s46_s26 = int_to_ptr.vmem [resolvable:$true] %s45_s26  ;;  %s68_s28 = int_to_ptr.vmem [resolvable:$true] %s67_s28 }
   0x8   :  { %s6948_s29 = scalar_lea.vmem %s46_s26, 4096  ;;  %p6953_p1 = scmp.lt.s32.totalorder %s46_s26, %s46_s26 }
   0x9   :  { %p6949_p0 = scmp.ne.s32.totalorder %s46_s26, %s6948_s29  ;;  %p6954_p2 = scmp.lt.s32.totalorder %s6948_s29, %s6948_s29 }
   0xb   :  { %p6955_p3 = por %p6954_p2, %p6953_p1 }
   0xd   :  { %p6956_p4 = pnand %p6955_p3, %p6949_p0 }
   0xf   :  { %6959 = shalt.err (!%p6956_p4)
}
  0x10   :  { %s7176_s30 = smov 256   ;;  %s7177_s14 = smov 16  }
  0x11   :  { %51 = dma.hbm_to_vmem [thread:$0]  %s7825_s2, 4096, %s46_s26, [#allocation6], %s7176_s30, %s7176_s30, %s7177_s14  }
  0x12   :  { %s6968_s17 = scalar_lea.vmem %s68_s28, 1024  ;;  %p6973_p6 = scmp.lt.s32.totalorder %s68_s28, %s68_s28 }
  0x13   :  { %p6969_p5 = scmp.ne.s32.totalorder %s68_s28, %s6968_s17  ;;  %p6974_p7 = scmp.lt.s32.totalorder %s6968_s17, %s6968_s17 }
  0x15   :  { %p6975_p8 = por %p6974_p7, %p6973_p6 }
  0x17   :  { %p6976_p9 = pnand %p6975_p8, %p6969_p5 }
  0x19   :  { %6979 = shalt.err (!%p6976_p9)
}
  0x1a   :  { %s7178_s18 = smov 64   ;;  %s7179_s19 = smov 4  }
  0x1b   :  { %73 = dma.hbm_to_vmem [thread:$0]  %s7827_s4, 1024, %s68_s28, [#allocation9], %s7178_s18, %s7178_s18, %s7179_s19  }
  0x1c   :  { %s7180_s22 = smov [#allocation11]   ;;  %s7181_s24 = smov [#allocation14]  }
  0x1d   :  { %s89_s23 = sshll.u32 %s7180_s22, 4  ;;  %s114_s25 = sshll.u32 %s7181_s24, 4  ;;  %s90_s23 = int_to_ptr.vmem [resolvable:$true] %s89_s23  ;;  %s115_s25 = int_to_ptr.vmem [resolvable:$true] %s114_s25 }
  0x1e   :  { %s6988_s2 = scalar_lea.vmem %s90_s23, 1024  ;;  %p6993_p11 = scmp.lt.s32.totalorder %s90_s23, %s90_s23 }
  0x1f   :  { %p6989_p10 = scmp.ne.s32.totalorder %s90_s23, %s6988_s2  ;;  %p6994_p12 = scmp.lt.s32.totalorder %s6988_s2, %s6988_s2 }
  0x21   :  { %p6995_p13 = por %p6994_p12, %p6993_p11 }
  0x23   :  { %p6996_p0 = pnand %p6995_p13, %p6989_p10 }
  0x25   :  { %6999 = shalt.err (!%p6996_p0)
}
  0x26   :  { %95 = dma.hbm_to_vmem [thread:$0]  %s7829_s6, 1024, %s90_s23, [#allocation12], %s7178_s18, %s7178_s18, %s7179_s19  }
  0x27   :  { %s7008_s29 = scalar_lea.vmem %s115_s25, 16  ;;  %s7012_s4 = scalar_lea.vmem %s115_s25, 32 }
  0x28   :  { %p7009_p1 = scmp.ne.s32.totalorder %s115_s25, %s7008_s29  ;;  %p7013_p2 = scmp.lt.s32.totalorder %s115_s25, %s115_s25 }
  0x29   :  { %p7014_p3 = scmp.lt.s32.totalorder %s7012_s4, %s7008_s29 }
  0x2b   :  { %p7015_p4 = por %p7014_p3, %p7013_p2 }
  0x2d   :  { %p7016_p5 = pnand %p7015_p4, %p7009_p1 }
  0x2f   :  { %7019 = shalt.err (!%p7016_p5)
}
  0x30   :  { %117 = dma.hbm_to_vmem [thread:$0]  %s7832_s9, 16, %s115_s25, [#allocation15]  }
  0x31   :  { %s7182_s16 = smov [#allocation2]   ;;  %s7183_s20 = smov [#allocation7]  }
  0x32   :  { %s33_s17 = sshll.u32 %s7182_s16, 4  ;;  %s58_s21 = sshll.u32 %s7183_s20, 4  ;;  %s34_s17 = int_to_ptr.vmem [resolvable:$true] %s33_s17  ;;  %s59_s21 = int_to_ptr.vmem [resolvable:$true] %s58_s21 }
  0x33   :  { %s7028_s22 = scalar_lea.vmem %s34_s17, 65536  ;;  %p7033_p7 = scmp.lt.s32.totalorder %s34_s17, %s34_s17 }
  0x34   :  { %p7029_p6 = scmp.ne.s32.totalorder %s34_s17, %s7028_s22  ;;  %p7034_p8 = scmp.lt.s32.totalorder %s7028_s22, %s7028_s22 }
  0x36   :  { %p7035_p9 = por %p7034_p8, %p7033_p7 }
  0x38   :  { %p7036_p10 = pnand %p7035_p9, %p7029_p6 }
  0x3a   :  { %7039 = shalt.err (!%p7036_p10)
}
  0x3b   :  { %39 = dma.hbm_to_vmem [thread:$0]  %s7824_s1, 65536, %s34_s17, [#allocation3], %s7176_s30, %s7176_s30, %s7177_s14  }
  0x3c   :  { %s7048_s9 = scalar_lea.vmem %s59_s21, 64  ;;  %p7053_p12 = scmp.lt.s32.totalorder %s59_s21, %s59_s21 }
  0x3d   :  { %p7049_p11 = scmp.ne.s32.totalorder %s59_s21, %s7048_s9  ;;  %p7054_p13 = scmp.lt.s32.totalorder %s7048_s9, %s7048_s9 }
  0x3f   :  { %p7055_p0 = por %p7054_p13, %p7053_p12 }
  0x41   :  { %p7056_p1 = pnand %p7055_p0, %p7049_p11 }
  0x43   :  { %7059 = shalt.err (!%p7056_p1)
}
  0x44   :  { %61 = dma.hbm_to_vmem [thread:$0]  %s7826_s3, 64, %s59_s21, [#allocation6]  }
  0x45   :  { %s7184_s24 = smov [#allocation10]   ;;  %s7185_s2 = smov [#allocation13]  }
  0x46   :  { %s80_s25 = sshll.u32 %s7184_s24, 4  ;;  %s102_s26 = sshll.u32 %s7185_s2, 4  ;;  %s81_s25 = int_to_ptr.vmem [resolvable:$true] %s80_s25  ;;  %s103_s26 = int_to_ptr.vmem [resolvable:$true] %s102_s26 }
  0x47   :  { %s7068_s27 = scalar_lea.vmem %s81_s25, 16  ;;  %s7072_s1 = scalar_lea.vmem %s81_s25, 32 }
  0x48   :  { %p7069_p2 = scmp.ne.s32.totalorder %s81_s25, %s7068_s27  ;;  %p7073_p3 = scmp.lt.s32.totalorder %s81_s25, %s81_s25 }
  0x49   :  { %p7074_p4 = scmp.lt.s32.totalorder %s7072_s1, %s7068_s27 }
  0x4b   :  { %p7075_p5 = por %p7074_p4, %p7073_p3 }
  0x4d   :  { %p7076_p6 = pnand %p7075_p5, %p7069_p2 }
  0x4f   :  { %7079 = shalt.err (!%p7076_p6)
}
  0x50   :  { %83 = dma.hbm_to_vmem [thread:$0]  %s7828_s5, 16, %s81_s25, [#allocation9]  }
  0x51   :  { %s7088_s29 = scalar_lea.vmem %s103_s26, 16  ;;  %s7092_s3 = scalar_lea.vmem %s103_s26, 32 }
  0x52   :  { %p7089_p7 = scmp.ne.s32.totalorder %s103_s26, %s7088_s29  ;;  %p7093_p8 = scmp.lt.s32.totalorder %s103_s26, %s103_s26 }
  0x53   :  { %p7094_p9 = scmp.lt.s32.totalorder %s7092_s3, %s7088_s29 }
  0x55   :  { %p7095_p10 = por %p7094_p9, %p7093_p8 }
  0x57   :  { %p7096_p11 = pnand %p7095_p10, %p7089_p7 }
  0x59   :  { %7099 = shalt.err (!%p7096_p11)
}
  0x5a   :  { %105 = dma.hbm_to_vmem [thread:$0]  %s7830_s7, 16, %s103_s26, [#allocation12]  }
  0x5b   :  { %s7186_s15 = smov [#allocation16]  }
  0x5c   :  { %s126_s16 = sshll.u32 %s7186_s15, 4  ;;  %s127_s16 = int_to_ptr.vmem [resolvable:$true] %s126_s16 }
  0x5d   :  { %s7108_s17 = scalar_lea.vmem %s127_s16, 16  ;;  %s7112_s20 = scalar_lea.vmem %s127_s16, 32 }
  0x5e   :  { %p7109_p12 = scmp.ne.s32.totalorder %s127_s16, %s7108_s17  ;;  %p7113_p13 = scmp.lt.s32.totalorder %s127_s16, %s127_s16 }
  0x5f   :  { %p7114_p0 = scmp.lt.s32.totalorder %s7112_s20, %s7108_s17 }
  0x61   :  { %p7115_p1 = por %p7114_p0, %p7113_p13 }
  0x63   :  { %p7116_p2 = pnand %p7115_p1, %p7109_p12 }
  0x65   :  { %7119 = shalt.err (!%p7116_p2)
}
  0x66   :  { %129 = dma.hbm_to_vmem [thread:$0]  %s7834_s11, 16, %s127_s16, [#allocation15]  }
  0x67   :  { %7160 = dma.done.wait [#allocation3], 65536  }
  0x68   :  { %7161 = vsyncadd [#allocation3], 4294901760 }
  0x69   :  { %7162 = dma.done.wait [#allocation6], 4160  }
  0x6a   :  { %7163 = vsyncadd [#allocation6], 4294963136 }
  0x6b   :  { %7164 = dma.done.wait [#allocation9], 1040  }
  0x6c   :  { %7165 = vsyncadd [#allocation9], 4294966256 }
  0x6d   :  { %7166 = dma.done.wait [#allocation12], 1040  }
  0x6e   :  { %7167 = vsyncadd [#allocation12], 4294966256 }
  0x6f   :  { %7168 = dma.done.wait [#allocation15], 32  }
  0x70   :  { %7169 = vsyncadd [#allocation15], 4294967264  ;;  %v5995_v0 = vld [vmem:[#allocation2 + $0xe4] ss:$16 sps:$4 sm:$0xff]   ;;  %v5999_v2 = vld [vmem:[#allocation2 + $0xe0] ss:$16 sps:$4 sm:$0xff]  }
  0x71   :  { %v5997_v1 = vld [vmem:[#allocation2 + $0x2e4] ss:$16 sps:$4 sm:$0xff]   ;;  %3316 = vmatprep.subr.bf16.mxu0 %v5995_v0  ;;  %v6000_v3 = vld [vmem:[#allocation2 + $0x2e0] ss:$16 sps:$4 sm:$0xff]   ;;  %v159_v48 = vld [vmem:[%s7823_s0 + $0x8] sm:$0x77] }
  0x72   :  { %3357 = vmatprep.subr.bf16.mxu1 %v5997_v1  ;;  %v6001_v4 = vld [vmem:[#allocation2 + $0xc4] ss:$16 sps:$4 sm:$0xff]   ;;  %3317 = vmatpush1.bf16.msra.mxu0 %v5999_v2  ;;  %v6005_v6 = vld [vmem:[#allocation2 + $0xc0] ss:$16 sps:$4 sm:$0xff]   ;;  %v7303_v51 = vcombine.high %v159_v48, %v159_v48  ;;  %vm7189_vm0 = vmmov 0   ;;  %s7190_s15 = smov [#allocation17]  }
  0x73   :  { %3358 = vmatpush1.bf16.msra.mxu1 %v6000_v3  ;;  %v6003_v5 = vld [vmem:[#allocation2 + $0x2c4] ss:$16 sps:$4 sm:$0xff]   ;;  %3318 = vmatprep.subr.bf16.mxu0 %v6001_v4  ;;  %v6006_v7 = vld [vmem:[#allocation2 + $0x2c0] ss:$16 sps:$4 sm:$0xff]   ;;  %s7191_s16 = smov [#allocation18]   ;;  %vm5113_vm1 = vcmask 16384  }
  0x74   :  { %3359 = vmatprep.subr.bf16.mxu1 %v6003_v5  ;;  %v6007_v8 = vld [vmem:[#allocation2 + $0xa4] ss:$16 sps:$4 sm:$0xff]   ;;  %v6011_v10 = vld [vmem:[#allocation2 + $0xa0] ss:$16 sps:$4 sm:$0xff]   ;;  %3389 = vmatprep.mubr.bf16.mxu1 %v7303_v51  ;;  %s5237_s17 = sshll.u32 %s7191_s16, 4  ;;  %s5238_s17 = int_to_ptr.vmem [resolvable:$true] %s5237_s17 }
  0x75   :  { %v6009_v9 = vld [vmem:[#allocation2 + $0x2a4] ss:$16 sps:$4 sm:$0xff]   ;;  %v6012_v11 = vld [vmem:[#allocation2 + $0x2a0] ss:$16 sps:$4 sm:$0xff]  }
  0x76   :  { %3319 = vmatpush1.bf16.msra.mxu0 %v6005_v6  ;;  %v6013_v12 = vld [vmem:[#allocation2 + $0x84] ss:$16 sps:$4 sm:$0xff]   ;;  %v6017_v14 = vld [vmem:[#allocation2 + $0x80] ss:$16 sps:$4 sm:$0xff]  }
  0x77   :  { %3360 = vmatpush1.bf16.msra.mxu1 %v6006_v7  ;;  %3320 = vmatprep.subr.bf16.mxu0 %v6007_v8  ;;  %v6015_v13 = vld [vmem:[#allocation2 + $0x284] ss:$16 sps:$4 sm:$0xff]   ;;  %v6018_v15 = vld [vmem:[#allocation2 + $0x280] ss:$16 sps:$4 sm:$0xff]   ;;  %v7309_v7 = vcombine.low %v159_v48, %v159_v48 }
  0x78   :  { %3361 = vmatprep.subr.bf16.mxu1 %v6009_v9  ;;  %v6019_v16 = vld [vmem:[#allocation2 + $0x64] ss:$16 sps:$4 sm:$0xff]   ;;  %v6023_v18 = vld [vmem:[#allocation2 + $0x60] ss:$16 sps:$4 sm:$0xff]  }
  0x79   :  { %v6021_v17 = vld [vmem:[#allocation2 + $0x264] ss:$16 sps:$4 sm:$0xff]   ;;  %v6024_v19 = vld [vmem:[#allocation2 + $0x260] ss:$16 sps:$4 sm:$0xff]  }
  0x7a   :  { %3321 = vmatpush1.bf16.msra.mxu0 %v6011_v10  ;;  %v6025_v20 = vld [vmem:[#allocation2 + $0x44] ss:$16 sps:$4 sm:$0xff]   ;;  %v6029_v22 = vld [vmem:[#allocation2 + $0x40] ss:$16 sps:$4 sm:$0xff]  }
  0x7b   :  { %3362 = vmatpush1.bf16.msra.mxu1 %v6012_v11  ;;  %3322 = vmatprep.subr.bf16.mxu0 %v6013_v12  ;;  %v6027_v21 = vld [vmem:[#allocation2 + $0x244] ss:$16 sps:$4 sm:$0xff]   ;;  %v6030_v23 = vld [vmem:[#allocation2 + $0x240] ss:$16 sps:$4 sm:$0xff]  }
  0x7c   :  { %3363 = vmatprep.subr.bf16.mxu1 %v6015_v13  ;;  %v6031_v24 = vld [vmem:[#allocation2 + $0x24] ss:$16 sps:$4 sm:$0xff]   ;;  %v6035_v26 = vld [vmem:[#allocation2 + $0x20] ss:$16 sps:$4 sm:$0xff]  }
  0x7d   :  { %v6033_v25 = vld [vmem:[#allocation2 + $0x224] ss:$16 sps:$4 sm:$0xff]   ;;  %v6036_v27 = vld [vmem:[#allocation2 + $0x220] ss:$16 sps:$4 sm:$0xff]  }
  0x7e   :  { %3323 = vmatpush1.bf16.msra.mxu0 %v6017_v14  ;;  %v6037_v28 = vld [vmem:[#allocation2 + $0x4] ss:$16 sps:$4 sm:$0xff]   ;;  %v6041_v30 = vld [vmem:[#allocation2] ss:$16 sps:$4 sm:$0xff]  }
  0x7f   :  { %3364 = vmatpush1.bf16.msra.mxu1 %v6018_v15  ;;  %3324 = vmatprep.subr.bf16.mxu0 %v6019_v16  ;;  %v6039_v29 = vld [vmem:[#allocation2 + $0x204] ss:$16 sps:$4 sm:$0xff]   ;;  %v6042_v31 = vld [vmem:[#allocation2 + $0x200] ss:$16 sps:$4 sm:$0xff]  }
  0x80   :  { %3365 = vmatprep.subr.bf16.mxu1 %v6021_v17  ;;  %v6043_v32 = vld [vmem:[#allocation2 + $0x1e4] ss:$16 sps:$4 sm:$0xff]   ;;  %v6047_v34 = vld [vmem:[#allocation2 + $0x1e0] ss:$16 sps:$4 sm:$0xff]  }
  0x81   :  { %v6045_v33 = vld [vmem:[#allocation2 + $0x3e4] ss:$16 sps:$4 sm:$0xff]   ;;  %v6048_v35 = vld [vmem:[#allocation2 + $0x3e0] ss:$16 sps:$4 sm:$0xff]  }
  0x82   :  { %3325 = vmatpush1.bf16.msra.mxu0 %v6023_v18  ;;  %v6049_v36 = vld [vmem:[#allocation2 + $0x1c4] ss:$16 sps:$4 sm:$0xff]   ;;  %v6053_v38 = vld [vmem:[#allocation2 + $0x1c0] ss:$16 sps:$4 sm:$0xff]  }
  0x83   :  { %3366 = vmatpush1.bf16.msra.mxu1 %v6024_v19  ;;  %3326 = vmatprep.subr.bf16.mxu0 %v6025_v20  ;;  %v6051_v37 = vld [vmem:[#allocation2 + $0x3c4] ss:$16 sps:$4 sm:$0xff]   ;;  %v6054_v39 = vld [vmem:[#allocation2 + $0x3c0] ss:$16 sps:$4 sm:$0xff]  }
  0x84   :  { %3367 = vmatprep.subr.bf16.mxu1 %v6027_v21  ;;  %v6055_v40 = vld [vmem:[#allocation2 + $0x1a4] ss:$16 sps:$4 sm:$0xff]   ;;  %v6059_v42 = vld [vmem:[#allocation2 + $0x1a0] ss:$16 sps:$4 sm:$0xff]  }
  0x85   :  { %v6057_v41 = vld [vmem:[#allocation2 + $0x3a4] ss:$16 sps:$4 sm:$0xff]   ;;  %v6060_v43 = vld [vmem:[#allocation2 + $0x3a0] ss:$16 sps:$4 sm:$0xff]  }
  0x86   :  { %3327 = vmatpush1.bf16.msra.mxu0 %v6029_v22  ;;  %v6061_v44 = vld [vmem:[#allocation2 + $0x184] ss:$16 sps:$4 sm:$0xff]   ;;  %v6065_v49 = vld [vmem:[#allocation2 + $0x180] ss:$16 sps:$4 sm:$0xff]  }
  0x87   :  { %3368 = vmatpush1.bf16.msra.mxu1 %v6030_v23  ;;  %3328 = vmatprep.subr.bf16.mxu0 %v6031_v24  ;;  %v6063_v45 = vld [vmem:[#allocation2 + $0x384] ss:$16 sps:$4 sm:$0xff]   ;;  %v6066_v50 = vld [vmem:[#allocation2 + $0x380] ss:$16 sps:$4 sm:$0xff]  }
  0x88   :  { %3369 = vmatprep.subr.bf16.mxu1 %v6033_v25  ;;  %v158_v46 = vld [vmem:[%s7823_s0] sm:$0x77] }
  0x89   :  { %v7298_v47 = vcombine.high %v158_v46, %v158_v46  ;;  %v6067_v52 = vld [vmem:[#allocation2 + $0x164] ss:$16 sps:$4 sm:$0xff]   ;;  %v6071_v54 = vld [vmem:[#allocation2 + $0x160] ss:$16 sps:$4 sm:$0xff]   ;;  %v7307_v6 = vcombine.low %v158_v46, %v158_v46 }
  0x8a   :  { %3329 = vmatpush1.bf16.msra.mxu0 %v6035_v26  ;;  %v6069_v53 = vld [vmem:[#allocation2 + $0x364] ss:$16 sps:$4 sm:$0xff]   ;;  %v6072_v55 = vld [vmem:[#allocation2 + $0x360] ss:$16 sps:$4 sm:$0xff]  }
  0x8b   :  { %3370 = vmatpush1.bf16.msra.mxu1 %v6036_v27  ;;  %3330 = vmatprep.subr.bf16.mxu0 %v6037_v28  ;;  %v6073_v56 = vld [vmem:[#allocation2 + $0x144] ss:$16 sps:$4 sm:$0xff]   ;;  %v6077_v58 = vld [vmem:[#allocation2 + $0x140] ss:$16 sps:$4 sm:$0xff]  }
  0x8c   :  { %3371 = vmatprep.subr.bf16.mxu1 %v6039_v29  ;;  %3348 = vmatprep.mubr.bf16.mxu0 %v7298_v47  ;;  %v6075_v57 = vld [vmem:[#allocation2 + $0x344] ss:$16 sps:$4 sm:$0xff]   ;;  %v6078_v59 = vld [vmem:[#allocation2 + $0x340] ss:$16 sps:$4 sm:$0xff]  }
  0x8d   :  { %v6079_v60 = vld [vmem:[#allocation2 + $0x124] ss:$16 sps:$4 sm:$0xff]   ;;  %v6083_v62 = vld [vmem:[#allocation2 + $0x120] ss:$16 sps:$4 sm:$0xff]  }
  0x8e   :  { %3331 = vmatpush1.bf16.msra.mxu0 %v6041_v30  ;;  %v6081_v61 = vld [vmem:[#allocation2 + $0x324] ss:$16 sps:$4 sm:$0xff]   ;;  %v6084_v63 = vld [vmem:[#allocation2 + $0x320] ss:$16 sps:$4 sm:$0xff]  }
  0x8f   :  { %3372 = vmatpush1.bf16.msra.mxu1 %v6042_v31  ;;  %3332 = vmatprep.subr.bf16.mxu0 %v6043_v32  ;;  %v6085_v0 = vld [vmem:[#allocation2 + $0x104] ss:$16 sps:$4 sm:$0xff]   ;;  %v6089_v2 = vld [vmem:[#allocation2 + $0x100] ss:$16 sps:$4 sm:$0xff]  }
  0x90   :  { %3373 = vmatprep.subr.bf16.mxu1 %v6045_v33  ;;  %v6087_v1 = vld [vmem:[#allocation2 + $0x304] ss:$16 sps:$4 sm:$0xff]   ;;  %v6090_v3 = vld [vmem:[#allocation2 + $0x300] ss:$16 sps:$4 sm:$0xff]   ;;  %v7321_v33 = vld [vmem:[%s7823_s0 + $0x18] sm:$0x77] }
  0x91   :  { %v6097_v4 = vld [vmem:[#allocation2 + $0x4e4] ss:$16 sps:$4 sm:$0xff]   ;;  %v6095_v8 = vld [vmem:[#allocation2 + $0x4e0] ss:$16 sps:$4 sm:$0xff]  }
  0x92   :  { %3333 = vmatpush2.bf16.msra.mxu0 %v6047_v34  ;;  %v6100_v5 = vld [vmem:[#allocation2 + $0x6e4] ss:$16 sps:$4 sm:$0xff]   ;;  %v6098_v9 = vld [vmem:[#allocation2 + $0x6e0] ss:$16 sps:$4 sm:$0xff]  }
  0x93   :  { %3374 = vmatpush2.bf16.msra.mxu1 %v6048_v35  ;;  %3334 = vmatprep.subr.bf16.mxu0 %v6049_v36  ;;  %v6103_v10 = vld [vmem:[#allocation2 + $0x4c4] ss:$16 sps:$4 sm:$0xff]   ;;  %v6101_v12 = vld [vmem:[#allocation2 + $0x4c0] ss:$16 sps:$4 sm:$0xff]  }
  0x94   :  { %3375 = vmatprep.subr.bf16.mxu1 %v6051_v37  ;;  %v6106_v11 = vld [vmem:[#allocation2 + $0x6c4] ss:$16 sps:$4 sm:$0xff]   ;;  %v6104_v13 = vld [vmem:[#allocation2 + $0x6c0] ss:$16 sps:$4 sm:$0xff]   ;;  %v7329_v37 = vcombine.high %v7321_v33, %v7321_v33 }
  0x95   :  { %v6109_v14 = vld [vmem:[#allocation2 + $0x4a4] ss:$16 sps:$4 sm:$0xff]   ;;  %v6107_v16 = vld [vmem:[#allocation2 + $0x4a0] ss:$16 sps:$4 sm:$0xff]  }
  0x96   :  { %3335 = vmatpush2.bf16.msra.mxu0 %v6053_v38  ;;  %v6112_v15 = vld [vmem:[#allocation2 + $0x6a4] ss:$16 sps:$4 sm:$0xff]   ;;  %v6110_v17 = vld [vmem:[#allocation2 + $0x6a0] ss:$16 sps:$4 sm:$0xff]  }
  0x97   :  { %3376 = vmatpush2.bf16.msra.mxu1 %v6054_v39  ;;  %3336 = vmatprep.subr.bf16.mxu0 %v6055_v40  ;;  %v6115_v18 = vld [vmem:[#allocation2 + $0x484] ss:$16 sps:$4 sm:$0xff]   ;;  %v6113_v20 = vld [vmem:[#allocation2 + $0x480] ss:$16 sps:$4 sm:$0xff]  }
  0x98   :  { %3377 = vmatprep.subr.bf16.mxu1 %v6057_v41  ;;  %v6118_v19 = vld [vmem:[#allocation2 + $0x684] ss:$16 sps:$4 sm:$0xff]   ;;  %v6116_v21 = vld [vmem:[#allocation2 + $0x680] ss:$16 sps:$4 sm:$0xff]  }
  0x99   :  { %v6121_v22 = vld [vmem:[#allocation2 + $0x464] ss:$16 sps:$4 sm:$0xff]   ;;  %v6119_v24 = vld [vmem:[#allocation2 + $0x460] ss:$16 sps:$4 sm:$0xff]  }
  0x9a   :  { %3337 = vmatpush2.bf16.msra.mxu0 %v6059_v42  ;;  %v6124_v23 = vld [vmem:[#allocation2 + $0x664] ss:$16 sps:$4 sm:$0xff]   ;;  %v6122_v25 = vld [vmem:[#allocation2 + $0x660] ss:$16 sps:$4 sm:$0xff]  }
  0x9b   :  { %3378 = vmatpush2.bf16.msra.mxu1 %v6060_v43  ;;  %3338 = vmatprep.subr.bf16.mxu0 %v6061_v44  ;;  %v6127_v26 = vld [vmem:[#allocation2 + $0x444] ss:$16 sps:$4 sm:$0xff]   ;;  %v6125_v28 = vld [vmem:[#allocation2 + $0x440] ss:$16 sps:$4 sm:$0xff]  }
  0x9c   :  { %3379 = vmatprep.subr.bf16.mxu1 %v6063_v45  ;;  %v6130_v27 = vld [vmem:[#allocation2 + $0x644] ss:$16 sps:$4 sm:$0xff]   ;;  %v6128_v29 = vld [vmem:[#allocation2 + $0x640] ss:$16 sps:$4 sm:$0xff]  }
  0x9d   :  { %v6133_v30 = vld [vmem:[#allocation2 + $0x424] ss:$16 sps:$4 sm:$0xff]   ;;  %v6131_v34 = vld [vmem:[#allocation2 + $0x420] ss:$16 sps:$4 sm:$0xff]  }
  0x9e   :  { %3339 = vmatpush2.bf16.msra.mxu0 %v6065_v49  ;;  %v6136_v31 = vld [vmem:[#allocation2 + $0x624] ss:$16 sps:$4 sm:$0xff]   ;;  %v6134_v35 = vld [vmem:[#allocation2 + $0x620] ss:$16 sps:$4 sm:$0xff]  }
  0x9f   :  { %3380 = vmatpush2.bf16.msra.mxu1 %v6066_v50  ;;  %3340 = vmatprep.subr.bf16.mxu0 %v6067_v52  ;;  %v7316_v32 = vld [vmem:[%s7823_s0 + $0x10] sm:$0x77] }
  0xa0   :  { %3381 = vmatprep.subr.bf16.mxu1 %v6069_v53  ;;  %v7325_v36 = vcombine.high %v7316_v32, %v7316_v32  ;;  %v6139_v38 = vld [vmem:[#allocation2 + $0x404] ss:$16 sps:$4 sm:$0xff]   ;;  %v6137_v40 = vld [vmem:[#allocation2 + $0x400] ss:$16 sps:$4 sm:$0xff]  }
  0xa1   :  { %v6142_v39 = vld [vmem:[#allocation2 + $0x604] ss:$16 sps:$4 sm:$0xff]   ;;  %v6140_v41 = vld [vmem:[#allocation2 + $0x600] ss:$16 sps:$4 sm:$0xff]  }
  0xa2   :  { %3341 = vmatpush2.bf16.msra.mxu0 %v6071_v54  ;;  %v6145_v42 = vld [vmem:[#allocation2 + $0x5e4] ss:$16 sps:$4 sm:$0xff]   ;;  %v6143_v44 = vld [vmem:[#allocation2 + $0x5e0] ss:$16 sps:$4 sm:$0xff]  }
  0xa3   :  { %3382 = vmatpush2.bf16.msra.mxu1 %v6072_v55  ;;  %3342 = vmatprep.subr.bf16.mxu0 %v6073_v56  ;;  %v6148_v43 = vld [vmem:[#allocation2 + $0x7e4] ss:$16 sps:$4 sm:$0xff]   ;;  %v6146_v45 = vld [vmem:[#allocation2 + $0x7e0] ss:$16 sps:$4 sm:$0xff]  }
  0xa4   :  { %3383 = vmatprep.subr.bf16.mxu1 %v6075_v57  ;;  %v6151_v46 = vld [vmem:[#allocation2 + $0x5c4] ss:$16 sps:$4 sm:$0xff]   ;;  %v6149_v49 = vld [vmem:[#allocation2 + $0x5c0] ss:$16 sps:$4 sm:$0xff]  }
  0xa5   :  { %v6154_v48 = vld [vmem:[#allocation2 + $0x7c4] ss:$16 sps:$4 sm:$0xff]   ;;  %v6152_v50 = vld [vmem:[#allocation2 + $0x7c0] ss:$16 sps:$4 sm:$0xff]  }
  0xa6   :  { %3343 = vmatpush2.bf16.msra.mxu0 %v6077_v58  ;;  %v6157_v52 = vld [vmem:[#allocation2 + $0x5a4] ss:$16 sps:$4 sm:$0xff]   ;;  %v6155_v54 = vld [vmem:[#allocation2 + $0x5a0] ss:$16 sps:$4 sm:$0xff]  }
  0xa7   :  { %3384 = vmatpush2.bf16.msra.mxu1 %v6078_v59  ;;  %3344 = vmatprep.subr.bf16.mxu0 %v6079_v60  ;;  %v6160_v53 = vld [vmem:[#allocation2 + $0x7a4] ss:$16 sps:$4 sm:$0xff]   ;;  %v6158_v55 = vld [vmem:[#allocation2 + $0x7a0] ss:$16 sps:$4 sm:$0xff]  }
  0xa8   :  { %3385 = vmatprep.subr.bf16.mxu1 %v6081_v61  ;;  %v6163_v56 = vld [vmem:[#allocation2 + $0x584] ss:$16 sps:$4 sm:$0xff]   ;;  %v6161_v58 = vld [vmem:[#allocation2 + $0x580] ss:$16 sps:$4 sm:$0xff]  }
  0xa9   :  { %v6166_v57 = vld [vmem:[#allocation2 + $0x784] ss:$16 sps:$4 sm:$0xff]   ;;  %v6164_v59 = vld [vmem:[#allocation2 + $0x780] ss:$16 sps:$4 sm:$0xff]  }
  0xaa   :  { %3345 = vmatpush2.bf16.msra.mxu0 %v6083_v62  ;;  %v6169_v60 = vld [vmem:[#allocation2 + $0x564] ss:$16 sps:$4 sm:$0xff]   ;;  %v6167_v62 = vld [vmem:[#allocation2 + $0x560] ss:$16 sps:$4 sm:$0xff]  }
  0xab   :  { %3386 = vmatpush2.bf16.msra.mxu1 %v6084_v63  ;;  %3346 = vmatprep.subr.bf16.mxu0 %v6085_v0  ;;  %v6172_v61 = vld [vmem:[#allocation2 + $0x764] ss:$16 sps:$4 sm:$0xff]   ;;  %v6170_v63 = vld [vmem:[#allocation2 + $0x760] ss:$16 sps:$4 sm:$0xff]  }
  0xac   :  { %3387 = vmatprep.subr.bf16.mxu1 %v6087_v1  ;;  %v6175_v0 = vld [vmem:[#allocation2 + $0x544] ss:$16 sps:$4 sm:$0xff]  }
  0xad   :  { %v6178_v1 = vld [vmem:[#allocation2 + $0x744] ss:$16 sps:$4 sm:$0xff]  }
  0xae   :  { %3347 = vmatpush2.bf16.msra.mxu0 %v6089_v2  ;;  %v6173_v2 = vld [vmem:[#allocation2 + $0x540] ss:$16 sps:$4 sm:$0xff]  }
  0xaf   :  { %3388 = vmatpush2.bf16.msra.mxu1 %v6090_v3  ;;  %3398 = vmatprep.subr.bf16.mxu0 %v6097_v4  ;;  %v6176_v3 = vld [vmem:[#allocation2 + $0x740] ss:$16 sps:$4 sm:$0xff]   ;;  %v6181_v4 = vld [vmem:[#allocation2 + $0x524] ss:$16 sps:$4 sm:$0xff]  }
  0xb0   :  { %3439 = vmatprep.subr.bf16.mxu1 %v6100_v5  ;;  %v6184_v5 = vld [vmem:[#allocation2 + $0x724] ss:$16 sps:$4 sm:$0xff]  }
  0xb1   :  { %3349 = vmatmul.mubr.bf16.vlgmr.msra.gmra.mxu0 %v7307_v6 }
  0xb2   :  { %3390 = vmatmul.mubr.bf16.vlgmr.msra.gmra.mxu1 %v7309_v7  ;;  %3399 = vmatpush1.bf16.msra.mxu0 %v6095_v8  ;;  %v6179_v8 = vld [vmem:[#allocation2 + $0x520] ss:$16 sps:$4 sm:$0xff]  }
  0xb3   :  { %3440 = vmatpush1.bf16.msra.mxu1 %v6098_v9  ;;  %3400 = vmatprep.subr.bf16.mxu0 %v6103_v10  ;;  %v6182_v9 = vld [vmem:[#allocation2 + $0x720] ss:$16 sps:$4 sm:$0xff]   ;;  %v6187_v10 = vld [vmem:[#allocation2 + $0x504] ss:$16 sps:$4 sm:$0xff]  }
  0xb4   :  { %3441 = vmatprep.subr.bf16.mxu1 %v6106_v11  ;;  %3430 = vmatprep.mubr.bf16.mxu0 %v7325_v36  ;;  %v6190_v11 = vld [vmem:[#allocation2 + $0x704] ss:$16 sps:$4 sm:$0xff]  }
  0xb5   :  { %3471 = vmatprep.mubr.bf16.mxu1 %v7329_v37 }
  0xb6   :  { %3401 = vmatpush1.bf16.msra.mxu0 %v6101_v12  ;;  %v6185_v12 = vld [vmem:[#allocation2 + $0x500] ss:$16 sps:$4 sm:$0xff]  }
  0xb7   :  { %3442 = vmatpush1.bf16.msra.mxu1 %v6104_v13  ;;  %3402 = vmatprep.subr.bf16.mxu0 %v6109_v14  ;;  %v6188_v13 = vld [vmem:[#allocation2 + $0x700] ss:$16 sps:$4 sm:$0xff]   ;;  %v6197_v14 = vld [vmem:[#allocation2 + $0x8e4] ss:$16 sps:$4 sm:$0xff]  }
  0xb8   :  { %3443 = vmatprep.subr.bf16.mxu1 %v6112_v15  ;;  %v6200_v15 = vld [vmem:[#allocation2 + $0xae4] ss:$16 sps:$4 sm:$0xff]  }
  0xba   :  { %3403 = vmatpush1.bf16.msra.mxu0 %v6107_v16  ;;  %v7335_v16 = vcombine.low %v7316_v32, %v7316_v32  ;;  %v6215_v32 = vld [vmem:[#allocation2 + $0x884] ss:$16 sps:$4 sm:$0xff]  }
  0xbb   :  { %3444 = vmatpush1.bf16.msra.mxu1 %v6110_v17  ;;  %3404 = vmatprep.subr.bf16.mxu0 %v6115_v18  ;;  %v7339_v17 = vcombine.low %v7321_v33, %v7321_v33  ;;  %v6195_v18 = vld [vmem:[#allocation2 + $0x8e0] ss:$16 sps:$4 sm:$0xff]   ;;  %v6218_v33 = vld [vmem:[#allocation2 + $0xa84] ss:$16 sps:$4 sm:$0xff]  }
  0xbc   :  { %3445 = vmatprep.subr.bf16.mxu1 %v6118_v19  ;;  %v6198_v19 = vld [vmem:[#allocation2 + $0xae0] ss:$16 sps:$4 sm:$0xff]  }
  0xbe   :  { %3405 = vmatpush1.bf16.msra.mxu0 %v6113_v20  ;;  %v6203_v20 = vld [vmem:[#allocation2 + $0x8c4] ss:$16 sps:$4 sm:$0xff]  }
  0xbf   :  { %3446 = vmatpush1.bf16.msra.mxu1 %v6116_v21  ;;  %3406 = vmatprep.subr.bf16.mxu0 %v6121_v22  ;;  %v6206_v21 = vld [vmem:[#allocation2 + $0xac4] ss:$16 sps:$4 sm:$0xff]  }
  0xc0   :  { %3447 = vmatprep.subr.bf16.mxu1 %v6124_v23  ;;  %v7344_v22 = vld [vmem:[%s7823_s0 + $0x20] sm:$0x77]  ;;  %v7349_v23 = vld [vmem:[%s7823_s0 + $0x28] sm:$0x77] }
  0xc2   :  { %3407 = vmatpush1.bf16.msra.mxu0 %v6119_v24  ;;  %v7353_v24 = vcombine.high %v7344_v22, %v7344_v22 }
  0xc3   :  { %3448 = vmatpush1.bf16.msra.mxu1 %v6122_v25  ;;  %3408 = vmatprep.subr.bf16.mxu0 %v6127_v26  ;;  %v7357_v25 = vcombine.high %v7349_v23, %v7349_v23  ;;  %v6201_v26 = vld [vmem:[#allocation2 + $0x8c0] ss:$16 sps:$4 sm:$0xff]  }
  0xc4   :  { %3449 = vmatprep.subr.bf16.mxu1 %v6130_v27  ;;  %v6204_v27 = vld [vmem:[#allocation2 + $0xac0] ss:$16 sps:$4 sm:$0xff]  }
  0xc6   :  { %3409 = vmatpush1.bf16.msra.mxu0 %v6125_v28  ;;  %v6209_v28 = vld [vmem:[#allocation2 + $0x8a4] ss:$16 sps:$4 sm:$0xff]  }
  0xc7   :  { %3450 = vmatpush1.bf16.msra.mxu1 %v6128_v29  ;;  %3410 = vmatprep.subr.bf16.mxu0 %v6133_v30  ;;  %v6212_v29 = vld [vmem:[#allocation2 + $0xaa4] ss:$16 sps:$4 sm:$0xff]   ;;  %v6207_v30 = vld [vmem:[#allocation2 + $0x8a0] ss:$16 sps:$4 sm:$0xff]  }
  0xc8   :  { %3451 = vmatprep.subr.bf16.mxu1 %v6136_v31  ;;  %v6210_v31 = vld [vmem:[#allocation2 + $0xaa0] ss:$16 sps:$4 sm:$0xff]  }
  0xca   :  { %3411 = vmatpush1.bf16.msra.mxu0 %v6131_v34  ;;  %v6213_v34 = vld [vmem:[#allocation2 + $0x880] ss:$16 sps:$4 sm:$0xff]  }
  0xcb   :  { %3452 = vmatpush1.bf16.msra.mxu1 %v6134_v35  ;;  %3412 = vmatprep.subr.bf16.mxu0 %v6139_v38  ;;  %v6216_v35 = vld [vmem:[#allocation2 + $0xa80] ss:$16 sps:$4 sm:$0xff]   ;;  %v6221_v38 = vld [vmem:[#allocation2 + $0x864] ss:$16 sps:$4 sm:$0xff]  }
  0xcc   :  { %3453 = vmatprep.subr.bf16.mxu1 %v6142_v39  ;;  %v6224_v39 = vld [vmem:[#allocation2 + $0xa64] ss:$16 sps:$4 sm:$0xff]  }
  0xce   :  { %3413 = vmatpush1.bf16.msra.mxu0 %v6137_v40  ;;  %v6219_v40 = vld [vmem:[#allocation2 + $0x860] ss:$16 sps:$4 sm:$0xff]  }
  0xcf   :  { %3454 = vmatpush1.bf16.msra.mxu1 %v6140_v41  ;;  %3414 = vmatprep.subr.bf16.mxu0 %v6145_v42  ;;  %v6222_v41 = vld [vmem:[#allocation2 + $0xa60] ss:$16 sps:$4 sm:$0xff]   ;;  %v6227_v42 = vld [vmem:[#allocation2 + $0x844] ss:$16 sps:$4 sm:$0xff]  }
  0xd0   :  { %3455 = vmatprep.subr.bf16.mxu1 %v6148_v43  ;;  %v6230_v43 = vld [vmem:[#allocation2 + $0xa44] ss:$16 sps:$4 sm:$0xff]  }
  0xd2   :  { %3415 = vmatpush2.bf16.msra.mxu0 %v6143_v44  ;;  %v6225_v44 = vld [vmem:[#allocation2 + $0x840] ss:$16 sps:$4 sm:$0xff]  }
  0xd3   :  { %3456 = vmatpush2.bf16.msra.mxu1 %v6146_v45  ;;  %3416 = vmatprep.subr.bf16.mxu0 %v6151_v46  ;;  %v6228_v45 = vld [vmem:[#allocation2 + $0xa40] ss:$16 sps:$4 sm:$0xff]   ;;  %v6233_v46 = vld [vmem:[#allocation2 + $0x824] ss:$16 sps:$4 sm:$0xff]  }
  0xd4   :  { %3457 = vmatprep.subr.bf16.mxu1 %v6154_v48  ;;  %v6236_v48 = vld [vmem:[#allocation2 + $0xa24] ss:$16 sps:$4 sm:$0xff]  }
  0xd6   :  { %3417 = vmatpush2.bf16.msra.mxu0 %v6149_v49  ;;  %v6231_v49 = vld [vmem:[#allocation2 + $0x820] ss:$16 sps:$4 sm:$0xff]  }
  0xd7   :  { %3458 = vmatpush2.bf16.msra.mxu1 %v6152_v50  ;;  %3418 = vmatprep.subr.bf16.mxu0 %v6157_v52  ;;  %v6234_v50 = vld [vmem:[#allocation2 + $0xa20] ss:$16 sps:$4 sm:$0xff]   ;;  %v6239_v52 = vld [vmem:[#allocation2 + $0x804] ss:$16 sps:$4 sm:$0xff]  }
  0xd8   :  { %3459 = vmatprep.subr.bf16.mxu1 %v6160_v53  ;;  %v6242_v53 = vld [vmem:[#allocation2 + $0xa04] ss:$16 sps:$4 sm:$0xff]  }
  0xda   :  { %3419 = vmatpush2.bf16.msra.mxu0 %v6155_v54  ;;  %v6237_v54 = vld [vmem:[#allocation2 + $0x800] ss:$16 sps:$4 sm:$0xff]  }
  0xdb   :  { %3460 = vmatpush2.bf16.msra.mxu1 %v6158_v55  ;;  %3420 = vmatprep.subr.bf16.mxu0 %v6163_v56  ;;  %v6240_v55 = vld [vmem:[#allocation2 + $0xa00] ss:$16 sps:$4 sm:$0xff]   ;;  %v6245_v56 = vld [vmem:[#allocation2 + $0x9e4] ss:$16 sps:$4 sm:$0xff]  }
  0xdc   :  { %3461 = vmatprep.subr.bf16.mxu1 %v6166_v57  ;;  %v6248_v57 = vld [vmem:[#allocation2 + $0xbe4] ss:$16 sps:$4 sm:$0xff]  }
  0xde   :  { %3421 = vmatpush2.bf16.msra.mxu0 %v6161_v58  ;;  %v6243_v58 = vld [vmem:[#allocation2 + $0x9e0] ss:$16 sps:$4 sm:$0xff]  }
  0xdf   :  { %3462 = vmatpush2.bf16.msra.mxu1 %v6164_v59  ;;  %3422 = vmatprep.subr.bf16.mxu0 %v6169_v60  ;;  %v6246_v59 = vld [vmem:[#allocation2 + $0xbe0] ss:$16 sps:$4 sm:$0xff]   ;;  %v6251_v60 = vld [vmem:[#allocation2 + $0x9c4] ss:$16 sps:$4 sm:$0xff]  }
  0xe0   :  { %3463 = vmatprep.subr.bf16.mxu1 %v6172_v61  ;;  %v6254_v61 = vld [vmem:[#allocation2 + $0xbc4] ss:$16 sps:$4 sm:$0xff]  }
  0xe2   :  { %3423 = vmatpush2.bf16.msra.mxu0 %v6167_v62  ;;  %v6249_v62 = vld [vmem:[#allocation2 + $0x9c0] ss:$16 sps:$4 sm:$0xff]  }
  0xe3   :  { %3464 = vmatpush2.bf16.msra.mxu1 %v6170_v63  ;;  %3424 = vmatprep.subr.bf16.mxu0 %v6175_v0  ;;  %v6252_v63 = vld [vmem:[#allocation2 + $0xbc0] ss:$16 sps:$4 sm:$0xff]   ;;  %v6257_v0 = vld [vmem:[#allocation2 + $0x9a4] ss:$16 sps:$4 sm:$0xff]  }
  0xe4   :  { %3465 = vmatprep.subr.bf16.mxu1 %v6178_v1  ;;  %v6260_v1 = vld [vmem:[#allocation2 + $0xba4] ss:$16 sps:$4 sm:$0xff]  }
  0xe6   :  { %3425 = vmatpush2.bf16.msra.mxu0 %v6173_v2  ;;  %v6255_v2 = vld [vmem:[#allocation2 + $0x9a0] ss:$16 sps:$4 sm:$0xff]  }
  0xe7   :  { %3466 = vmatpush2.bf16.msra.mxu1 %v6176_v3  ;;  %3426 = vmatprep.subr.bf16.mxu0 %v6181_v4  ;;  %v6258_v3 = vld [vmem:[#allocation2 + $0xba0] ss:$16 sps:$4 sm:$0xff]   ;;  %v6263_v4 = vld [vmem:[#allocation2 + $0x984] ss:$16 sps:$4 sm:$0xff]  }
  0xe8   :  { %3467 = vmatprep.subr.bf16.mxu1 %v6184_v5  ;;  %v6266_v5 = vld [vmem:[#allocation2 + $0xb84] ss:$16 sps:$4 sm:$0xff]  }
  0xea   :  { %3427 = vmatpush2.bf16.msra.mxu0 %v6179_v8  ;;  %v6261_v8 = vld [vmem:[#allocation2 + $0x980] ss:$16 sps:$4 sm:$0xff]  }
  0xeb   :  { %3468 = vmatpush2.bf16.msra.mxu1 %v6182_v9  ;;  %3428 = vmatprep.subr.bf16.mxu0 %v6187_v10  ;;  %v6264_v9 = vld [vmem:[#allocation2 + $0xb80] ss:$16 sps:$4 sm:$0xff]   ;;  %v6269_v10 = vld [vmem:[#allocation2 + $0x964] ss:$16 sps:$4 sm:$0xff]  }
  0xec   :  { %3469 = vmatprep.subr.bf16.mxu1 %v6190_v11  ;;  %v6272_v11 = vld [vmem:[#allocation2 + $0xb64] ss:$16 sps:$4 sm:$0xff]  }
  0xee   :  { %3429 = vmatpush2.bf16.msra.mxu0 %v6185_v12  ;;  %v6267_v12 = vld [vmem:[#allocation2 + $0x960] ss:$16 sps:$4 sm:$0xff]  }
  0xef   :  { %3470 = vmatpush2.bf16.msra.mxu1 %v6188_v13  ;;  %3480 = vmatprep.subr.bf16.mxu0 %v6197_v14  ;;  %v6270_v13 = vld [vmem:[#allocation2 + $0xb60] ss:$16 sps:$4 sm:$0xff]   ;;  %v6275_v14 = vld [vmem:[#allocation2 + $0x944] ss:$16 sps:$4 sm:$0xff]  }
  0xf0   :  { %3521 = vmatprep.subr.bf16.mxu1 %v6200_v15  ;;  %v6278_v15 = vld [vmem:[#allocation2 + $0xb44] ss:$16 sps:$4 sm:$0xff]  }
  0xf1   :  { %3431 = vmatmul.mubr.bf16.vlgmr.msra.gmra.mxu0 %v7335_v16 }
  0xf2   :  { %3472 = vmatmul.mubr.bf16.vlgmr.msra.gmra.mxu1 %v7339_v17  ;;  %3481 = vmatpush1.bf16.msra.mxu0 %v6195_v18  ;;  %v6273_v18 = vld [vmem:[#allocation2 + $0x940] ss:$16 sps:$4 sm:$0xff]  }
  0xf3   :  { %3522 = vmatpush1.bf16.msra.mxu1 %v6198_v19  ;;  %3482 = vmatprep.subr.bf16.mxu0 %v6203_v20  ;;  %v6276_v19 = vld [vmem:[#allocation2 + $0xb40] ss:$16 sps:$4 sm:$0xff]   ;;  %v6281_v20 = vld [vmem:[#allocation2 + $0x924] ss:$16 sps:$4 sm:$0xff]  }
  0xf4   :  { %3523 = vmatprep.subr.bf16.mxu1 %v6206_v21  ;;  %3512 = vmatprep.mubr.bf16.mxu0 %v7353_v24  ;;  %v6284_v21 = vld [vmem:[#allocation2 + $0xb24] ss:$16 sps:$4 sm:$0xff]  }
  0xf5   :  { %3553 = vmatprep.mubr.bf16.mxu1 %v7357_v25 }
  0xf6   :  { %3483 = vmatpush1.bf16.msra.mxu0 %v6201_v26  ;;  %v6279_v26 = vld [vmem:[#allocation2 + $0x920] ss:$16 sps:$4 sm:$0xff]  }
  0xf7   :  { %3524 = vmatpush1.bf16.msra.mxu1 %v6204_v27  ;;  %3484 = vmatprep.subr.bf16.mxu0 %v6209_v28  ;;  %v6282_v27 = vld [vmem:[#allocation2 + $0xb20] ss:$16 sps:$4 sm:$0xff]   ;;  %v6287_v28 = vld [vmem:[#allocation2 + $0x904] ss:$16 sps:$4 sm:$0xff]  }
  0xf8   :  { %3525 = vmatprep.subr.bf16.mxu1 %v6212_v29  ;;  %v6290_v29 = vld [vmem:[#allocation2 + $0xb04] ss:$16 sps:$4 sm:$0xff]  }
  0xfa   :  { %3485 = vmatpush1.bf16.msra.mxu0 %v6207_v30  ;;  %v6285_v30 = vld [vmem:[#allocation2 + $0x900] ss:$16 sps:$4 sm:$0xff]  }
  0xfb   :  { %3526 = vmatpush1.bf16.msra.mxu1 %v6210_v31  ;;  %3486 = vmatprep.subr.bf16.mxu0 %v6215_v32  ;;  %v6288_v31 = vld [vmem:[#allocation2 + $0xb00] ss:$16 sps:$4 sm:$0xff]   ;;  %v6297_v32 = vld [vmem:[#allocation2 + $0xce4] ss:$16 sps:$4 sm:$0xff]  }
  0xfc   :  { %3527 = vmatprep.subr.bf16.mxu1 %v6218_v33  ;;  %v6300_v33 = vld [vmem:[#allocation2 + $0xee4] ss:$16 sps:$4 sm:$0xff]  }
  0xfe   :  { %3487 = vmatpush1.bf16.msra.mxu0 %v6213_v34  ;;  %v6295_v34 = vld [vmem:[#allocation2 + $0xce0] ss:$16 sps:$4 sm:$0xff]  }
  0xff   :  { %3528 = vmatpush1.bf16.msra.mxu1 %v6216_v35  ;;  %3488 = vmatprep.subr.bf16.mxu0 %v6221_v38  ;;  %v7366_v35 = vld [vmem:[%s7823_s0 + $0x30] sm:$0x77]  ;;  %v7370_v38 = vcombine.low %v7344_v22, %v7344_v22 }
 0x100   :  { %3529 = vmatprep.subr.bf16.mxu1 %v6224_v39  ;;  %v7374_v39 = vcombine.low %v7349_v23, %v7349_v23  ;;  %v7383_v22 = vcombine.high %v7366_v35, %v7366_v35 }
 0x102   :  { %3489 = vmatpush1.bf16.msra.mxu0 %v6219_v40  ;;  %v7379_v40 = vld [vmem:[%s7823_s0 + $0x38] sm:$0x77] }
 0x103   :  { %3530 = vmatpush1.bf16.msra.mxu1 %v6222_v41  ;;  %3490 = vmatprep.subr.bf16.mxu0 %v6227_v42  ;;  %v6298_v41 = vld [vmem:[#allocation2 + $0xee0] ss:$16 sps:$4 sm:$0xff]   ;;  %v6303_v42 = vld [vmem:[#allocation2 + $0xcc4] ss:$16 sps:$4 sm:$0xff]   ;;  %v7387_v23 = vcombine.high %v7379_v40, %v7379_v40 }
 0x104   :  { %3531 = vmatprep.subr.bf16.mxu1 %v6230_v43  ;;  %v6306_v43 = vld [vmem:[#allocation2 + $0xec4] ss:$16 sps:$4 sm:$0xff]  }
 0x106   :  { %3491 = vmatpush1.bf16.msra.mxu0 %v6225_v44  ;;  %v6301_v44 = vld [vmem:[#allocation2 + $0xcc0] ss:$16 sps:$4 sm:$0xff]  }
 0x107   :  { %3532 = vmatpush1.bf16.msra.mxu1 %v6228_v45  ;;  %3492 = vmatprep.subr.bf16.mxu0 %v6233_v46  ;;  %v6304_v45 = vld [vmem:[#allocation2 + $0xec0] ss:$16 sps:$4 sm:$0xff]   ;;  %v6309_v46 = vld [vmem:[#allocation2 + $0xca4] ss:$16 sps:$4 sm:$0xff]  }
 0x108   :  { %3533 = vmatprep.subr.bf16.mxu1 %v6236_v48  ;;  %v6312_v48 = vld [vmem:[#allocation2 + $0xea4] ss:$16 sps:$4 sm:$0xff]  }
 0x10a   :  { %3493 = vmatpush1.bf16.msra.mxu0 %v6231_v49  ;;  %v6307_v49 = vld [vmem:[#allocation2 + $0xca0] ss:$16 sps:$4 sm:$0xff]  }
 0x10b   :  { %3534 = vmatpush1.bf16.msra.mxu1 %v6234_v50  ;;  %3494 = vmatprep.subr.bf16.mxu0 %v6239_v52  ;;  %v6310_v50 = vld [vmem:[#allocation2 + $0xea0] ss:$16 sps:$4 sm:$0xff]   ;;  %v6315_v52 = vld [vmem:[#allocation2 + $0xc84] ss:$16 sps:$4 sm:$0xff]  }
 0x10c   :  { %3535 = vmatprep.subr.bf16.mxu1 %v6242_v53  ;;  %v6318_v53 = vld [vmem:[#allocation2 + $0xe84] ss:$16 sps:$4 sm:$0xff]  }
 0x10e   :  { %3495 = vmatpush1.bf16.msra.mxu0 %v6237_v54  ;;  %v6313_v54 = vld [vmem:[#allocation2 + $0xc80] ss:$16 sps:$4 sm:$0xff]  }
 0x10f   :  { %3536 = vmatpush1.bf16.msra.mxu1 %v6240_v55  ;;  %3496 = vmatprep.subr.bf16.mxu0 %v6245_v56  ;;  %v6316_v55 = vld [vmem:[#allocation2 + $0xe80] ss:$16 sps:$4 sm:$0xff]   ;;  %v6321_v56 = vld [vmem:[#allocation2 + $0xc64] ss:$16 sps:$4 sm:$0xff]  }
 0x110   :  { %3537 = vmatprep.subr.bf16.mxu1 %v6248_v57  ;;  %v6324_v57 = vld [vmem:[#allocation2 + $0xe64] ss:$16 sps:$4 sm:$0xff]  }
 0x112   :  { %3497 = vmatpush2.bf16.msra.mxu0 %v6243_v58  ;;  %v6319_v58 = vld [vmem:[#allocation2 + $0xc60] ss:$16 sps:$4 sm:$0xff]  }
 0x113   :  { %3538 = vmatpush2.bf16.msra.mxu1 %v6246_v59  ;;  %3498 = vmatprep.subr.bf16.mxu0 %v6251_v60  ;;  %v6322_v59 = vld [vmem:[#allocation2 + $0xe60] ss:$16 sps:$4 sm:$0xff]   ;;  %v6327_v60 = vld [vmem:[#allocation2 + $0xc44] ss:$16 sps:$4 sm:$0xff]  }
 0x114   :  { %3539 = vmatprep.subr.bf16.mxu1 %v6254_v61  ;;  %v6330_v61 = vld [vmem:[#allocation2 + $0xe44] ss:$16 sps:$4 sm:$0xff]  }
 0x116   :  { %3499 = vmatpush2.bf16.msra.mxu0 %v6249_v62  ;;  %v6325_v62 = vld [vmem:[#allocation2 + $0xc40] ss:$16 sps:$4 sm:$0xff]  }
 0x117   :  { %3540 = vmatpush2.bf16.msra.mxu1 %v6252_v63  ;;  %3500 = vmatprep.subr.bf16.mxu0 %v6257_v0  ;;  %v6328_v63 = vld [vmem:[#allocation2 + $0xe40] ss:$16 sps:$4 sm:$0xff]   ;;  %v6333_v0 = vld [vmem:[#allocation2 + $0xc24] ss:$16 sps:$4 sm:$0xff]  }
 0x118   :  { %3541 = vmatprep.subr.bf16.mxu1 %v6260_v1  ;;  %v6336_v1 = vld [vmem:[#allocation2 + $0xe24] ss:$16 sps:$4 sm:$0xff]  }
 0x11a   :  { %3501 = vmatpush2.bf16.msra.mxu0 %v6255_v2  ;;  %v6331_v2 = vld [vmem:[#allocation2 + $0xc20] ss:$16 sps:$4 sm:$0xff]  }
 0x11b   :  { %3542 = vmatpush2.bf16.msra.mxu1 %v6258_v3  ;;  %3502 = vmatprep.subr.bf16.mxu0 %v6263_v4  ;;  %v6334_v3 = vld [vmem:[#allocation2 + $0xe20] ss:$16 sps:$4 sm:$0xff]   ;;  %v6339_v4 = vld [vmem:[#allocation2 + $0xc04] ss:$16 sps:$4 sm:$0xff]  }
 0x11c   :  { %3543 = vmatprep.subr.bf16.mxu1 %v6266_v5  ;;  %v6342_v5 = vld [vmem:[#allocation2 + $0xe04] ss:$16 sps:$4 sm:$0xff]  }
 0x11e   :  { %3503 = vmatpush2.bf16.msra.mxu0 %v6261_v8  ;;  %v6337_v8 = vld [vmem:[#allocation2 + $0xc00] ss:$16 sps:$4 sm:$0xff]  }
 0x11f   :  { %3544 = vmatpush2.bf16.msra.mxu1 %v6264_v9  ;;  %3504 = vmatprep.subr.bf16.mxu0 %v6269_v10  ;;  %v6340_v9 = vld [vmem:[#allocation2 + $0xe00] ss:$16 sps:$4 sm:$0xff]   ;;  %v6345_v10 = vld [vmem:[#allocation2 + $0xde4] ss:$16 sps:$4 sm:$0xff]  }
 0x120   :  { %3545 = vmatprep.subr.bf16.mxu1 %v6272_v11  ;;  %v6348_v11 = vld [vmem:[#allocation2 + $0xfe4] ss:$16 sps:$4 sm:$0xff]  }
 0x122   :  { %3505 = vmatpush2.bf16.msra.mxu0 %v6267_v12  ;;  %v6343_v12 = vld [vmem:[#allocation2 + $0xde0] ss:$16 sps:$4 sm:$0xff]  }
 0x123   :  { %3546 = vmatpush2.bf16.msra.mxu1 %v6270_v13  ;;  %3506 = vmatprep.subr.bf16.mxu0 %v6275_v14  ;;  %v6346_v13 = vld [vmem:[#allocation2 + $0xfe0] ss:$16 sps:$4 sm:$0xff]   ;;  %v6351_v14 = vld [vmem:[#allocation2 + $0xdc4] ss:$16 sps:$4 sm:$0xff]  }
 0x124   :  { %3547 = vmatprep.subr.bf16.mxu1 %v6278_v15  ;;  %v6354_v15 = vld [vmem:[#allocation2 + $0xfc4] ss:$16 sps:$4 sm:$0xff]  }
 0x126   :  { %3507 = vmatpush2.bf16.msra.mxu0 %v6273_v18  ;;  %v6349_v18 = vld [vmem:[#allocation2 + $0xdc0] ss:$16 sps:$4 sm:$0xff]  }
 0x127   :  { %3548 = vmatpush2.bf16.msra.mxu1 %v6276_v19  ;;  %3508 = vmatprep.subr.bf16.mxu0 %v6281_v20  ;;  %v6352_v19 = vld [vmem:[#allocation2 + $0xfc0] ss:$16 sps:$4 sm:$0xff]   ;;  %v6357_v20 = vld [vmem:[#allocation2 + $0xda4] ss:$16 sps:$4 sm:$0xff]  }
 0x128   :  { %3549 = vmatprep.subr.bf16.mxu1 %v6284_v21  ;;  %v6360_v21 = vld [vmem:[#allocation2 + $0xfa4] ss:$16 sps:$4 sm:$0xff]  }
 0x12a   :  { %3509 = vmatpush2.bf16.msra.mxu0 %v6279_v26  ;;  %v6355_v26 = vld [vmem:[#allocation2 + $0xda0] ss:$16 sps:$4 sm:$0xff]  }
 0x12b   :  { %3550 = vmatpush2.bf16.msra.mxu1 %v6282_v27  ;;  %3510 = vmatprep.subr.bf16.mxu0 %v6287_v28  ;;  %v6358_v27 = vld [vmem:[#allocation2 + $0xfa0] ss:$16 sps:$4 sm:$0xff]   ;;  %v6363_v28 = vld [vmem:[#allocation2 + $0xd84] ss:$16 sps:$4 sm:$0xff]  }
 0x12c   :  { %3551 = vmatprep.subr.bf16.mxu1 %v6290_v29  ;;  %v6366_v29 = vld [vmem:[#allocation2 + $0xf84] ss:$16 sps:$4 sm:$0xff]  }
 0x12e   :  { %3511 = vmatpush2.bf16.msra.mxu0 %v6285_v30  ;;  %v6361_v30 = vld [vmem:[#allocation2 + $0xd80] ss:$16 sps:$4 sm:$0xff]  }
 0x12f   :  { %3552 = vmatpush2.bf16.msra.mxu1 %v6288_v31  ;;  %3562 = vmatprep.subr.bf16.mxu0 %v6297_v32  ;;  %v6364_v31 = vld [vmem:[#allocation2 + $0xf80] ss:$16 sps:$4 sm:$0xff]   ;;  %v6369_v32 = vld [vmem:[#allocation2 + $0xd64] ss:$16 sps:$4 sm:$0xff]  }
 0x130   :  { %3603 = vmatprep.subr.bf16.mxu1 %v6300_v33  ;;  %v6372_v33 = vld [vmem:[#allocation2 + $0xf64] ss:$16 sps:$4 sm:$0xff]  }
 0x131   :  { %3513 = vmatmul.mubr.bf16.vlgmr.msra.gmra.mxu0 %v7370_v38 }
 0x132   :  { %3554 = vmatmul.mubr.bf16.vlgmr.msra.gmra.mxu1 %v7374_v39  ;;  %3563 = vmatpush1.bf16.msra.mxu0 %v6295_v34  ;;  %v6367_v34 = vld [vmem:[#allocation2 + $0xd60] ss:$16 sps:$4 sm:$0xff]  }
 0x133   :  { %3604 = vmatpush1.bf16.msra.mxu1 %v6298_v41  ;;  %3564 = vmatprep.subr.bf16.mxu0 %v6303_v42  ;;  %v6370_v41 = vld [vmem:[#allocation2 + $0xf60] ss:$16 sps:$4 sm:$0xff]   ;;  %v6375_v42 = vld [vmem:[#allocation2 + $0xd44] ss:$16 sps:$4 sm:$0xff]  }
 0x134   :  { %3605 = vmatprep.subr.bf16.mxu1 %v6306_v43  ;;  %3594 = vmatprep.mubr.bf16.mxu0 %v7383_v22  ;;  %v6378_v43 = vld [vmem:[#allocation2 + $0xf44] ss:$16 sps:$4 sm:$0xff]  }
 0x135   :  { %3635 = vmatprep.mubr.bf16.mxu1 %v7387_v23 }
 0x136   :  { %3565 = vmatpush1.bf16.msra.mxu0 %v6301_v44  ;;  %v6373_v44 = vld [vmem:[#allocation2 + $0xd40] ss:$16 sps:$4 sm:$0xff]  }
 0x137   :  { %3606 = vmatpush1.bf16.msra.mxu1 %v6304_v45  ;;  %3566 = vmatprep.subr.bf16.mxu0 %v6309_v46  ;;  %v6376_v45 = vld [vmem:[#allocation2 + $0xf40] ss:$16 sps:$4 sm:$0xff]   ;;  %v680_v46 = vlaneseq }
 0x138   :  { %3607 = vmatprep.subr.bf16.mxu1 %v6312_v48  ;;  %v6381_v48 = vld [vmem:[#allocation2 + $0xd24] ss:$16 sps:$4 sm:$0xff]  }
 0x13a   :  { %3567 = vmatpush1.bf16.msra.mxu0 %v6307_v49  ;;  %v6384_v49 = vld [vmem:[#allocation2 + $0xf24] ss:$16 sps:$4 sm:$0xff]  }
 0x13b   :  { %3608 = vmatpush1.bf16.msra.mxu1 %v6310_v50  ;;  %3568 = vmatprep.subr.bf16.mxu0 %v6315_v52  ;;  %v6379_v50 = vld [vmem:[#allocation2 + $0xd20] ss:$16 sps:$4 sm:$0xff]  }
 0x13c   :  { %3609 = vmatprep.subr.bf16.mxu1 %v6318_v53  ;;  %v6382_v52 = vld [vmem:[#allocation2 + $0xf20] ss:$16 sps:$4 sm:$0xff]   ;;  %v7393_v53 = vshrl.u32 %v680_v46, 7  ;;  %v6428_v46 = vld [vmem:[#allocation2 + $0x248] ss:$16 sps:$4 sm:$0xff]  }
 0x13e   :  { %3569 = vmatpush1.bf16.msra.mxu0 %v6313_v54  ;;  %v6387_v54 = vld [vmem:[#allocation2 + $0xd04] ss:$16 sps:$4 sm:$0xff]  }
 0x13f   :  { %3610 = vmatpush1.bf16.msra.mxu1 %v6316_v55  ;;  %3570 = vmatprep.subr.bf16.mxu0 %v6321_v56  ;;  %v6390_v55 = vld [vmem:[#allocation2 + $0xf04] ss:$16 sps:$4 sm:$0xff]   ;;  %v6385_v56 = vld [vmem:[#allocation2 + $0xd00] ss:$16 sps:$4 sm:$0xff]  }
 0x140   :  { %3611 = vmatprep.subr.bf16.mxu1 %v6324_v57  ;;  %v6388_v57 = vld [vmem:[#allocation2 + $0xf00] ss:$16 sps:$4 sm:$0xff]  }
 0x142   :  { %3571 = vmatpush1.bf16.msra.mxu0 %v6319_v58  ;;  %v678_v58 = vld [vmem:[#allocation7] sm:$0xf] }
 0x143   :  { %3612 = vmatpush1.bf16.msra.mxu1 %v6322_v59  ;;  %3572 = vmatprep.subr.bf16.mxu0 %v6327_v60  ;;  %v682_v59 = vsub.s32 0, %v7393_v53  ;;  %v6397_v60 = vld [vmem:[#allocation2 + $0xec] ss:$16 sps:$4 sm:$0xff]  }
 0x144   :  { %3613 = vmatprep.subr.bf16.mxu1 %v6330_v61  ;;  %v6400_v61 = vld [vmem:[#allocation2 + $0x2ec] ss:$16 sps:$4 sm:$0xff]  }
 0x146   :  { %3573 = vmatpush1.bf16.msra.mxu0 %v6325_v62  ;;  %v686_v62 = vsub.s32 1, %v7393_v53 }
 0x147   :  { %3614 = vmatpush1.bf16.msra.mxu1 %v6328_v63  ;;  %3574 = vmatprep.subr.bf16.mxu0 %v6333_v0  ;;  %v7399_v63 = vcombine.low %v7366_v35, %v7366_v35  ;;  %v7403_v0 = vcombine.low %v7379_v40, %v7379_v40  ;;  %v6404_v40 = vld [vmem:[#allocation2 + $0x2c8] ss:$16 sps:$4 sm:$0xff]  }
 0x148   :  { %3615 = vmatprep.subr.bf16.mxu1 %v6336_v1  ;;  %v6395_v1 = vld [vmem:[#allocation2 + $0xe8] ss:$16 sps:$4 sm:$0xff]  }
 0x14a   :  { %3575 = vmatpush1.bf16.msra.mxu0 %v6331_v2  ;;  %v683_v2 = vrot.slane %v678_v58, %v682_v59  ;;  %v6448_v59 = vld [vmem:[#allocation2 + $0x3ec] ss:$16 sps:$4 sm:$0xff]  }
 0x14b   :  { %3616 = vmatpush1.bf16.msra.mxu1 %v6334_v3  ;;  %3576 = vmatprep.subr.bf16.mxu0 %v6339_v4  ;;  %v6398_v3 = vld [vmem:[#allocation2 + $0x2e8] ss:$16 sps:$4 sm:$0xff]   ;;  %v6403_v4 = vld [vmem:[#allocation2 + $0xcc] ss:$16 sps:$4 sm:$0xff]  }
 0x14c   :  { %3617 = vmatprep.subr.bf16.mxu1 %v6342_v5  ;;  %v6406_v5 = vld [vmem:[#allocation2 + $0x2cc] ss:$16 sps:$4 sm:$0xff]  }
 0x14e   :  { %3577 = vmatpush1.bf16.msra.mxu0 %v6337_v8  ;;  %v687_v8 = vrot.slane %v678_v58, %v686_v62  ;;  %v6445_v58 = vld [vmem:[#allocation2 + $0x1ec] ss:$16 sps:$4 sm:$0xff]  }
 0x14f   :  { %3618 = vmatpush1.bf16.msra.mxu1 %v6340_v9  ;;  %3578 = vmatprep.subr.bf16.mxu0 %v6345_v10  ;;  %v6401_v10 = vld [vmem:[#allocation2 + $0xc8] ss:$16 sps:$4 sm:$0xff]   ;;  %v6451_v62 = vld [vmem:[#allocation2 + $0x1cc] ss:$16 sps:$4 sm:$0xff]  }
 0x150   :  { %3619 = vmatprep.subr.bf16.mxu1 %v6348_v11 }
 0x152   :  { %3579 = vmatpush2.bf16.msra.mxu0 %v6343_v12 }
 0x153   :  { %3620 = vmatpush2.bf16.msra.mxu1 %v6346_v13  ;;  %3580 = vmatprep.subr.bf16.mxu0 %v6351_v14  ;;  %v6409_v14 = vld [vmem:[#allocation2 + $0xac] ss:$16 sps:$4 sm:$0xff]  }
 0x154   :  { %3621 = vmatprep.subr.bf16.mxu1 %v6354_v15  ;;  %v6412_v15 = vld [vmem:[#allocation2 + $0x2ac] ss:$16 sps:$4 sm:$0xff]  }
 0x156   :  { %3581 = vmatpush2.bf16.msra.mxu0 %v6349_v18 }
 0x157   :  { %3622 = vmatpush2.bf16.msra.mxu1 %v6352_v19  ;;  %3582 = vmatprep.subr.bf16.mxu0 %v6357_v20 }
 0x158   :  { %3623 = vmatprep.subr.bf16.mxu1 %v6360_v21  ;;  %v6407_v21 = vld [vmem:[#allocation2 + $0xa8] ss:$16 sps:$4 sm:$0xff]  }
 0x15a   :  { %3583 = vmatpush2.bf16.msra.mxu0 %v6355_v26 }
 0x15b   :  { %3624 = vmatpush2.bf16.msra.mxu1 %v6358_v27  ;;  %3584 = vmatprep.subr.bf16.mxu0 %v6363_v28  ;;  %v6410_v28 = vld [vmem:[#allocation2 + $0x2a8] ss:$16 sps:$4 sm:$0xff]  }
 0x15c   :  { %3625 = vmatprep.subr.bf16.mxu1 %v6366_v29 }
 0x15e   :  { %3585 = vmatpush2.bf16.msra.mxu0 %v6361_v30  ;;  %v6415_v30 = vld [vmem:[#allocation2 + $0x8c] ss:$16 sps:$4 sm:$0xff]  }
 0x15f   :  { %3626 = vmatpush2.bf16.msra.mxu1 %v6364_v31  ;;  %3586 = vmatprep.subr.bf16.mxu0 %v6369_v32  ;;  %v6418_v31 = vld [vmem:[#allocation2 + $0x28c] ss:$16 sps:$4 sm:$0xff]  }
 0x160   :  { %3627 = vmatprep.subr.bf16.mxu1 %v6372_v33  ;;  %v6413_v33 = vld [vmem:[#allocation2 + $0x88] ss:$16 sps:$4 sm:$0xff]  }
 0x162   :  { %3587 = vmatpush2.bf16.msra.mxu0 %v6367_v34  ;;  %v6424_v34 = vld [vmem:[#allocation2 + $0x26c] ss:$16 sps:$4 sm:$0xff]  }
 0x163   :  { %3628 = vmatpush2.bf16.msra.mxu1 %v6370_v41  ;;  %3588 = vmatprep.subr.bf16.mxu0 %v6375_v42  ;;  %v6419_v41 = vld [vmem:[#allocation2 + $0x68] ss:$16 sps:$4 sm:$0xff]  }
 0x164   :  { %3629 = vmatprep.subr.bf16.mxu1 %v6378_v43  ;;  %v6422_v42 = vld [vmem:[#allocation2 + $0x268] ss:$16 sps:$4 sm:$0xff]   ;;  %v6427_v43 = vld [vmem:[#allocation2 + $0x4c] ss:$16 sps:$4 sm:$0xff]  }
 0x166   :  { %3589 = vmatpush2.bf16.msra.mxu0 %v6373_v44  ;;  %v6430_v44 = vld [vmem:[#allocation2 + $0x24c] ss:$16 sps:$4 sm:$0xff]  }
 0x167   :  { %3630 = vmatpush2.bf16.msra.mxu1 %v6376_v45  ;;  %3590 = vmatprep.subr.bf16.mxu0 %v6381_v48  ;;  %v6425_v45 = vld [vmem:[#allocation2 + $0x48] ss:$16 sps:$4 sm:$0xff]   ;;  %v6433_v48 = vld [vmem:[#allocation2 + $0x2c] ss:$16 sps:$4 sm:$0xff]  }
 0x168   :  { %3631 = vmatprep.subr.bf16.mxu1 %v6384_v49  ;;  %v6436_v49 = vld [vmem:[#allocation2 + $0x22c] ss:$16 sps:$4 sm:$0xff]  }
 0x16a   :  { %3591 = vmatpush2.bf16.msra.mxu0 %v6379_v50  ;;  %v6431_v50 = vld [vmem:[#allocation2 + $0x28] ss:$16 sps:$4 sm:$0xff]  }
 0x16b   :  { %3632 = vmatpush2.bf16.msra.mxu1 %v6382_v52  ;;  %3592 = vmatprep.subr.bf16.mxu0 %v6387_v54  ;;  %v6434_v52 = vld [vmem:[#allocation2 + $0x228] ss:$16 sps:$4 sm:$0xff]   ;;  %v6439_v54 = vld [vmem:[#allocation2 + $0xc] ss:$16 sps:$4 sm:$0xff]  }
 0x16c   :  { %3633 = vmatprep.subr.bf16.mxu1 %v6390_v55  ;;  %v6442_v55 = vld [vmem:[#allocation2 + $0x20c] ss:$16 sps:$4 sm:$0xff]  }
 0x16e   :  { %3593 = vmatpush2.bf16.msra.mxu0 %v6385_v56  ;;  %v6437_v56 = vld [vmem:[#allocation2 + $0x8] ss:$16 sps:$4 sm:$0xff]  }
 0x16f   :  { %3634 = vmatpush2.bf16.msra.mxu1 %v6388_v57  ;;  %3644 = vmatprep.subr.bf16.mxu0 %v6397_v60  ;;  %v6440_v57 = vld [vmem:[#allocation2 + $0x208] ss:$16 sps:$4 sm:$0xff]  }
 0x170   :  { %3685 = vmatprep.subr.bf16.mxu1 %v6400_v61  ;;  %v6443_v60 = vld [vmem:[#allocation2 + $0x1e8] ss:$16 sps:$4 sm:$0xff]  }
 0x171   :  { %v3350_v9 = vpop.f32.mrf.mxu0  ;;  %3595 = vmatmul.mubr.bf16.vlgmr.msra.gmra.mxu0 %v7399_v63  ;;  %v6446_v61 = vld [vmem:[#allocation2 + $0x3e8] ss:$16 sps:$4 sm:$0xff]  }
 0x172   :  { %3636 = vmatmul.mubr.bf16.vlgmr.msra.gmra.mxu1 %v7403_v0  ;;  %v3391_v35 = vpop.f32.mrf.mxu1  ;;  %v3351_v11 = vadd.f32 %v3350_v9, %v683_v2  ;;  %3645 = vmatpush1.bf16.msra.mxu0 %v6395_v1  ;;  %v6454_v1 = vld [vmem:[#allocation2 + $0x3cc] ss:$16 sps:$4 sm:$0xff]   ;;  %v6449_v2 = vld [vmem:[#allocation2 + $0x1c8] ss:$16 sps:$4 sm:$0xff]  }
 0x173   :  { %3686 = vmatpush1.bf16.msra.mxu1 %v6398_v3  ;;  %v3352_v12 = vpop.f32.mrf.mxu0  ;;  %3646 = vmatprep.subr.bf16.mxu0 %v6403_v4  ;;  %v6452_v3 = vld [vmem:[#allocation2 + $0x3c8] ss:$16 sps:$4 sm:$0xff]   ;;  %v6457_v4 = vld [vmem:[#allocation2 + $0x1ac] ss:$16 sps:$4 sm:$0xff]  }
 0x174   :  { %v3393_v13 = vpop.f32.mrf.mxu1  ;;  %3687 = vmatprep.subr.bf16.mxu1 %v6406_v5  ;;  %v3353_v18 = vadd.f32 %v3352_v12, %v687_v8  ;;  %v7407_v19 = vadd.f32 %v3391_v35, %v3351_v11  ;;  %3676 = vmatprep.mubr.bf16.mxu0 %v7298_v47  ;;  %v6416_v47 = vld [vmem:[#allocation2 + $0x288] ss:$16 sps:$4 sm:$0xff]   ;;  %v6460_v5 = vld [vmem:[#allocation2 + $0x3ac] ss:$16 sps:$4 sm:$0xff]  }
 0x175   :  { %3717 = vmatprep.mubr.bf16.mxu1 %v7303_v51  ;;  %v3354_v20 = vpop.f32.mrf.mxu0  ;;  %v6421_v51 = vld [vmem:[#allocation2 + $0x6c] ss:$16 sps:$4 sm:$0xff]   ;;  %v6455_v8 = vld [vmem:[#allocation2 + $0x1a8] ss:$16 sps:$4 sm:$0xff]  }
 0x176   :  { %v3395_v26 = vpop.f32.mrf.mxu1  ;;  %v7411_v27 = vadd.f32 %v3393_v13, %v3353_v18  ;;  %3647 = vmatpush1.bf16.msra.mxu0 %v6401_v10  ;;  %v6458_v9 = vld [vmem:[#allocation2 + $0x3a8] ss:$16 sps:$4 sm:$0xff]   ;;  %v6463_v35 = vld [vmem:[#allocation2 + $0x18c] ss:$16 sps:$4 sm:$0xff]  }
 0x177   :  { %3688 = vmatpush1.bf16.msra.mxu1 %v6404_v40  ;;  %v3355_v29 = vpop.f32.mrf.mxu0  ;;  %3648 = vmatprep.subr.bf16.mxu0 %v6409_v14  ;;  %v6466_v10 = vld [vmem:[#allocation2 + $0x38c] ss:$16 sps:$4 sm:$0xff]   ;;  %v6461_v11 = vld [vmem:[#allocation2 + $0x188] ss:$16 sps:$4 sm:$0xff]  }
 0x178   :  { %3689 = vmatprep.subr.bf16.mxu1 %v6412_v15  ;;  %v3396_v32 = vpop.f32.mrf.mxu1  ;;  %v6464_v40 = vld [vmem:[#allocation2 + $0x388] ss:$16 sps:$4 sm:$0xff]   ;;  %v6469_v12 = vld [vmem:[#allocation2 + $0x16c] ss:$16 sps:$4 sm:$0xff]  }
 0x179   :  { %v6472_v13 = vld [vmem:[#allocation2 + $0x36c] ss:$16 sps:$4 sm:$0xff]   ;;  %v6467_v14 = vld [vmem:[#allocation2 + $0x168] ss:$16 sps:$4 sm:$0xff]  }
 0x17a   :  { %3649 = vmatpush1.bf16.msra.mxu0 %v6407_v21  ;;  %v6470_v15 = vld [vmem:[#allocation2 + $0x368] ss:$16 sps:$4 sm:$0xff]   ;;  %v6475_v18 = vld [vmem:[#allocation2 + $0x14c] ss:$16 sps:$4 sm:$0xff]  }
 0x17b   :  { %3690 = vmatpush1.bf16.msra.mxu1 %v6410_v28  ;;  %3650 = vmatprep.subr.bf16.mxu0 %v6415_v30  ;;  %v6478_v20 = vld [vmem:[#allocation2 + $0x34c] ss:$16 sps:$4 sm:$0xff]   ;;  %v6473_v21 = vld [vmem:[#allocation2 + $0x148] ss:$16 sps:$4 sm:$0xff]  }
 0x17c   :  { %3691 = vmatprep.subr.bf16.mxu1 %v6418_v31  ;;  %v6476_v26 = vld [vmem:[#allocation2 + $0x348] ss:$16 sps:$4 sm:$0xff]   ;;  %v6481_v28 = vld [vmem:[#allocation2 + $0x12c] ss:$16 sps:$4 sm:$0xff]  }
 0x17d   :  { %v6484_v29 = vld [vmem:[#allocation2 + $0x32c] ss:$16 sps:$4 sm:$0xff]   ;;  %v6479_v30 = vld [vmem:[#allocation2 + $0x128] ss:$16 sps:$4 sm:$0xff]  }
 0x17e   :  { %3651 = vmatpush1.bf16.msra.mxu0 %v6413_v33  ;;  %v6482_v31 = vld [vmem:[#allocation2 + $0x328] ss:$16 sps:$4 sm:$0xff]   ;;  %v6487_v32 = vld [vmem:[#allocation2 + $0x10c] ss:$16 sps:$4 sm:$0xff]  }
 0x17f   :  { %3692 = vmatpush1.bf16.msra.mxu1 %v6416_v47  ;;  %3652 = vmatprep.subr.bf16.mxu0 %v6421_v51  ;;  %v6490_v33 = vld [vmem:[#allocation2 + $0x30c] ss:$16 sps:$4 sm:$0xff]   ;;  %v6485_v47 = vld [vmem:[#allocation2 + $0x108] ss:$16 sps:$4 sm:$0xff]  }
 0x180   :  { %3693 = vmatprep.subr.bf16.mxu1 %v6424_v34  ;;  %v6488_v51 = vld [vmem:[#allocation2 + $0x308] ss:$16 sps:$4 sm:$0xff]   ;;  %v6493_v34 = vld [vmem:[#allocation2 + $0x4ec] ss:$16 sps:$4 sm:$0xff]  }
 0x182   :  { %3653 = vmatpush1.bf16.msra.mxu0 %v6419_v41  ;;  %v6496_v41 = vld [vmem:[#allocation2 + $0x6ec] ss:$16 sps:$4 sm:$0xff]  }
 0x183   :  { %3694 = vmatpush1.bf16.msra.mxu1 %v6422_v42  ;;  %3654 = vmatprep.subr.bf16.mxu0 %v6427_v43  ;;  %v6491_v42 = vld [vmem:[#allocation2 + $0x4e8] ss:$16 sps:$4 sm:$0xff]  }
 0x184   :  { %3695 = vmatprep.subr.bf16.mxu1 %v6430_v44  ;;  %v6494_v43 = vld [vmem:[#allocation2 + $0x6e8] ss:$16 sps:$4 sm:$0xff]   ;;  %v6499_v44 = vld [vmem:[#allocation2 + $0x4cc] ss:$16 sps:$4 sm:$0xff]  }
 0x186   :  { %3655 = vmatpush1.bf16.msra.mxu0 %v6425_v45  ;;  %v6502_v45 = vld [vmem:[#allocation2 + $0x6cc] ss:$16 sps:$4 sm:$0xff]  }
 0x187   :  { %3696 = vmatpush1.bf16.msra.mxu1 %v6428_v46  ;;  %3656 = vmatprep.subr.bf16.mxu0 %v6433_v48  ;;  %v6497_v46 = vld [vmem:[#allocation2 + $0x4c8] ss:$16 sps:$4 sm:$0xff]  }
 0x188   :  { %3697 = vmatprep.subr.bf16.mxu1 %v6436_v49  ;;  %v6500_v48 = vld [vmem:[#allocation2 + $0x6c8] ss:$16 sps:$4 sm:$0xff]  }
 0x18a   :  { %3657 = vmatpush1.bf16.msra.mxu0 %v6431_v50 }
 0x18b   :  { %3698 = vmatpush1.bf16.msra.mxu1 %v6434_v52  ;;  %3658 = vmatprep.subr.bf16.mxu0 %v6439_v54 }
 0x18c   :  { %3699 = vmatprep.subr.bf16.mxu1 %v6442_v55 }
 0x18e   :  { %3659 = vmatpush1.bf16.msra.mxu0 %v6437_v56  ;;  %v6505_v56 = vld [vmem:[#allocation2 + $0x4ac] ss:$16 sps:$4 sm:$0xff]  }
 0x18f   :  { %3700 = vmatpush1.bf16.msra.mxu1 %v6440_v57  ;;  %3660 = vmatprep.subr.bf16.mxu0 %v6445_v58  ;;  %v6508_v57 = vld [vmem:[#allocation2 + $0x6ac] ss:$16 sps:$4 sm:$0xff]  }
 0x190   :  { %3701 = vmatprep.subr.bf16.mxu1 %v6448_v59 }
 0x192   :  { %3661 = vmatpush2.bf16.msra.mxu0 %v6443_v60  ;;  %v6503_v60 = vld [vmem:[#allocation2 + $0x4a8] ss:$16 sps:$4 sm:$0xff]  }
 0x193   :  { %3702 = vmatpush2.bf16.msra.mxu1 %v6446_v61  ;;  %3662 = vmatprep.subr.bf16.mxu0 %v6451_v62  ;;  %v6506_v61 = vld [vmem:[#allocation2 + $0x6a8] ss:$16 sps:$4 sm:$0xff]  }
 0x194   :  { %3703 = vmatprep.subr.bf16.mxu1 %v6454_v1  ;;  %v6511_v1 = vld [vmem:[#allocation2 + $0x48c] ss:$16 sps:$4 sm:$0xff]  }
 0x196   :  { %3663 = vmatpush2.bf16.msra.mxu0 %v6449_v2  ;;  %v6514_v2 = vld [vmem:[#allocation2 + $0x68c] ss:$16 sps:$4 sm:$0xff]  }
 0x197   :  { %3704 = vmatpush2.bf16.msra.mxu1 %v6452_v3  ;;  %3664 = vmatprep.subr.bf16.mxu0 %v6457_v4  ;;  %v6509_v3 = vld [vmem:[#allocation2 + $0x488] ss:$16 sps:$4 sm:$0xff]  }
 0x198   :  { %3705 = vmatprep.subr.bf16.mxu1 %v6460_v5  ;;  %v6512_v4 = vld [vmem:[#allocation2 + $0x688] ss:$16 sps:$4 sm:$0xff]  }
 0x199   :  { %v6515_v5 = vld [vmem:[#allocation2 + $0x468] ss:$16 sps:$4 sm:$0xff]  }
 0x19a   :  { %3665 = vmatpush2.bf16.msra.mxu0 %v6455_v8  ;;  %v6518_v8 = vld [vmem:[#allocation2 + $0x668] ss:$16 sps:$4 sm:$0xff]  }
 0x19b   :  { %3706 = vmatpush2.bf16.msra.mxu1 %v6458_v9  ;;  %3666 = vmatprep.subr.bf16.mxu0 %v6463_v35  ;;  %v6523_v9 = vld [vmem:[#allocation2 + $0x44c] ss:$16 sps:$4 sm:$0xff]  }
 0x19c   :  { %3707 = vmatprep.subr.bf16.mxu1 %v6466_v10  ;;  %v6526_v35 = vld [vmem:[#allocation2 + $0x64c] ss:$16 sps:$4 sm:$0xff]   ;;  %v6521_v10 = vld [vmem:[#allocation2 + $0x448] ss:$16 sps:$4 sm:$0xff]  }
 0x19e   :  { %3667 = vmatpush2.bf16.msra.mxu0 %v6461_v11  ;;  %v6524_v11 = vld [vmem:[#allocation2 + $0x648] ss:$16 sps:$4 sm:$0xff]  }
 0x19f   :  { %3708 = vmatpush2.bf16.msra.mxu1 %v6464_v40  ;;  %3668 = vmatprep.subr.bf16.mxu0 %v6469_v12  ;;  %v6529_v40 = vld [vmem:[#allocation2 + $0x42c] ss:$16 sps:$4 sm:$0xff]  }
 0x1a0   :  { %3709 = vmatprep.subr.bf16.mxu1 %v6472_v13  ;;  %v6532_v12 = vld [vmem:[#allocation2 + $0x62c] ss:$16 sps:$4 sm:$0xff]   ;;  %v6527_v13 = vld [vmem:[#allocation2 + $0x428] ss:$16 sps:$4 sm:$0xff]  }
 0x1a2   :  { %3669 = vmatpush2.bf16.msra.mxu0 %v6467_v14  ;;  %v6530_v14 = vld [vmem:[#allocation2 + $0x628] ss:$16 sps:$4 sm:$0xff]  }
 0x1a3   :  { %3710 = vmatpush2.bf16.msra.mxu1 %v6470_v15  ;;  %3670 = vmatprep.subr.bf16.mxu0 %v6475_v18  ;;  %v6535_v15 = vld [vmem:[#allocation2 + $0x40c] ss:$16 sps:$4 sm:$0xff]  }
 0x1a4   :  { %3711 = vmatprep.subr.bf16.mxu1 %v6478_v20  ;;  %v6538_v18 = vld [vmem:[#allocation2 + $0x60c] ss:$16 sps:$4 sm:$0xff]   ;;  %v6533_v20 = vld [vmem:[#allocation2 + $0x408] ss:$16 sps:$4 sm:$0xff]  }
 0x1a6   :  { %3671 = vmatpush2.bf16.msra.mxu0 %v6473_v21  ;;  %v6536_v21 = vld [vmem:[#allocation2 + $0x608] ss:$16 sps:$4 sm:$0xff]  }
 0x1a7   :  { %3712 = vmatpush2.bf16.msra.mxu1 %v6476_v26  ;;  %3672 = vmatprep.subr.bf16.mxu0 %v6481_v28  ;;  %v6541_v26 = vld [vmem:[#allocation2 + $0x5ec] ss:$16 sps:$4 sm:$0xff]  }
 0x1a8   :  { %3713 = vmatprep.subr.bf16.mxu1 %v6484_v29  ;;  %v6544_v28 = vld [vmem:[#allocation2 + $0x7ec] ss:$16 sps:$4 sm:$0xff]   ;;  %v6539_v29 = vld [vmem:[#allocation2 + $0x5e8] ss:$16 sps:$4 sm:$0xff]  }
 0x1aa   :  { %3673 = vmatpush2.bf16.msra.mxu0 %v6479_v30  ;;  %v6542_v30 = vld [vmem:[#allocation2 + $0x7e8] ss:$16 sps:$4 sm:$0xff]  }
 0x1ab   :  { %3714 = vmatpush2.bf16.msra.mxu1 %v6482_v31  ;;  %3674 = vmatprep.subr.bf16.mxu0 %v6487_v32  ;;  %v6547_v31 = vld [vmem:[#allocation2 + $0x5cc] ss:$16 sps:$4 sm:$0xff]  }
 0x1ac   :  { %3715 = vmatprep.subr.bf16.mxu1 %v6490_v33  ;;  %v6550_v32 = vld [vmem:[#allocation2 + $0x7cc] ss:$16 sps:$4 sm:$0xff]   ;;  %v6545_v33 = vld [vmem:[#allocation2 + $0x5c8] ss:$16 sps:$4 sm:$0xff]  }
 0x1ae   :  { %3675 = vmatpush2.bf16.msra.mxu0 %v6485_v47  ;;  %v6548_v47 = vld [vmem:[#allocation2 + $0x7c8] ss:$16 sps:$4 sm:$0xff]  }
 0x1af   :  { %3716 = vmatpush2.bf16.msra.mxu1 %v6488_v51  ;;  %3726 = vmatprep.subr.bf16.mxu0 %v6493_v34  ;;  %v6553_v51 = vld [vmem:[#allocation2 + $0x5ac] ss:$16 sps:$4 sm:$0xff]  }
 0x1b0   :  { %3767 = vmatprep.subr.bf16.mxu1 %v6496_v41  ;;  %v6556_v34 = vld [vmem:[#allocation2 + $0x7ac] ss:$16 sps:$4 sm:$0xff]   ;;  %v6551_v41 = vld [vmem:[#allocation2 + $0x5a8] ss:$16 sps:$4 sm:$0xff]  }
 0x1b1   :  { %v3432_v49 = vpop.f32.mrf.mxu0  ;;  %3677 = vmatmul.mubr.bf16.vlgmr.msra.gmra.mxu0 %v7307_v6 }
 0x1b2   :  { %3718 = vmatmul.mubr.bf16.vlgmr.msra.gmra.mxu1 %v7309_v7  ;;  %v3473_v50 = vpop.f32.mrf.mxu1  ;;  %v3433_v52 = vadd.f32 %v3432_v49, %v7407_v19  ;;  %3727 = vmatpush1.bf16.msra.mxu0 %v6491_v42  ;;  %v6554_v42 = vld [vmem:[#allocation2 + $0x7a8] ss:$16 sps:$4 sm:$0xff]   ;;  %v6568_v49 = vld [vmem:[#allocation2 + $0x76c] ss:$16 sps:$4 sm:$0xff]  }
 0x1b3   :  { %3768 = vmatpush1.bf16.msra.mxu1 %v6494_v43  ;;  %v3434_v54 = vpop.f32.mrf.mxu0  ;;  %3728 = vmatprep.subr.bf16.mxu0 %v6499_v44  ;;  %v6559_v43 = vld [vmem:[#allocation2 + $0x58c] ss:$16 sps:$4 sm:$0xff]  }
 0x1b4   :  { %v3475_v55 = vpop.f32.mrf.mxu1  ;;  %3769 = vmatprep.subr.bf16.mxu1 %v6502_v45  ;;  %v3435_v58 = vadd.f32 %v3434_v54, %v7411_v27  ;;  %v7417_v59 = vadd.f32 %v3473_v50, %v3433_v52  ;;  %3758 = vmatprep.mubr.bf16.mxu0 %v7325_v36  ;;  %v6517_v36 = vld [vmem:[#allocation2 + $0x46c] ss:$16 sps:$4 sm:$0xff]   ;;  %v6557_v45 = vld [vmem:[#allocation2 + $0x588] ss:$16 sps:$4 sm:$0xff]  }
 0x1b5   :  { %3799 = vmatprep.mubr.bf16.mxu1 %v7329_v37  ;;  %v3436_v6 = vpop.f32.mrf.mxu0  ;;  %v6520_v37 = vld [vmem:[#allocation2 + $0x66c] ss:$16 sps:$4 sm:$0xff]   ;;  %v6563_v50 = vld [vmem:[#allocation2 + $0x568] ss:$16 sps:$4 sm:$0xff]  }
 0x1b6   :  { %v3477_v7 = vpop.f32.mrf.mxu1  ;;  %v7421_v19 = vadd.f32 %v3475_v55, %v3435_v58  ;;  %3729 = vmatpush1.bf16.msra.mxu0 %v6497_v46  ;;  %v6562_v44 = vld [vmem:[#allocation2 + $0x78c] ss:$16 sps:$4 sm:$0xff]   ;;  %v6560_v46 = vld [vmem:[#allocation2 + $0x788] ss:$16 sps:$4 sm:$0xff]  }
 0x1b7   :  { %3770 = vmatpush1.bf16.msra.mxu1 %v6500_v48  ;;  %v3437_v62 = vpop.f32.mrf.mxu0  ;;  %3730 = vmatprep.subr.bf16.mxu0 %v6505_v56  ;;  %v6565_v48 = vld [vmem:[#allocation2 + $0x56c] ss:$16 sps:$4 sm:$0xff]   ;;  %v6566_v52 = vld [vmem:[#allocation2 + $0x768] ss:$16 sps:$4 sm:$0xff]  }
 0x1b8   :  { %3771 = vmatprep.subr.bf16.mxu1 %v6508_v57  ;;  %v3478_v27 = vpop.f32.mrf.mxu1  ;;  %v6571_v54 = vld [vmem:[#allocation2 + $0x54c] ss:$16 sps:$4 sm:$0xff]   ;;  %v6569_v56 = vld [vmem:[#allocation2 + $0x548] ss:$16 sps:$4 sm:$0xff]  }
 0x1b9   :  { %v6574_v55 = vld [vmem:[#allocation2 + $0x74c] ss:$16 sps:$4 sm:$0xff]   ;;  %v6572_v57 = vld [vmem:[#allocation2 + $0x748] ss:$16 sps:$4 sm:$0xff]  }
 0x1ba   :  { %3731 = vmatpush1.bf16.msra.mxu0 %v6503_v60  ;;  %v6577_v58 = vld [vmem:[#allocation2 + $0x52c] ss:$16 sps:$4 sm:$0xff]   ;;  %v6578_v6 = vld [vmem:[#allocation2 + $0x728] ss:$16 sps:$4 sm:$0xff]  }
 0x1bb   :  { %3772 = vmatpush1.bf16.msra.mxu1 %v6506_v61  ;;  %3732 = vmatprep.subr.bf16.mxu0 %v6511_v1  ;;  %v6580_v60 = vld [vmem:[#allocation2 + $0x72c] ss:$16 sps:$4 sm:$0xff]   ;;  %v6575_v61 = vld [vmem:[#allocation2 + $0x528] ss:$16 sps:$4 sm:$0xff]  }
 0x1bc   :  { %3773 = vmatprep.subr.bf16.mxu1 %v6514_v2  ;;  %v6583_v7 = vld [vmem:[#allocation2 + $0x50c] ss:$16 sps:$4 sm:$0xff]   ;;  %v6581_v1 = vld [vmem:[#allocation2 + $0x508] ss:$16 sps:$4 sm:$0xff]  }
 0x1bd   :  { %v6586_v62 = vld [vmem:[#allocation2 + $0x70c] ss:$16 sps:$4 sm:$0xff]   ;;  %v6584_v2 = vld [vmem:[#allocation2 + $0x708] ss:$16 sps:$4 sm:$0xff]  }
 0x1be   :  { %3733 = vmatpush1.bf16.msra.mxu0 %v6509_v3  ;;  %v6589_v27 = vld [vmem:[#allocation2 + $0x8ec] ss:$16 sps:$4 sm:$0xff]  }
 0x1bf   :  { %3774 = vmatpush1.bf16.msra.mxu1 %v6512_v4  ;;  %3734 = vmatprep.subr.bf16.mxu0 %v6517_v36  ;;  %v6592_v3 = vld [vmem:[#allocation2 + $0xaec] ss:$16 sps:$4 sm:$0xff]   ;;  %v6587_v4 = vld [vmem:[#allocation2 + $0x8e8] ss:$16 sps:$4 sm:$0xff]  }
 0x1c0   :  { %3775 = vmatprep.subr.bf16.mxu1 %v6520_v37  ;;  %v6590_v36 = vld [vmem:[#allocation2 + $0xae8] ss:$16 sps:$4 sm:$0xff]   ;;  %v6595_v37 = vld [vmem:[#allocation2 + $0x8cc] ss:$16 sps:$4 sm:$0xff]  }
 0x1c2   :  { %3735 = vmatpush1.bf16.msra.mxu0 %v6515_v5  ;;  %v6598_v5 = vld [vmem:[#allocation2 + $0xacc] ss:$16 sps:$4 sm:$0xff]  }
 0x1c3   :  { %3776 = vmatpush1.bf16.msra.mxu1 %v6518_v8  ;;  %3736 = vmatprep.subr.bf16.mxu0 %v6523_v9 }
 0x1c4   :  { %3777 = vmatprep.subr.bf16.mxu1 %v6526_v35 }
 0x1c6   :  { %3737 = vmatpush1.bf16.msra.mxu0 %v6521_v10  ;;  %v6593_v10 = vld [vmem:[#allocation2 + $0x8c8] ss:$16 sps:$4 sm:$0xff]  }
 0x1c7   :  { %3778 = vmatpush1.bf16.msra.mxu1 %v6524_v11  ;;  %3738 = vmatprep.subr.bf16.mxu0 %v6529_v40  ;;  %v6596_v11 = vld [vmem:[#allocation2 + $0xac8] ss:$16 sps:$4 sm:$0xff]  }
 0x1c8   :  { %3779 = vmatprep.subr.bf16.mxu1 %v6532_v12 }
 0x1ca   :  { %3739 = vmatpush1.bf16.msra.mxu0 %v6527_v13  ;;  %v6601_v13 = vld [vmem:[#allocation2 + $0x8ac] ss:$16 sps:$4 sm:$0xff]  }
 0x1cb   :  { %3780 = vmatpush1.bf16.msra.mxu1 %v6530_v14  ;;  %3740 = vmatprep.subr.bf16.mxu0 %v6535_v15  ;;  %v6604_v14 = vld [vmem:[#allocation2 + $0xaac] ss:$16 sps:$4 sm:$0xff]  }
 0x1cc   :  { %3781 = vmatprep.subr.bf16.mxu1 %v6538_v18 }
 0x1ce   :  { %3741 = vmatpush1.bf16.msra.mxu0 %v6533_v20  ;;  %v6599_v20 = vld [vmem:[#allocation2 + $0x8a8] ss:$16 sps:$4 sm:$0xff]  }
 0x1cf   :  { %3782 = vmatpush1.bf16.msra.mxu1 %v6536_v21  ;;  %3742 = vmatprep.subr.bf16.mxu0 %v6541_v26  ;;  %v6602_v21 = vld [vmem:[#allocation2 + $0xaa8] ss:$16 sps:$4 sm:$0xff]  }
 0x1d0   :  { %3783 = vmatprep.subr.bf16.mxu1 %v6544_v28  ;;  %v6607_v28 = vld [vmem:[#allocation2 + $0x88c] ss:$16 sps:$4 sm:$0xff]  }
 0x1d2   :  { %3743 = vmatpush2.bf16.msra.mxu0 %v6539_v29  ;;  %v6610_v29 = vld [vmem:[#allocation2 + $0xa8c] ss:$16 sps:$4 sm:$0xff]  }
 0x1d3   :  { %3784 = vmatpush2.bf16.msra.mxu1 %v6542_v30  ;;  %3744 = vmatprep.subr.bf16.mxu0 %v6547_v31  ;;  %v6605_v30 = vld [vmem:[#allocation2 + $0x888] ss:$16 sps:$4 sm:$0xff]   ;;  %v6616_v31 = vld [vmem:[#allocation2 + $0xa6c] ss:$16 sps:$4 sm:$0xff]  }
 0x1d4   :  { %3785 = vmatprep.subr.bf16.mxu1 %v6550_v32  ;;  %v6611_v32 = vld [vmem:[#allocation2 + $0x868] ss:$16 sps:$4 sm:$0xff]  }
 0x1d6   :  { %3745 = vmatpush2.bf16.msra.mxu0 %v6545_v33  ;;  %v6614_v33 = vld [vmem:[#allocation2 + $0xa68] ss:$16 sps:$4 sm:$0xff]  }
 0x1d7   :  { %3786 = vmatpush2.bf16.msra.mxu1 %v6548_v47  ;;  %3746 = vmatprep.subr.bf16.mxu0 %v6553_v51  ;;  %v6619_v47 = vld [vmem:[#allocation2 + $0x84c] ss:$16 sps:$4 sm:$0xff]  }
 0x1d8   :  { %3787 = vmatprep.subr.bf16.mxu1 %v6556_v34  ;;  %v6622_v51 = vld [vmem:[#allocation2 + $0xa4c] ss:$16 sps:$4 sm:$0xff]   ;;  %v6617_v34 = vld [vmem:[#allocation2 + $0x848] ss:$16 sps:$4 sm:$0xff]  }
 0x1da   :  { %3747 = vmatpush2.bf16.msra.mxu0 %v6551_v41  ;;  %v6620_v41 = vld [vmem:[#allocation2 + $0xa48] ss:$16 sps:$4 sm:$0xff]  }
 0x1db   :  { %3788 = vmatpush2.bf16.msra.mxu1 %v6554_v42  ;;  %3748 = vmatprep.subr.bf16.mxu0 %v6559_v43  ;;  %v6625_v42 = vld [vmem:[#allocation2 + $0x82c] ss:$16 sps:$4 sm:$0xff]  }
 0x1dc   :  { %3789 = vmatprep.subr.bf16.mxu1 %v6562_v44  ;;  %v6628_v43 = vld [vmem:[#allocation2 + $0xa2c] ss:$16 sps:$4 sm:$0xff]   ;;  %v6623_v44 = vld [vmem:[#allocation2 + $0x828] ss:$16 sps:$4 sm:$0xff]  }
 0x1de   :  { %3749 = vmatpush2.bf16.msra.mxu0 %v6557_v45  ;;  %v6626_v45 = vld [vmem:[#allocation2 + $0xa28] ss:$16 sps:$4 sm:$0xff]  }
 0x1df   :  { %3790 = vmatpush2.bf16.msra.mxu1 %v6560_v46  ;;  %3750 = vmatprep.subr.bf16.mxu0 %v6565_v48  ;;  %v6631_v46 = vld [vmem:[#allocation2 + $0x80c] ss:$16 sps:$4 sm:$0xff]  }
 0x1e0   :  { %3791 = vmatprep.subr.bf16.mxu1 %v6568_v49  ;;  %v6634_v48 = vld [vmem:[#allocation2 + $0xa0c] ss:$16 sps:$4 sm:$0xff]   ;;  %v6629_v49 = vld [vmem:[#allocation2 + $0x808] ss:$16 sps:$4 sm:$0xff]  }
 0x1e2   :  { %3751 = vmatpush2.bf16.msra.mxu0 %v6563_v50  ;;  %v6632_v50 = vld [vmem:[#allocation2 + $0xa08] ss:$16 sps:$4 sm:$0xff]  }
 0x1e3   :  { %3792 = vmatpush2.bf16.msra.mxu1 %v6566_v52  ;;  %3752 = vmatprep.subr.bf16.mxu0 %v6571_v54  ;;  %v6637_v52 = vld [vmem:[#allocation2 + $0x9ec] ss:$16 sps:$4 sm:$0xff]  }
 0x1e4   :  { %3793 = vmatprep.subr.bf16.mxu1 %v6574_v55  ;;  %v6640_v54 = vld [vmem:[#allocation2 + $0xbec] ss:$16 sps:$4 sm:$0xff]   ;;  %v6635_v55 = vld [vmem:[#allocation2 + $0x9e8] ss:$16 sps:$4 sm:$0xff]  }
 0x1e6   :  { %3753 = vmatpush2.bf16.msra.mxu0 %v6569_v56  ;;  %v6638_v56 = vld [vmem:[#allocation2 + $0xbe8] ss:$16 sps:$4 sm:$0xff]  }
 0x1e7   :  { %3794 = vmatpush2.bf16.msra.mxu1 %v6572_v57  ;;  %3754 = vmatprep.subr.bf16.mxu0 %v6577_v58  ;;  %v6643_v57 = vld [vmem:[#allocation2 + $0x9cc] ss:$16 sps:$4 sm:$0xff]  }
 0x1e8   :  { %3795 = vmatprep.subr.bf16.mxu1 %v6580_v60  ;;  %v6646_v58 = vld [vmem:[#allocation2 + $0xbcc] ss:$16 sps:$4 sm:$0xff]   ;;  %v6641_v60 = vld [vmem:[#allocation2 + $0x9c8] ss:$16 sps:$4 sm:$0xff]  }
 0x1ea   :  { %3755 = vmatpush2.bf16.msra.mxu0 %v6575_v61  ;;  %v6644_v61 = vld [vmem:[#allocation2 + $0xbc8] ss:$16 sps:$4 sm:$0xff]  }
 0x1eb   :  { %3796 = vmatpush2.bf16.msra.mxu1 %v6578_v6  ;;  %3756 = vmatprep.subr.bf16.mxu0 %v6583_v7  ;;  %v6649_v6 = vld [vmem:[#allocation2 + $0x9ac] ss:$16 sps:$4 sm:$0xff]  }
 0x1ec   :  { %3797 = vmatprep.subr.bf16.mxu1 %v6586_v62  ;;  %v6652_v7 = vld [vmem:[#allocation2 + $0xbac] ss:$16 sps:$4 sm:$0xff]   ;;  %v6647_v62 = vld [vmem:[#allocation2 + $0x9a8] ss:$16 sps:$4 sm:$0xff]  }
 0x1ee   :  { %3757 = vmatpush2.bf16.msra.mxu0 %v6581_v1  ;;  %v6650_v1 = vld [vmem:[#allocation2 + $0xba8] ss:$16 sps:$4 sm:$0xff]  }
 0x1ef   :  { %3798 = vmatpush2.bf16.msra.mxu1 %v6584_v2  ;;  %3808 = vmatprep.subr.bf16.mxu0 %v6589_v27  ;;  %v6655_v2 = vld [vmem:[#allocation2 + $0x98c] ss:$16 sps:$4 sm:$0xff]  }
 0x1f0   :  { %3849 = vmatprep.subr.bf16.mxu1 %v6592_v3  ;;  %v6658_v27 = vld [vmem:[#allocation2 + $0xb8c] ss:$16 sps:$4 sm:$0xff]   ;;  %v6653_v3 = vld [vmem:[#allocation2 + $0x988] ss:$16 sps:$4 sm:$0xff]  }
 0x1f1   :  { %v3514_v8 = vpop.f32.mrf.mxu0  ;;  %3759 = vmatmul.mubr.bf16.vlgmr.msra.gmra.mxu0 %v7335_v16 }
 0x1f2   :  { %3800 = vmatmul.mubr.bf16.vlgmr.msra.gmra.mxu1 %v7339_v17  ;;  %v3555_v9 = vpop.f32.mrf.mxu1  ;;  %v3515_v35 = vadd.f32 %v3514_v8, %v7417_v59  ;;  %3809 = vmatpush1.bf16.msra.mxu0 %v6587_v4  ;;  %v6656_v4 = vld [vmem:[#allocation2 + $0xb88] ss:$16 sps:$4 sm:$0xff]  }
 0x1f3   :  { %3850 = vmatpush1.bf16.msra.mxu1 %v6590_v36  ;;  %v3516_v40 = vpop.f32.mrf.mxu0  ;;  %3810 = vmatprep.subr.bf16.mxu0 %v6595_v37  ;;  %v6661_v36 = vld [vmem:[#allocation2 + $0x96c] ss:$16 sps:$4 sm:$0xff]   ;;  %v6662_v8 = vld [vmem:[#allocation2 + $0xb68] ss:$16 sps:$4 sm:$0xff]  }
 0x1f4   :  { %v3557_v12 = vpop.f32.mrf.mxu1  ;;  %3851 = vmatprep.subr.bf16.mxu1 %v6598_v5  ;;  %v3517_v15 = vadd.f32 %v3516_v40, %v7421_v19  ;;  %v7427_v18 = vadd.f32 %v3555_v9, %v3515_v35  ;;  %3840 = vmatprep.mubr.bf16.mxu0 %v7353_v24  ;;  %v6608_v24 = vld [vmem:[#allocation2 + $0xa88] ss:$16 sps:$4 sm:$0xff]   ;;  %v6664_v37 = vld [vmem:[#allocation2 + $0xb6c] ss:$16 sps:$4 sm:$0xff]  }
 0x1f5   :  { %3881 = vmatprep.mubr.bf16.mxu1 %v7357_v25  ;;  %v3518_v16 = vpop.f32.mrf.mxu0  ;;  %v6613_v25 = vld [vmem:[#allocation2 + $0x86c] ss:$16 sps:$4 sm:$0xff]   ;;  %v6659_v5 = vld [vmem:[#allocation2 + $0x968] ss:$16 sps:$4 sm:$0xff]  }
 0x1f6   :  { %v3559_v17 = vpop.f32.mrf.mxu1  ;;  %v7431_v59 = vadd.f32 %v3557_v12, %v3517_v15  ;;  %3811 = vmatpush1.bf16.msra.mxu0 %v6593_v10  ;;  %v6667_v9 = vld [vmem:[#allocation2 + $0x94c] ss:$16 sps:$4 sm:$0xff]   ;;  %v6665_v10 = vld [vmem:[#allocation2 + $0x948] ss:$16 sps:$4 sm:$0xff]  }
 0x1f7   :  { %3852 = vmatpush1.bf16.msra.mxu1 %v6596_v11  ;;  %v3519_v26 = vpop.f32.mrf.mxu0  ;;  %3812 = vmatprep.subr.bf16.mxu0 %v6601_v13  ;;  %v6670_v35 = vld [vmem:[#allocation2 + $0xb4c] ss:$16 sps:$4 sm:$0xff]   ;;  %v6668_v11 = vld [vmem:[#allocation2 + $0xb48] ss:$16 sps:$4 sm:$0xff]  }
 0x1f8   :  { %3853 = vmatprep.subr.bf16.mxu1 %v6604_v14  ;;  %v3560_v19 = vpop.f32.mrf.mxu1  ;;  %v6673_v40 = vld [vmem:[#allocation2 + $0x92c] ss:$16 sps:$4 sm:$0xff]   ;;  %v6671_v13 = vld [vmem:[#allocation2 + $0x928] ss:$16 sps:$4 sm:$0xff]  }
 0x1f9   :  { %v6676_v12 = vld [vmem:[#allocation2 + $0xb2c] ss:$16 sps:$4 sm:$0xff]   ;;  %v6674_v14 = vld [vmem:[#allocation2 + $0xb28] ss:$16 sps:$4 sm:$0xff]  }
 0x1fa   :  { %3813 = vmatpush1.bf16.msra.mxu0 %v6599_v20  ;;  %v6679_v15 = vld [vmem:[#allocation2 + $0x90c] ss:$16 sps:$4 sm:$0xff]   ;;  %v6677_v17 = vld [vmem:[#allocation2 + $0x908] ss:$16 sps:$4 sm:$0xff]  }
 0x1fb   :  { %3854 = vmatpush1.bf16.msra.mxu1 %v6602_v21  ;;  %3814 = vmatprep.subr.bf16.mxu0 %v6607_v28  ;;  %v6682_v16 = vld [vmem:[#allocation2 + $0xb0c] ss:$16 sps:$4 sm:$0xff]   ;;  %v6680_v20 = vld [vmem:[#allocation2 + $0xb08] ss:$16 sps:$4 sm:$0xff]  }
 0x1fc   :  { %3855 = vmatprep.subr.bf16.mxu1 %v6610_v29  ;;  %v6685_v21 = vld [vmem:[#allocation2 + $0xcec] ss:$16 sps:$4 sm:$0xff]   ;;  %v6683_v28 = vld [vmem:[#allocation2 + $0xce8] ss:$16 sps:$4 sm:$0xff]  }
 0x1fd   :  { %v6688_v26 = vld [vmem:[#allocation2 + $0xeec] ss:$16 sps:$4 sm:$0xff]   ;;  %v6686_v29 = vld [vmem:[#allocation2 + $0xee8] ss:$16 sps:$4 sm:$0xff]  }
 0x1fe   :  { %3815 = vmatpush1.bf16.msra.mxu0 %v6605_v30  ;;  %v6691_v19 = vld [vmem:[#allocation2 + $0xccc] ss:$16 sps:$4 sm:$0xff]  }
 0x1ff   :  { %3856 = vmatpush1.bf16.msra.mxu1 %v6608_v24  ;;  %3816 = vmatprep.subr.bf16.mxu0 %v6613_v25  ;;  %v6694_v30 = vld [vmem:[#allocation2 + $0xecc] ss:$16 sps:$4 sm:$0xff]  }
 0x200   :  { %3857 = vmatprep.subr.bf16.mxu1 %v6616_v31 }
 0x202   :  { %3817 = vmatpush1.bf16.msra.mxu0 %v6611_v32  ;;  %v6689_v32 = vld [vmem:[#allocation2 + $0xcc8] ss:$16 sps:$4 sm:$0xff]  }
 0x203   :  { %3858 = vmatpush1.bf16.msra.mxu1 %v6614_v33  ;;  %3818 = vmatprep.subr.bf16.mxu0 %v6619_v47  ;;  %v6692_v33 = vld [vmem:[#allocation2 + $0xec8] ss:$16 sps:$4 sm:$0xff]  }
 0x204   :  { %3859 = vmatprep.subr.bf16.mxu1 %v6622_v51 }
 0x206   :  { %3819 = vmatpush1.bf16.msra.mxu0 %v6617_v34  ;;  %v6697_v34 = vld [vmem:[#allocation2 + $0xcac] ss:$16 sps:$4 sm:$0xff]  }
 0x207   :  { %3860 = vmatpush1.bf16.msra.mxu1 %v6620_v41  ;;  %3820 = vmatprep.subr.bf16.mxu0 %v6625_v42  ;;  %v6700_v41 = vld [vmem:[#allocation2 + $0xeac] ss:$16 sps:$4 sm:$0xff]  }
 0x208   :  { %3861 = vmatprep.subr.bf16.mxu1 %v6628_v43 }
 0x20a   :  { %3821 = vmatpush1.bf16.msra.mxu0 %v6623_v44  ;;  %v6695_v44 = vld [vmem:[#allocation2 + $0xca8] ss:$16 sps:$4 sm:$0xff]  }
 0x20b   :  { %3862 = vmatpush1.bf16.msra.mxu1 %v6626_v45  ;;  %3822 = vmatprep.subr.bf16.mxu0 %v6631_v46  ;;  %v6698_v45 = vld [vmem:[#allocation2 + $0xea8] ss:$16 sps:$4 sm:$0xff]  }
 0x20c   :  { %3863 = vmatprep.subr.bf16.mxu1 %v6634_v48  ;;  %v6703_v48 = vld [vmem:[#allocation2 + $0xc8c] ss:$16 sps:$4 sm:$0xff]  }
 0x20e   :  { %3823 = vmatpush1.bf16.msra.mxu0 %v6629_v49  ;;  %v6706_v49 = vld [vmem:[#allocation2 + $0xe8c] ss:$16 sps:$4 sm:$0xff]  }
 0x20f   :  { %3864 = vmatpush1.bf16.msra.mxu1 %v6632_v50  ;;  %3824 = vmatprep.subr.bf16.mxu0 %v6637_v52  ;;  %v6701_v50 = vld [vmem:[#allocation2 + $0xc88] ss:$16 sps:$4 sm:$0xff]   ;;  %v6712_v52 = vld [vmem:[#allocation2 + $0xe6c] ss:$16 sps:$4 sm:$0xff]  }
 0x210   :  { %3865 = vmatprep.subr.bf16.mxu1 %v6640_v54  ;;  %v6707_v54 = vld [vmem:[#allocation2 + $0xc68] ss:$16 sps:$4 sm:$0xff]  }
 0x212   :  { %3825 = vmatpush2.bf16.msra.mxu0 %v6635_v55  ;;  %v6710_v55 = vld [vmem:[#allocation2 + $0xe68] ss:$16 sps:$4 sm:$0xff]  }
 0x213   :  { %3866 = vmatpush2.bf16.msra.mxu1 %v6638_v56  ;;  %3826 = vmatprep.subr.bf16.mxu0 %v6643_v57  ;;  %v6715_v56 = vld [vmem:[#allocation2 + $0xc4c] ss:$16 sps:$4 sm:$0xff]  }
 0x214   :  { %3867 = vmatprep.subr.bf16.mxu1 %v6646_v58  ;;  %v6718_v57 = vld [vmem:[#allocation2 + $0xe4c] ss:$16 sps:$4 sm:$0xff]   ;;  %v6713_v58 = vld [vmem:[#allocation2 + $0xc48] ss:$16 sps:$4 sm:$0xff]  }
 0x216   :  { %3827 = vmatpush2.bf16.msra.mxu0 %v6641_v60  ;;  %v6716_v60 = vld [vmem:[#allocation2 + $0xe48] ss:$16 sps:$4 sm:$0xff]  }
 0x217   :  { %3868 = vmatpush2.bf16.msra.mxu1 %v6644_v61  ;;  %3828 = vmatprep.subr.bf16.mxu0 %v6649_v6  ;;  %v6721_v61 = vld [vmem:[#allocation2 + $0xc2c] ss:$16 sps:$4 sm:$0xff]  }
 0x218   :  { %3869 = vmatprep.subr.bf16.mxu1 %v6652_v7  ;;  %v6724_v6 = vld [vmem:[#allocation2 + $0xe2c] ss:$16 sps:$4 sm:$0xff]   ;;  %v6719_v7 = vld [vmem:[#allocation2 + $0xc28] ss:$16 sps:$4 sm:$0xff]  }
 0x21a   :  { %3829 = vmatpush2.bf16.msra.mxu0 %v6647_v62  ;;  %v6722_v62 = vld [vmem:[#allocation2 + $0xe28] ss:$16 sps:$4 sm:$0xff]  }
 0x21b   :  { %3870 = vmatpush2.bf16.msra.mxu1 %v6650_v1  ;;  %3830 = vmatprep.subr.bf16.mxu0 %v6655_v2  ;;  %v6727_v1 = vld [vmem:[#allocation2 + $0xc0c] ss:$16 sps:$4 sm:$0xff]  }
 0x21c   :  { %3871 = vmatprep.subr.bf16.mxu1 %v6658_v27  ;;  %v6730_v2 = vld [vmem:[#allocation2 + $0xe0c] ss:$16 sps:$4 sm:$0xff]   ;;  %v6725_v27 = vld [vmem:[#allocation2 + $0xc08] ss:$16 sps:$4 sm:$0xff]  }
 0x21e   :  { %3831 = vmatpush2.bf16.msra.mxu0 %v6653_v3  ;;  %v6728_v3 = vld [vmem:[#allocation2 + $0xe08] ss:$16 sps:$4 sm:$0xff]  }
 0x21f   :  { %3872 = vmatpush2.bf16.msra.mxu1 %v6656_v4  ;;  %3832 = vmatprep.subr.bf16.mxu0 %v6661_v36  ;;  %v6733_v4 = vld [vmem:[#allocation2 + $0xdec] ss:$16 sps:$4 sm:$0xff]  }
 0x220   :  { %3873 = vmatprep.subr.bf16.mxu1 %v6664_v37  ;;  %v6736_v36 = vld [vmem:[#allocation2 + $0xfec] ss:$16 sps:$4 sm:$0xff]   ;;  %v6731_v37 = vld [vmem:[#allocation2 + $0xde8] ss:$16 sps:$4 sm:$0xff]  }
 0x222   :  { %3833 = vmatpush2.bf16.msra.mxu0 %v6659_v5  ;;  %v6734_v5 = vld [vmem:[#allocation2 + $0xfe8] ss:$16 sps:$4 sm:$0xff]  }
 0x223   :  { %3874 = vmatpush2.bf16.msra.mxu1 %v6662_v8  ;;  %3834 = vmatprep.subr.bf16.mxu0 %v6667_v9  ;;  %v6739_v8 = vld [vmem:[#allocation2 + $0xdcc] ss:$16 sps:$4 sm:$0xff]  }
 0x224   :  { %3875 = vmatprep.subr.bf16.mxu1 %v6670_v35  ;;  %v6742_v9 = vld [vmem:[#allocation2 + $0xfcc] ss:$16 sps:$4 sm:$0xff]   ;;  %v6737_v35 = vld [vmem:[#allocation2 + $0xdc8] ss:$16 sps:$4 sm:$0xff]  }
 0x226   :  { %3835 = vmatpush2.bf16.msra.mxu0 %v6665_v10  ;;  %v6740_v10 = vld [vmem:[#allocation2 + $0xfc8] ss:$16 sps:$4 sm:$0xff]  }
 0x227   :  { %3876 = vmatpush2.bf16.msra.mxu1 %v6668_v11  ;;  %3836 = vmatprep.subr.bf16.mxu0 %v6673_v40  ;;  %v6745_v11 = vld [vmem:[#allocation2 + $0xdac] ss:$16 sps:$4 sm:$0xff]  }
 0x228   :  { %3877 = vmatprep.subr.bf16.mxu1 %v6676_v12  ;;  %v6748_v40 = vld [vmem:[#allocation2 + $0xfac] ss:$16 sps:$4 sm:$0xff]   ;;  %v6743_v12 = vld [vmem:[#allocation2 + $0xda8] ss:$16 sps:$4 sm:$0xff]  }
 0x22a   :  { %3837 = vmatpush2.bf16.msra.mxu0 %v6671_v13  ;;  %v6746_v13 = vld [vmem:[#allocation2 + $0xfa8] ss:$16 sps:$4 sm:$0xff]  }
 0x22b   :  { %3878 = vmatpush2.bf16.msra.mxu1 %v6674_v14  ;;  %3838 = vmatprep.subr.bf16.mxu0 %v6679_v15  ;;  %v6751_v14 = vld [vmem:[#allocation2 + $0xd8c] ss:$16 sps:$4 sm:$0xff]  }
 0x22c   :  { %3879 = vmatprep.subr.bf16.mxu1 %v6682_v16  ;;  %v6754_v15 = vld [vmem:[#allocation2 + $0xf8c] ss:$16 sps:$4 sm:$0xff]   ;;  %v6749_v16 = vld [vmem:[#allocation2 + $0xd88] ss:$16 sps:$4 sm:$0xff]  }
 0x22e   :  { %3839 = vmatpush2.bf16.msra.mxu0 %v6677_v17  ;;  %v6752_v17 = vld [vmem:[#allocation2 + $0xf88] ss:$16 sps:$4 sm:$0xff]  }
 0x22f   :  { %3880 = vmatpush2.bf16.msra.mxu1 %v6680_v20  ;;  %3890 = vmatprep.subr.bf16.mxu0 %v6685_v21  ;;  %v6757_v20 = vld [vmem:[#allocation2 + $0xd6c] ss:$16 sps:$4 sm:$0xff]  }
 0x230   :  { %3931 = vmatprep.subr.bf16.mxu1 %v6688_v26  ;;  %v6760_v21 = vld [vmem:[#allocation2 + $0xf6c] ss:$16 sps:$4 sm:$0xff]   ;;  %v6755_v26 = vld [vmem:[#allocation2 + $0xd68] ss:$16 sps:$4 sm:$0xff]  }
 0x231   :  { %v3596_v24 = vpop.f32.mrf.mxu0  ;;  %3841 = vmatmul.mubr.bf16.vlgmr.msra.gmra.mxu0 %v7370_v38 }
 0x232   :  { %3882 = vmatmul.mubr.bf16.vlgmr.msra.gmra.mxu1 %v7374_v39  ;;  %v3637_v25 = vpop.f32.mrf.mxu1  ;;  %v3597_v31 = vadd.f32 %v3596_v24, %v7427_v18  ;;  %3891 = vmatpush1.bf16.msra.mxu0 %v6683_v28  ;;  %v6758_v28 = vld [vmem:[#allocation2 + $0xf68] ss:$16 sps:$4 sm:$0xff]  }
 0x233   :  { %3932 = vmatpush1.bf16.msra.mxu1 %v6686_v29  ;;  %v3598_v47 = vpop.f32.mrf.mxu0  ;;  %3892 = vmatprep.subr.bf16.mxu0 %v6691_v19  ;;  %v6763_v29 = vld [vmem:[#allocation2 + $0xd4c] ss:$16 sps:$4 sm:$0xff]   ;;  %v6764_v24 = vld [vmem:[#allocation2 + $0xf48] ss:$16 sps:$4 sm:$0xff]  }
 0x234   :  { %v3639_v51 = vpop.f32.mrf.mxu1  ;;  %3933 = vmatprep.subr.bf16.mxu1 %v6694_v30  ;;  %v3599_v42 = vadd.f32 %v3598_v47, %v7431_v59  ;;  %v7437_v43 = vadd.f32 %v3637_v25, %v3597_v31  ;;  %3922 = vmatprep.mubr.bf16.mxu0 %v7383_v22  ;;  %v6704_v22 = vld [vmem:[#allocation2 + $0xe88] ss:$16 sps:$4 sm:$0xff]   ;;  %v6766_v19 = vld [vmem:[#allocation2 + $0xf4c] ss:$16 sps:$4 sm:$0xff]  }
 0x235   :  { %3963 = vmatprep.mubr.bf16.mxu1 %v7387_v23  ;;  %v3600_v38 = vpop.f32.mrf.mxu0  ;;  %v6709_v23 = vld [vmem:[#allocation2 + $0xc6c] ss:$16 sps:$4 sm:$0xff]   ;;  %v6761_v30 = vld [vmem:[#allocation2 + $0xd48] ss:$16 sps:$4 sm:$0xff]  }
 0x236   :  { %v3641_v39 = vpop.f32.mrf.mxu1  ;;  %v7441_v18 = vadd.f32 %v3639_v51, %v3599_v42  ;;  %3893 = vmatpush1.bf16.msra.mxu0 %v6689_v32  ;;  %v6769_v25 = vld [vmem:[#allocation2 + $0xd2c] ss:$16 sps:$4 sm:$0xff]   ;;  %v6767_v32 = vld [vmem:[#allocation2 + $0xd28] ss:$16 sps:$4 sm:$0xff]   ;;  %v690_v42 = vsub.s32 2, %v7393_v53 }
 0x237   :  { %3934 = vmatpush1.bf16.msra.mxu1 %v6692_v33  ;;  %v3601_v46 = vpop.f32.mrf.mxu0  ;;  %3894 = vmatprep.subr.bf16.mxu0 %v6697_v34  ;;  %v6772_v31 = vld [vmem:[#allocation2 + $0xf2c] ss:$16 sps:$4 sm:$0xff]   ;;  %v6770_v33 = vld [vmem:[#allocation2 + $0xf28] ss:$16 sps:$4 sm:$0xff]   ;;  %v7444_v38 = vld [vmem:[#allocation5 + $0xe4] ss:$16 sps:$4 sm:$0xff]  }
 0x238   :  { %3935 = vmatprep.subr.bf16.mxu1 %v6700_v41  ;;  %v3642_v59 = vpop.f32.mrf.mxu1  ;;  %v6775_v47 = vld [vmem:[#allocation2 + $0xd0c] ss:$16 sps:$4 sm:$0xff]   ;;  %v6773_v34 = vld [vmem:[#allocation2 + $0xd08] ss:$16 sps:$4 sm:$0xff]  }
 0x239   :  { %v6778_v51 = vld [vmem:[#allocation2 + $0xf0c] ss:$16 sps:$4 sm:$0xff]   ;;  %v6776_v41 = vld [vmem:[#allocation2 + $0xf08] ss:$16 sps:$4 sm:$0xff]   ;;  %v7455_v59 = vld [vmem:[#allocation5 + $0xc4] ss:$16 sps:$4 sm:$0xff]  }
 0x23a   :  { %3895 = vmatpush1.bf16.msra.mxu0 %v6695_v44  ;;  %v7446_v39 = vld [vmem:[#allocation5 + $0xec] ss:$16 sps:$4 sm:$0xff]   ;;  %v694_v44 = vsub.s32 3, %v7393_v53 }
 0x23b   :  { %3936 = vmatpush1.bf16.msra.mxu1 %v6698_v45  ;;  %3896 = vmatprep.subr.bf16.mxu0 %v6703_v48  ;;  %v6939_v45 = vld [vmem:[#allocation7] sm:$0xf] }
 0x23c   :  { %3937 = vmatprep.subr.bf16.mxu1 %v6706_v49  ;;  %v691_v46 = vrot.slane %v6939_v45, %v690_v42  ;;  %v7449_v48 = vld [vmem:[#allocation5 + $0xe0] ss:$16 sps:$4 sm:$0xff]   ;;  %v7451_v49 = vld [vmem:[#allocation5 + $0xe8] ss:$16 sps:$4 sm:$0xff]  }
 0x23e   :  { %3897 = vmatpush1.bf16.msra.mxu0 %v6701_v50  ;;  %v7457_v50 = vld [vmem:[#allocation5 + $0xcc] ss:$16 sps:$4 sm:$0xff]  }
 0x23f   :  { %3938 = vmatpush1.bf16.msra.mxu1 %v6704_v22  ;;  %3898 = vmatprep.subr.bf16.mxu0 %v6709_v23  ;;  %v695_v22 = vrot.slane %v6939_v45, %v694_v44 }
 0x240   :  { %3939 = vmatprep.subr.bf16.mxu1 %v6712_v52 }
 0x242   :  { %3899 = vmatpush1.bf16.msra.mxu0 %v6707_v54  ;;  %v7463_v54 = vld [vmem:[#allocation5 + $0xc0] ss:$16 sps:$4 sm:$0xff]  }
 0x243   :  { %3940 = vmatpush1.bf16.msra.mxu1 %v6710_v55  ;;  %3900 = vmatprep.subr.bf16.mxu0 %v6715_v56  ;;  %v7465_v55 = vld [vmem:[#allocation5 + $0xc8] ss:$16 sps:$4 sm:$0xff]  }
 0x244   :  { %3941 = vmatprep.subr.bf16.mxu1 %v6718_v57 }
 0x246   :  { %3901 = vmatpush1.bf16.msra.mxu0 %v6713_v58  ;;  %v7469_v58 = vld [vmem:[#allocation5 + $0xa4] ss:$16 sps:$4 sm:$0xff]  }
 0x247   :  { %3942 = vmatpush1.bf16.msra.mxu1 %v6716_v60  ;;  %3902 = vmatprep.subr.bf16.mxu0 %v6721_v61  ;;  %v7187_v61 = vmov 0  }
 0x248   :  { %3943 = vmatprep.subr.bf16.mxu1 %v6724_v6 }
 0x24a   :  { %3903 = vmatpush1.bf16.msra.mxu0 %v6719_v7 }
 0x24b   :  { %3944 = vmatpush1.bf16.msra.mxu1 %v6722_v62  ;;  %3904 = vmatprep.subr.bf16.mxu0 %v6727_v1  ;;  %v7481_v1 = vld [vmem:[#allocation5 + $0xa0] ss:$16 sps:$4 sm:$0xff]  }
 0x24c   :  { %3945 = vmatprep.subr.bf16.mxu1 %v6730_v2  ;;  %v7483_v2 = vld [vmem:[#allocation5 + $0xa8] ss:$16 sps:$4 sm:$0xff]  }
 0x24e   :  { %3905 = vmatpush1.bf16.msra.mxu0 %v6725_v27 }
 0x24f   :  { %3946 = vmatpush1.bf16.msra.mxu1 %v6728_v3  ;;  %3906 = vmatprep.subr.bf16.mxu0 %v6733_v4  ;;  %v7487_v3 = vld [vmem:[#allocation5 + $0x84] ss:$16 sps:$4 sm:$0xff]   ;;  %v7489_v4 = vld [vmem:[#allocation5 + $0x8c] ss:$16 sps:$4 sm:$0xff]  }
 0x250   :  { %3947 = vmatprep.subr.bf16.mxu1 %v6736_v36 }
 0x252   :  { %3907 = vmatpush2.bf16.msra.mxu0 %v6731_v37  ;;  %v7493_v37 = vld [vmem:[#allocation5 + $0x80] ss:$16 sps:$4 sm:$0xff]  }
 0x253   :  { %3948 = vmatpush2.bf16.msra.mxu1 %v6734_v5  ;;  %3908 = vmatprep.subr.bf16.mxu0 %v6739_v8  ;;  %v7495_v5 = vld [vmem:[#allocation5 + $0x88] ss:$16 sps:$4 sm:$0xff]   ;;  %v7499_v8 = vld [vmem:[#allocation5 + $0x64] ss:$16 sps:$4 sm:$0xff]  }
 0x254   :  { %3949 = vmatprep.subr.bf16.mxu1 %v6742_v9  ;;  %v7501_v9 = vld [vmem:[#allocation5 + $0x6c] ss:$16 sps:$4 sm:$0xff]  }
 0x256   :  { %3909 = vmatpush2.bf16.msra.mxu0 %v6737_v35  ;;  %v7505_v35 = vld [vmem:[#allocation5 + $0x60] ss:$16 sps:$4 sm:$0xff]  }
 0x257   :  { %3950 = vmatpush2.bf16.msra.mxu1 %v6740_v10  ;;  %3910 = vmatprep.subr.bf16.mxu0 %v6745_v11  ;;  %v7507_v10 = vld [vmem:[#allocation5 + $0x68] ss:$16 sps:$4 sm:$0xff]   ;;  %v7511_v11 = vld [vmem:[#allocation5 + $0x44] ss:$16 sps:$4 sm:$0xff]  }
 0x258   :  { %3951 = vmatprep.subr.bf16.mxu1 %v6748_v40  ;;  %v7513_v40 = vld [vmem:[#allocation5 + $0x4c] ss:$16 sps:$4 sm:$0xff]  }
 0x25a   :  { %3911 = vmatpush2.bf16.msra.mxu0 %v6743_v12  ;;  %v7517_v12 = vld [vmem:[#allocation5 + $0x40] ss:$16 sps:$4 sm:$0xff]  }
 0x25b   :  { %3952 = vmatpush2.bf16.msra.mxu1 %v6746_v13  ;;  %3912 = vmatprep.subr.bf16.mxu0 %v6751_v14  ;;  %v7519_v13 = vld [vmem:[#allocation5 + $0x48] ss:$16 sps:$4 sm:$0xff]   ;;  %v7523_v14 = vld [vmem:[#allocation5 + $0x24] ss:$16 sps:$4 sm:$0xff]  }
 0x25c   :  { %3953 = vmatprep.subr.bf16.mxu1 %v6754_v15  ;;  %v7525_v15 = vld [vmem:[#allocation5 + $0x2c] ss:$16 sps:$4 sm:$0xff]  }
 0x25e   :  { %3913 = vmatpush2.bf16.msra.mxu0 %v6749_v16  ;;  %v7529_v16 = vld [vmem:[#allocation5 + $0x20] ss:$16 sps:$4 sm:$0xff]  }
 0x25f   :  { %3954 = vmatpush2.bf16.msra.mxu1 %v6752_v17  ;;  %3914 = vmatprep.subr.bf16.mxu0 %v6757_v20  ;;  %v7531_v17 = vld [vmem:[#allocation5 + $0x28] ss:$16 sps:$4 sm:$0xff]   ;;  %v7535_v20 = vld [vmem:[#allocation5 + $0x4] ss:$16 sps:$4 sm:$0xff]  }
 0x260   :  { %3955 = vmatprep.subr.bf16.mxu1 %v6760_v21  ;;  %v7537_v21 = vld [vmem:[#allocation5 + $0xc] ss:$16 sps:$4 sm:$0xff]  }
 0x262   :  { %3915 = vmatpush2.bf16.msra.mxu0 %v6755_v26  ;;  %v7541_v26 = vld [vmem:[#allocation5] ss:$16 sps:$4 sm:$0xff]  }
 0x263   :  { %3956 = vmatpush2.bf16.msra.mxu1 %v6758_v28  ;;  %3916 = vmatprep.subr.bf16.mxu0 %v6763_v29  ;;  %v7543_v28 = vld [vmem:[#allocation5 + $0x8] ss:$16 sps:$4 sm:$0xff]  }
 0x264   :  { %3957 = vmatprep.subr.bf16.mxu1 %v6766_v19 }
 0x266   :  { %3917 = vmatpush2.bf16.msra.mxu0 %v6761_v30 }
 0x267   :  { %3958 = vmatpush2.bf16.msra.mxu1 %v6764_v24  ;;  %3918 = vmatprep.subr.bf16.mxu0 %v6769_v25 }
 0x268   :  { %3959 = vmatprep.subr.bf16.mxu1 %v6772_v31 }
 0x26a   :  { %3919 = vmatpush2.bf16.msra.mxu0 %v6767_v32 }
 0x26b   :  { %3960 = vmatpush2.bf16.msra.mxu1 %v6770_v33  ;;  %3920 = vmatprep.subr.bf16.mxu0 %v6775_v47 }
 0x26c   :  { %3961 = vmatprep.subr.bf16.mxu1 %v6778_v51 }
 0x26e   :  { %3921 = vmatpush2.bf16.msra.mxu0 %v6773_v34 }
 0x26f   :  { %3962 = vmatpush2.bf16.msra.mxu1 %v6776_v41  ;;  %4164 = vmatprep.subr.bf16.mxu0 %v7444_v38 }
 0x270   :  { %4205 = vmatprep.subr.bf16.mxu1 %v7446_v39 }
 0x271   :  { %v3678_v23 = vpop.f32.mrf.mxu0  ;;  %3923 = vmatmul.mubr.bf16.vlgmr.msra.gmra.mxu0 %v7399_v63  ;;  %v7471_v63 = vld [vmem:[#allocation5 + $0xac] ss:$16 sps:$4 sm:$0xff]  }
 0x272   :  { %3964 = vmatmul.mubr.bf16.vlgmr.msra.gmra.mxu1 %v7403_v0  ;;  %v3719_v53 = vpop.f32.mrf.mxu1  ;;  %v3679_v52 = vadd.f32 %v3678_v23, %v691_v46  ;;  %4165 = vmatpush1.bf16.msra.mxu0 %v7449_v48 }
 0x273   :  { %4206 = vmatpush1.bf16.msra.mxu1 %v7451_v49  ;;  %v3680_v56 = vpop.f32.mrf.mxu0  ;;  %4166 = vmatprep.subr.bf16.mxu0 %v7455_v59 }
 0x274   :  { %v3721_v57 = vpop.f32.mrf.mxu1  ;;  %4207 = vmatprep.subr.bf16.mxu1 %v7457_v50  ;;  %v3681_v0 = vadd.f32 %v3680_v56, %v695_v22  ;;  %v7473_v60 = vadd.f32 %v3719_v53, %v3679_v52  ;;  %4196 = vmatprep.mubr.bf16.mxu0 %v7187_v61 }
 0x275   :  { %4237 = vmatprep.mubr.bf16.mxu1 %v7187_v61  ;;  %v3682_v6 = vpop.f32.mrf.mxu0 }
 0x276   :  { %v3723_v7 = vpop.f32.mrf.mxu1  ;;  %v7477_v62 = vadd.f32 %v3721_v57, %v3681_v0  ;;  %4167 = vmatpush1.bf16.msra.mxu0 %v7463_v54 }
 0x277   :  { %4208 = vmatpush1.bf16.msra.mxu1 %v7465_v55  ;;  %v3683_v27 = vpop.f32.mrf.mxu0  ;;  %4168 = vmatprep.subr.bf16.mxu0 %v7469_v58 }
 0x278   :  { %4209 = vmatprep.subr.bf16.mxu1 %v7471_v63  ;;  %v3724_v36 = vpop.f32.mrf.mxu1 }
 0x27a   :  { %4169 = vmatpush1.bf16.msra.mxu0 %v7481_v1 }
 0x27b   :  { %4210 = vmatpush1.bf16.msra.mxu1 %v7483_v2  ;;  %4170 = vmatprep.subr.bf16.mxu0 %v7487_v3 }
 0x27c   :  { %4211 = vmatprep.subr.bf16.mxu1 %v7489_v4 }
 0x27e   :  { %4171 = vmatpush1.bf16.msra.mxu0 %v7493_v37 }
 0x27f   :  { %4212 = vmatpush1.bf16.msra.mxu1 %v7495_v5  ;;  %4172 = vmatprep.subr.bf16.mxu0 %v7499_v8 }
 0x280   :  { %4213 = vmatprep.subr.bf16.mxu1 %v7501_v9 }
 0x282   :  { %4173 = vmatpush1.bf16.msra.mxu0 %v7505_v35 }
 0x283   :  { %4214 = vmatpush1.bf16.msra.mxu1 %v7507_v10  ;;  %4174 = vmatprep.subr.bf16.mxu0 %v7511_v11 }
 0x284   :  { %4215 = vmatprep.subr.bf16.mxu1 %v7513_v40 }
 0x286   :  { %4175 = vmatpush1.bf16.msra.mxu0 %v7517_v12 }
 0x287   :  { %4216 = vmatpush1.bf16.msra.mxu1 %v7519_v13  ;;  %4176 = vmatprep.subr.bf16.mxu0 %v7523_v14 }
 0x288   :  { %4217 = vmatprep.subr.bf16.mxu1 %v7525_v15 }
 0x28a   :  { %4177 = vmatpush1.bf16.msra.mxu0 %v7529_v16 }
 0x28b   :  { %4218 = vmatpush1.bf16.msra.mxu1 %v7531_v17  ;;  %4178 = vmatprep.subr.bf16.mxu0 %v7535_v20 }
 0x28c   :  { %4219 = vmatprep.subr.bf16.mxu1 %v7537_v21 }
 0x28e   :  { %4179 = vmatpush1.bf16.msra.mxu0 %v7541_v26 }
 0x28f   :  { %4220 = vmatpush1.bf16.msra.mxu1 %v7543_v28  ;;  %4275 = vmatprep.subr.bf16.mxu0 %v7444_v38 }
 0x290   :  { %4316 = vmatprep.subr.bf16.mxu1 %v7446_v39 }
 0x291   :  { %4197 = vmatmul.mubr.bf16.vlgmr.msra.gmra.mxu0 %v7187_v61 }
 0x292   :  { %4238 = vmatmul.mubr.bf16.vlgmr.msra.gmra.mxu1 %v7187_v61  ;;  %4276 = vmatpush1.bf16.msra.mxu0 %v7449_v48 }
 0x293   :  { %4317 = vmatpush1.bf16.msra.mxu1 %v7451_v49  ;;  %4277 = vmatprep.subr.bf16.mxu0 %v7455_v59 }
 0x294   :  { %4318 = vmatprep.subr.bf16.mxu1 %v7457_v50  ;;  %4307 = vmatprep.mubr.bf16.mxu0 %v7187_v61 }
 0x295   :  { %4348 = vmatprep.mubr.bf16.mxu1 %v7187_v61 }
 0x296   :  { %4278 = vmatpush1.bf16.msra.mxu0 %v7463_v54 }
 0x297   :  { %4319 = vmatpush1.bf16.msra.mxu1 %v7465_v55  ;;  %4279 = vmatprep.subr.bf16.mxu0 %v7469_v58 }
 0x298   :  { %4320 = vmatprep.subr.bf16.mxu1 %v7471_v63 }
 0x29a   :  { %4280 = vmatpush1.bf16.msra.mxu0 %v7481_v1 }
 0x29b   :  { %4321 = vmatpush1.bf16.msra.mxu1 %v7483_v2  ;;  %4281 = vmatprep.subr.bf16.mxu0 %v7487_v3 }
 0x29c   :  { %4322 = vmatprep.subr.bf16.mxu1 %v7489_v4 }
 0x29e   :  { %4282 = vmatpush1.bf16.msra.mxu0 %v7493_v37 }
 0x29f   :  { %4323 = vmatpush1.bf16.msra.mxu1 %v7495_v5  ;;  %4283 = vmatprep.subr.bf16.mxu0 %v7499_v8 }
 0x2a0   :  { %4324 = vmatprep.subr.bf16.mxu1 %v7501_v9 }
 0x2a2   :  { %4284 = vmatpush1.bf16.msra.mxu0 %v7505_v35 }
 0x2a3   :  { %4325 = vmatpush1.bf16.msra.mxu1 %v7507_v10  ;;  %4285 = vmatprep.subr.bf16.mxu0 %v7511_v11 }
 0x2a4   :  { %4326 = vmatprep.subr.bf16.mxu1 %v7513_v40 }
 0x2a6   :  { %4286 = vmatpush1.bf16.msra.mxu0 %v7517_v12 }
 0x2a7   :  { %4327 = vmatpush1.bf16.msra.mxu1 %v7519_v13  ;;  %4287 = vmatprep.subr.bf16.mxu0 %v7523_v14 }
 0x2a8   :  { %4328 = vmatprep.subr.bf16.mxu1 %v7525_v15 }
 0x2aa   :  { %4288 = vmatpush1.bf16.msra.mxu0 %v7529_v16 }
 0x2ab   :  { %4329 = vmatpush1.bf16.msra.mxu1 %v7531_v17  ;;  %4289 = vmatprep.subr.bf16.mxu0 %v7535_v20 }
 0x2ac   :  { %4330 = vmatprep.subr.bf16.mxu1 %v7537_v21 }
 0x2ae   :  { %4290 = vmatpush1.bf16.msra.mxu0 %v7541_v26 }
 0x2af   :  { %4331 = vmatpush1.bf16.msra.mxu1 %v7543_v28  ;;  %4405 = vmatprep.subr.bf16.mxu0 %v7444_v38 }
 0x2b0   :  { %4446 = vmatprep.subr.bf16.mxu1 %v7446_v39 }
 0x2b1   :  { %v3760_v29 = vpop.f32.mrf.mxu0 }
 0x2b2   :  { %v3801_v19 = vpop.f32.mrf.mxu1  ;;  %v3761_v30 = vadd.f32 %v3760_v29, %v7473_v60 }
 0x2b3   :  { %v3762_v24 = vpop.f32.mrf.mxu0 }
 0x2b4   :  { %v3803_v25 = vpop.f32.mrf.mxu1  ;;  %v3763_v31 = vadd.f32 %v3762_v24, %v7477_v62  ;;  %v3802_v32 = vadd.f32 %v3801_v19, %v3761_v30 }
 0x2b5   :  { %v3764_v33 = vpop.f32.mrf.mxu0 }
 0x2b6   :  { %v3805_v47 = vpop.f32.mrf.mxu1  ;;  %v3804_v51 = vadd.f32 %v3803_v25, %v3763_v31 }
 0x2b7   :  { %v3765_v34 = vpop.f32.mrf.mxu0 }
 0x2b8   :  { %v3806_v41 = vpop.f32.mrf.mxu1 }
 0x2f1   :  { %v3842_v42 = vpop.f32.mrf.mxu0 }
 0x2f2   :  { %v3883_v44 = vpop.f32.mrf.mxu1  ;;  %v3843_v45 = vadd.f32 %v3842_v42, %v3802_v32 }
 0x2f3   :  { %v3844_v46 = vpop.f32.mrf.mxu0 }
 0x2f4   :  { %v3885_v22 = vpop.f32.mrf.mxu1  ;;  %v3845_v23 = vadd.f32 %v3844_v46, %v3804_v51  ;;  %v3884_v53 = vadd.f32 %v3883_v44, %v3843_v45 }
 0x2f5   :  { %v3846_v52 = vpop.f32.mrf.mxu0 }
 0x2f6   :  { %v3887_v56 = vpop.f32.mrf.mxu1  ;;  %v3886_v57 = vadd.f32 %v3885_v22, %v3845_v23 }
 0x2f7   :  { %v3847_v0 = vpop.f32.mrf.mxu0 }
 0x2f8   :  { %v3888_v60 = vpop.f32.mrf.mxu1 }
 0x331   :  { %v3924_v6 = vpop.f32.mrf.mxu0 }
 0x332   :  { %v3965_v7 = vpop.f32.mrf.mxu1  ;;  %v3925_v23 = vadd.f32 %v3924_v6, %v3884_v53 }
 0x333   :  { %v3926_v62 = vpop.f32.mrf.mxu0 }
 0x334   :  { %v3967_v27 = vpop.f32.mrf.mxu1  ;;  %v3927_v44 = vadd.f32 %v3926_v62, %v3886_v57  ;;  %v7594_v56 = vadd.f32 %v3965_v7, %v3925_v23 }
 0x335   :  { %v3928_v36 = vpop.f32.mrf.mxu0 }
 0x336   :  { %v3969_v29 = vpop.f32.mrf.mxu1  ;;  %v7591_v22 = vadd.f32 %v3967_v27, %v3927_v44 }
 0x337   :  { %v3929_v19 = vpop.f32.mrf.mxu0 }
 0x338   :  { %v3970_v30 = vpop.f32.mrf.mxu1 }
 0x351   :  { %v4198_v24 = vpop.f32.mrf.mxu0 }
 0x352   :  { %v4239_v25 = vpop.f32.mrf.mxu1  ;;  %v4246_v31 = vadd.f32 %v4198_v24, %v7437_v43 }
 0x353   :  { %v4200_v32 = vpop.f32.mrf.mxu0  ;;  %v4248_v36 = vadd.f32 %v4239_v25, %v7594_v56 }
 0x354   :  { %v4241_v33 = vpop.f32.mrf.mxu1  ;;  %v5814_v47 = vmul.f32 -1.442695, %v4246_v31  ;;  %v4247_v51 = vadd.f32 %v4200_v32, %v7441_v18 }
 0x355   :  { %v4202_v34 = vpop.f32.mrf.mxu0  ;;  %v4249_v52 = vadd.f32 %v4241_v33, %v7591_v22 }
 0x356   :  { %v4243_v41 = vpop.f32.mrf.mxu1  ;;  %6859 = vpow2.f32 %v5814_v47  ;;  %v5815_v42 = vmul.f32 -1.442695, %v4247_v51 }
 0x357   :  { %v4203_v45 = vpop.f32.mrf.mxu0  ;;  %v5816_v0 = vmul.f32 -1.442695, %v4249_v52 }
 0x358   :  { %v4244_v46 = vpop.f32.mrf.mxu1  ;;  %6861 = vpow2.f32 %v5815_v42 }
 0x359   :  { %6863 = vpow2.f32 %v5816_v0 }
 0x363   :  { %v6860_v60 = vpop.eup %6859 }
 0x364   :  { %v4253_v29 = vadd.f32 1.0, %v6860_v60 }
 0x365   :  { %v6862_v19 = vpop.eup %6861 }
 0x366   :  { %6865 = vrcp.f32 %v4253_v29  ;;  %v4259_v30 = vadd.f32 1.0, %v6862_v19  ;;  %v6864_v57 = vpop.eup %6863 }
 0x367   :  { %6867 = vtanh.f32 %v4248_v36  ;;  %v4266_v53 = vadd.f32 1.0, %v6864_v57 }
 0x368   :  { %6869 = vrcp.f32 %v4259_v30 }
 0x369   :  { %6871 = vrcp.f32 %v4266_v53 }
 0x373   :  { %v6866_v62 = vpop.eup %6865 }
 0x374   :  { %v6868_v27 = vpop.eup %6867 }
 0x375   :  { %v6870_v24 = vpop.eup %6869  ;;  %v4270_v31 = vmul.f32 %v6868_v27, %v6866_v62 }
 0x376   :  { %v4269_v6 = vmul.f32 0.0, %v6870_v24  ;;  %v6872_v25 = vpop.eup %6871 }
 0x378   :  { %v7597_v7 = vadd.f32 %v4270_v31, %v4269_v6 }
 0x37a   :  { %6873 = vtanh.f32 %v7597_v7 }
 0x387   :  { %v6874_v32 = vpop.eup %6873 }
 0x388   :  { %v4273_v33 = vmul.f32 %v6874_v32, %v6872_v25 }
 0x38a   :  { %v4274_v47 = vpack.c.bf16 %v4273_v33, %v4273_v33 }
 0x38c   :  { %4308 = vmatmul.mubr.bf16.vlgmr.msra.gmra.mxu0 %v4274_v47  ;;  %4349 = vmatmul.mubr.bf16.vlgmr.msra.gmra.mxu1 %v4274_v47 }
 0x38d   :  { %4406 = vmatpush1.bf16.msra.mxu0 %v7449_v48  ;;  %4447 = vmatpush1.bf16.msra.mxu1 %v7451_v49 }
 0x38e   :  { %4407 = vmatprep.subr.bf16.mxu0 %v7455_v59  ;;  %4448 = vmatprep.subr.bf16.mxu1 %v7457_v50 }
 0x38f   :  { %4437 = vmatprep.mubr.bf16.mxu0 %v7187_v61  ;;  %4478 = vmatprep.mubr.bf16.mxu1 %v7187_v61 }
 0x391   :  { %4408 = vmatpush1.bf16.msra.mxu0 %v7463_v54  ;;  %4449 = vmatpush1.bf16.msra.mxu1 %v7465_v55 }
 0x392   :  { %4409 = vmatprep.subr.bf16.mxu0 %v7469_v58  ;;  %4450 = vmatprep.subr.bf16.mxu1 %v7471_v63 }
 0x395   :  { %4410 = vmatpush1.bf16.msra.mxu0 %v7481_v1  ;;  %4451 = vmatpush1.bf16.msra.mxu1 %v7483_v2 }
 0x396   :  { %4411 = vmatprep.subr.bf16.mxu0 %v7487_v3  ;;  %4452 = vmatprep.subr.bf16.mxu1 %v7489_v4 }
 0x399   :  { %4412 = vmatpush1.bf16.msra.mxu0 %v7493_v37  ;;  %4453 = vmatpush1.bf16.msra.mxu1 %v7495_v5 }
 0x39a   :  { %4413 = vmatprep.subr.bf16.mxu0 %v7499_v8  ;;  %4454 = vmatprep.subr.bf16.mxu1 %v7501_v9 }
 0x39d   :  { %4414 = vmatpush1.bf16.msra.mxu0 %v7505_v35  ;;  %4455 = vmatpush1.bf16.msra.mxu1 %v7507_v10 }
 0x39e   :  { %4415 = vmatprep.subr.bf16.mxu0 %v7511_v11  ;;  %4456 = vmatprep.subr.bf16.mxu1 %v7513_v40 }
 0x3a1   :  { %4416 = vmatpush1.bf16.msra.mxu0 %v7517_v12  ;;  %4457 = vmatpush1.bf16.msra.mxu1 %v7519_v13 }
 0x3a2   :  { %4417 = vmatprep.subr.bf16.mxu0 %v7523_v14  ;;  %4458 = vmatprep.subr.bf16.mxu1 %v7525_v15 }
 0x3a5   :  { %4418 = vmatpush1.bf16.msra.mxu0 %v7529_v16  ;;  %4459 = vmatpush1.bf16.msra.mxu1 %v7531_v17 }
 0x3a6   :  { %4419 = vmatprep.subr.bf16.mxu0 %v7535_v20  ;;  %4460 = vmatprep.subr.bf16.mxu1 %v7537_v21 }
 0x3a9   :  { %4420 = vmatpush1.bf16.msra.mxu0 %v7541_v26  ;;  %4461 = vmatpush1.bf16.msra.mxu1 %v7543_v28 }
 0x3aa   :  { %4534 = vmatprep.subr.bf16.mxu0 %v7444_v38  ;;  %4575 = vmatprep.subr.bf16.mxu1 %v7446_v39 }
 0x44c   :  { %v4309_v51 = vpop.f32.mrf.mxu0  ;;  %v4350_v34 = vpop.f32.mrf.mxu1 }
 0x44d   :  { %v4361_v41 = vrot.slane %v4309_v51, 7  ;;  %v4363_v62 = vrot.slane %v4350_v34, 7  ;;  %v4393_v51 = vrot.slane %v7597_v7, 7 }
 0x44e   :  { %v4311_v42 = vpop.f32.mrf.mxu0  ;;  %v4352_v44 = vpop.f32.mrf.mxu1 }
 0x44f   :  { %v4369_v45 = vadd.f32 %v4361_v41, %v7437_v43  ;;  %v4362_v46 = vrot.slane %v4311_v42, 7  ;;  %v4364_v30 = vrot.slane %v4352_v44, 7  ;;  %v4371_v53 = vadd.f32 %v4363_v62, %v7594_v56 }
 0x450   :  { %v4313_v23 = vpop.f32.mrf.mxu0  ;;  %v4354_v52 = vpop.f32.mrf.mxu1 }
 0x451   :  { %v5817_v0 = vmul.f32 -1.442695, %v4369_v45  ;;  %v4370_v60 = vadd.f32 %v4362_v46, %v7441_v18  ;;  %v4372_v57 = vadd.f32 %v4364_v30, %v7591_v22 }
 0x452   :  { %v4314_v36 = vpop.f32.mrf.mxu0  ;;  %v4355_v29 = vpop.f32.mrf.mxu1 }
 0x453   :  { %6875 = vpow2.f32 %v5817_v0  ;;  %v5818_v19 = vmul.f32 -1.442695, %v4370_v60  ;;  %v5819_v27 = vmul.f32 -1.442695, %v4372_v57 }
 0x455   :  { %6877 = vpow2.f32 %v5818_v19 }
 0x456   :  { %6879 = vpow2.f32 %v5819_v27 }
 0x460   :  { %v6876_v24 = vpop.eup %6875 }
 0x461   :  { %v4376_v6 = vadd.f32 1.0, %v6876_v24 }
 0x462   :  { %v6878_v31 = vpop.eup %6877 }
 0x463   :  { %6881 = vrcp.f32 %v4376_v6  ;;  %v4382_v25 = vadd.f32 1.0, %v6878_v31  ;;  %v6880_v32 = vpop.eup %6879 }
 0x464   :  { %6883 = vtanh.f32 %v4371_v53  ;;  %v4389_v42 = vadd.f32 1.0, %v6880_v32 }
 0x465   :  { %6885 = vrcp.f32 %v4382_v25 }
 0x466   :  { %6887 = vrcp.f32 %v4389_v42 }
 0x470   :  { %v6882_v33 = vpop.eup %6881 }
 0x471   :  { %v6884_v47 = vpop.eup %6883 }
 0x472   :  { %v6886_v41 = vpop.eup %6885  ;;  %v4396_v44 = vmul.f32 %v6884_v47, %v6882_v33 }
 0x473   :  { %v4395_v34 = vmul.f32 %v6886_v41, %v4393_v51  ;;  %v6888_v46 = vpop.eup %6887 }
 0x475   :  { %v7639_v45 = vadd.f32 %v4396_v44, %v4395_v34 }
 0x477   :  { %6889 = vtanh.f32 %v7639_v45 }
 0x484   :  { %v6890_v23 = vpop.eup %6889 }
 0x485   :  { %v4399_v52 = vmul.f32 %v6890_v23, %v6888_v46 }
 0x487   :  { %v4400_v0 = vpack.c.bf16 %v4399_v52, %v4399_v52 }
 0x489   :  { %v4402_v60 = vshrl.u32 %v4400_v0, 16  ;;  %v4523_v0 = vrot.slane %v7639_v45, 7 }
 0x48b   :  { %4438 = vmatmul.mubr.bf16.vlgmr.msra.gmra.mxu0 %v4402_v60  ;;  %4479 = vmatmul.mubr.bf16.vlgmr.msra.gmra.mxu1 %v4402_v60 }
 0x48c   :  { %4535 = vmatpush1.bf16.msra.mxu0 %v7449_v48  ;;  %4576 = vmatpush1.bf16.msra.mxu1 %v7451_v49 }
 0x48d   :  { %4536 = vmatprep.subr.bf16.mxu0 %v7455_v59  ;;  %4577 = vmatprep.subr.bf16.mxu1 %v7457_v50 }
 0x48e   :  { %4566 = vmatprep.mubr.bf16.mxu0 %v7187_v61  ;;  %4607 = vmatprep.mubr.bf16.mxu1 %v7187_v61 }
 0x490   :  { %4537 = vmatpush1.bf16.msra.mxu0 %v7463_v54  ;;  %4578 = vmatpush1.bf16.msra.mxu1 %v7465_v55 }
 0x491   :  { %4538 = vmatprep.subr.bf16.mxu0 %v7469_v58  ;;  %4579 = vmatprep.subr.bf16.mxu1 %v7471_v63 }
 0x494   :  { %4539 = vmatpush1.bf16.msra.mxu0 %v7481_v1  ;;  %4580 = vmatpush1.bf16.msra.mxu1 %v7483_v2 }
 0x495   :  { %4540 = vmatprep.subr.bf16.mxu0 %v7487_v3  ;;  %4581 = vmatprep.subr.bf16.mxu1 %v7489_v4 }
 0x498   :  { %4541 = vmatpush1.bf16.msra.mxu0 %v7493_v37  ;;  %4582 = vmatpush1.bf16.msra.mxu1 %v7495_v5 }
 0x499   :  { %4542 = vmatprep.subr.bf16.mxu0 %v7499_v8  ;;  %4583 = vmatprep.subr.bf16.mxu1 %v7501_v9 }
 0x49c   :  { %4543 = vmatpush1.bf16.msra.mxu0 %v7505_v35  ;;  %4584 = vmatpush1.bf16.msra.mxu1 %v7507_v10 }
 0x49d   :  { %4544 = vmatprep.subr.bf16.mxu0 %v7511_v11  ;;  %4585 = vmatprep.subr.bf16.mxu1 %v7513_v40 }
 0x4a0   :  { %4545 = vmatpush1.bf16.msra.mxu0 %v7517_v12  ;;  %4586 = vmatpush1.bf16.msra.mxu1 %v7519_v13 }
 0x4a1   :  { %4546 = vmatprep.subr.bf16.mxu0 %v7523_v14  ;;  %4587 = vmatprep.subr.bf16.mxu1 %v7525_v15 }
 0x4a4   :  { %4547 = vmatpush1.bf16.msra.mxu0 %v7529_v16  ;;  %4588 = vmatpush1.bf16.msra.mxu1 %v7531_v17 }
 0x4a5   :  { %4548 = vmatprep.subr.bf16.mxu0 %v7535_v20  ;;  %4589 = vmatprep.subr.bf16.mxu1 %v7537_v21 }
 0x4a8   :  { %4549 = vmatpush1.bf16.msra.mxu0 %v7541_v26  ;;  %4590 = vmatpush1.bf16.msra.mxu1 %v7543_v28 }
 0x4a9   :  { %4665 = vmatprep.subr.bf16.mxu0 %v7444_v38  ;;  %4706 = vmatprep.subr.bf16.mxu1 %v7446_v39 }
 0x54b   :  { %v4439_v7 = vpop.f32.mrf.mxu0  ;;  %v4480_v36 = vpop.f32.mrf.mxu1 }
 0x54c   :  { %v4491_v29 = vrot.slane %v4439_v7, 6  ;;  %v4493_v33 = vrot.slane %v4480_v36, 6 }
 0x54d   :  { %v4441_v19 = vpop.f32.mrf.mxu0  ;;  %v4482_v30 = vpop.f32.mrf.mxu1 }
 0x54e   :  { %v4499_v57 = vadd.f32 %v4491_v29, %v7437_v43  ;;  %v4492_v62 = vrot.slane %v4441_v19, 6  ;;  %v4494_v38 = vrot.slane %v4482_v30, 6  ;;  %v4501_v41 = vadd.f32 %v4493_v33, %v7594_v56 }
 0x54f   :  { %v4443_v27 = vpop.f32.mrf.mxu0  ;;  %v4484_v24 = vpop.f32.mrf.mxu1  ;;  %v7188_v33 = vmov 0.0  }
 0x550   :  { %v5820_v53 = vmul.f32 -1.442695, %v4499_v57  ;;  %v4500_v6 = vadd.f32 %v4492_v62, %v7441_v18  ;;  %v4502_v39 = vadd.f32 %v4494_v38, %v7591_v22 }
 0x551   :  { %v4444_v31 = vpop.f32.mrf.mxu0  ;;  %v4485_v25 = vpop.f32.mrf.mxu1 }
 0x552   :  { %6891 = vpow2.f32 %v5820_v53  ;;  %v5821_v32 = vmul.f32 -1.442695, %v4500_v6  ;;  %v5822_v47 = vmul.f32 -1.442695, %v4502_v39  ;;  %v6827_v39 = vld [vmem:[#allocation8 + $0x38] sm:$0xff]  }
 0x554   :  { %6893 = vpow2.f32 %v5821_v32 }
 0x555   :  { %6895 = vpow2.f32 %v5822_v47  ;;  %v6828_v47 = vld [vmem:[#allocation8 + $0x30] sm:$0xff]  }
 0x55f   :  { %v6892_v51 = vpop.eup %6891 }
 0x560   :  { %v4506_v42 = vadd.f32 1.0, %v6892_v51  ;;  %v6829_v51 = vld [vmem:[#allocation8 + $0x28] sm:$0xff]  }
 0x561   :  { %v6894_v44 = vpop.eup %6893 }
 0x562   :  { %6897 = vrcp.f32 %v4506_v42  ;;  %v4512_v34 = vadd.f32 1.0, %v6894_v44  ;;  %v6896_v46 = vpop.eup %6895  ;;  %v6831_v42 = vld [vmem:[#allocation8 + $0x18] sm:$0xff]   ;;  %v6832_v44 = vld [vmem:[#allocation8 + $0x10] sm:$0xff]  }
 0x563   :  { %6899 = vtanh.f32 %v4501_v41  ;;  %v4519_v7 = vadd.f32 1.0, %v6896_v46  ;;  %v6830_v41 = vld [vmem:[#allocation8 + $0x20] sm:$0xff]  }
 0x564   :  { %6901 = vrcp.f32 %v4512_v34  ;;  %v6833_v34 = vld [vmem:[#allocation8 + $0x8] sm:$0xff]   ;;  %v6834_v46 = vld [vmem:[#allocation8] sm:$0xff]  }
 0x565   :  { %6903 = vrcp.f32 %v4519_v7  ;;  %v6839_v7 = vld [vmem:[#allocation11 + $0x18] sm:$0xff]  }
 0x56f   :  { %v6898_v23 = vpop.eup %6897 }
 0x570   :  { %v6900_v52 = vpop.eup %6899 }
 0x571   :  { %v6902_v60 = vpop.eup %6901  ;;  %v4526_v29 = vmul.f32 %v6900_v52, %v6898_v23  ;;  %v6835_v23 = vld [vmem:[#allocation11 + $0x38] sm:$0xff]   ;;  %v6836_v52 = vld [vmem:[#allocation11 + $0x30] sm:$0xff]  }
 0x572   :  { %v4525_v36 = vmul.f32 %v6902_v60, %v4523_v0  ;;  %v6904_v30 = vpop.eup %6903  ;;  %v6837_v0 = vld [vmem:[#allocation11 + $0x28] sm:$0xff]   ;;  %v6838_v60 = vld [vmem:[#allocation11 + $0x20] sm:$0xff]  }
 0x574   :  { %v7681_v19 = vadd.f32 %v4526_v29, %v4525_v36  ;;  %v6840_v29 = vld [vmem:[#allocation11 + $0x10] sm:$0xff]  }
 0x576   :  { %6905 = vtanh.f32 %v7681_v19 }
 0x583   :  { %v6906_v57 = vpop.eup %6905 }
 0x584   :  { %v4529_v62 = vmul.f32 %v6906_v57, %v6904_v30 }
 0x586   :  { %v4530_v27 = vpack.c.bf16 %v4529_v62, %v4529_v62 }
 0x588   :  { %v4532_v24 = vrot.slane %v4530_v27, 1 }
 0x58a   :  { %4567 = vmatmul.mubr.bf16.vlgmr.msra.gmra.mxu0 %v4532_v24  ;;  %4608 = vmatmul.mubr.bf16.vlgmr.msra.gmra.mxu1 %v4532_v24 }
 0x58b   :  { %4666 = vmatpush1.bf16.msra.mxu0 %v7449_v48  ;;  %4707 = vmatpush1.bf16.msra.mxu1 %v7451_v49 }
 0x58c   :  { %4667 = vmatprep.subr.bf16.mxu0 %v7455_v59  ;;  %4708 = vmatprep.subr.bf16.mxu1 %v7457_v50 }
 0x58d   :  { %4697 = vmatprep.mubr.bf16.mxu0 %v7187_v61  ;;  %4738 = vmatprep.mubr.bf16.mxu1 %v7187_v61 }
 0x58f   :  { %4668 = vmatpush1.bf16.msra.mxu0 %v7463_v54  ;;  %4709 = vmatpush1.bf16.msra.mxu1 %v7465_v55 }
 0x590   :  { %4669 = vmatprep.subr.bf16.mxu0 %v7469_v58  ;;  %4710 = vmatprep.subr.bf16.mxu1 %v7471_v63 }
 0x593   :  { %4670 = vmatpush1.bf16.msra.mxu0 %v7481_v1  ;;  %4711 = vmatpush1.bf16.msra.mxu1 %v7483_v2 }
 0x594   :  { %4671 = vmatprep.subr.bf16.mxu0 %v7487_v3  ;;  %4712 = vmatprep.subr.bf16.mxu1 %v7489_v4 }
 0x597   :  { %4672 = vmatpush1.bf16.msra.mxu0 %v7493_v37  ;;  %4713 = vmatpush1.bf16.msra.mxu1 %v7495_v5 }
 0x598   :  { %4673 = vmatprep.subr.bf16.mxu0 %v7499_v8  ;;  %4714 = vmatprep.subr.bf16.mxu1 %v7501_v9 }
 0x59b   :  { %4674 = vmatpush1.bf16.msra.mxu0 %v7505_v35  ;;  %4715 = vmatpush1.bf16.msra.mxu1 %v7507_v10 }
 0x59c   :  { %4675 = vmatprep.subr.bf16.mxu0 %v7511_v11  ;;  %4716 = vmatprep.subr.bf16.mxu1 %v7513_v40 }
 0x59f   :  { %4676 = vmatpush1.bf16.msra.mxu0 %v7517_v12  ;;  %4717 = vmatpush1.bf16.msra.mxu1 %v7519_v13 }
 0x5a0   :  { %4677 = vmatprep.subr.bf16.mxu0 %v7523_v14  ;;  %4718 = vmatprep.subr.bf16.mxu1 %v7525_v15 }
 0x5a3   :  { %4678 = vmatpush1.bf16.msra.mxu0 %v7529_v16  ;;  %4719 = vmatpush1.bf16.msra.mxu1 %v7531_v17  ;;  %v4652_v17 = vrot.slane %v7681_v19, 7 }
 0x5a4   :  { %4679 = vmatprep.subr.bf16.mxu0 %v7535_v20  ;;  %4720 = vmatprep.subr.bf16.mxu1 %v7537_v21 }
 0x5a7   :  { %4680 = vmatpush1.bf16.msra.mxu0 %v7541_v26  ;;  %4721 = vmatpush1.bf16.msra.mxu1 %v7543_v28 }
 0x5a8   :  { %5897 = vmatprep.subr.bf16.mxu0 %v7188_v33  ;;  %5917 = vmatprep.subr.bf16.mxu1 %v7188_v33 }
 0x64a   :  { %v4568_v48 = vpop.f32.mrf.mxu0  ;;  %v4609_v49 = vpop.f32.mrf.mxu1 }
 0x64b   :  { %v4620_v59 = vrot.slane %v4568_v48, 5  ;;  %v4622_v9 = vrot.slane %v4609_v49, 5 }
 0x64c   :  { %v4570_v50 = vpop.f32.mrf.mxu0  ;;  %v4611_v54 = vpop.f32.mrf.mxu1 }
 0x64d   :  { %v4628_v55 = vadd.f32 %v4620_v59, %v7437_v43  ;;  %v4621_v58 = vrot.slane %v4570_v50, 5  ;;  %v4623_v5 = vrot.slane %v4611_v54, 5  ;;  %v4630_v11 = vadd.f32 %v4622_v9, %v7594_v56 }
 0x64e   :  { %v4572_v63 = vpop.f32.mrf.mxu0  ;;  %v4613_v61 = vpop.f32.mrf.mxu1 }
 0x64f   :  { %v5823_v1 = vmul.f32 -1.442695, %v4628_v55  ;;  %v4629_v2 = vadd.f32 %v4621_v58, %v7441_v18  ;;  %v4631_v8 = vadd.f32 %v4623_v5, %v7591_v22 }
 0x650   :  { %v4573_v3 = vpop.f32.mrf.mxu0  ;;  %v4614_v4 = vpop.f32.mrf.mxu1 }
 0x651   :  { %6907 = vpow2.f32 %v5823_v1  ;;  %v5824_v37 = vmul.f32 -1.442695, %v4629_v2  ;;  %v5825_v35 = vmul.f32 -1.442695, %v4631_v8 }
 0x653   :  { %6909 = vpow2.f32 %v5824_v37 }
 0x654   :  { %6911 = vpow2.f32 %v5825_v35 }
 0x65e   :  { %v6908_v10 = vpop.eup %6907 }
 0x65f   :  { %v4635_v40 = vadd.f32 1.0, %v6908_v10 }
 0x660   :  { %v6910_v12 = vpop.eup %6909 }
 0x661   :  { %6913 = vrcp.f32 %v4635_v40  ;;  %v4641_v13 = vadd.f32 1.0, %v6910_v12  ;;  %v6912_v14 = vpop.eup %6911 }
 0x662   :  { %6915 = vtanh.f32 %v4630_v11  ;;  %v4648_v21 = vadd.f32 1.0, %v6912_v14 }
 0x663   :  { %6917 = vrcp.f32 %v4641_v13 }
 0x664   :  { %6919 = vrcp.f32 %v4648_v21  ;;  %v6843_v21 = vld [vmem:[%s7831_s8 + $0x38] sm:$0xff]  }
 0x66e   :  { %v6914_v15 = vpop.eup %6913 }
 0x66f   :  { %v6916_v16 = vpop.eup %6915 }
 0x670   :  { %v6918_v20 = vpop.eup %6917  ;;  %v4655_v26 = vmul.f32 %v6916_v16, %v6914_v15 }
 0x671   :  { %v4654_v28 = vmul.f32 %v6918_v20, %v4652_v17  ;;  %v6920_v53 = vpop.eup %6919  ;;  %v6841_v17 = vld [vmem:[#allocation11 + $0x8] sm:$0xff]   ;;  %v6842_v20 = vld [vmem:[#allocation11] sm:$0xff]  }
 0x673   :  { %v7721_v45 = vadd.f32 %v4655_v26, %v4654_v28  ;;  %v6845_v26 = vld [vmem:[%s7831_s8 + $0x30] sm:$0xff]   ;;  %v6847_v28 = vld [vmem:[%s7831_s8 + $0x28] sm:$0xff]  }
 0x675   :  { %6921 = vtanh.f32 %v7721_v45  ;;  %v4783_v35 = vrot.slane %v7721_v45, 7  ;;  %v6849_v45 = vld [vmem:[%s7831_s8 + $0x20] sm:$0xff]  }
 0x682   :  { %v6922_v6 = vpop.eup %6921 }
 0x683   :  { %v4658_v31 = vmul.f32 %v6922_v6, %v6920_v53  ;;  %v6851_v53 = vld [vmem:[%s7831_s8 + $0x18] sm:$0xff]   ;;  %v6853_v6 = vld [vmem:[%s7831_s8 + $0x10] sm:$0xff]  }
 0x685   :  { %v4659_v25 = vpack.c.bf16 %v4658_v31, %v4658_v31  ;;  %v4807_v31 = vld [vmem:[#allocation10] sm:$0x1] }
 0x687   :  { %v4661_v32 = vshrl.u32 %v4659_v25, 16 }
 0x689   :  { %v4663_v38 = vrot.slane %v4661_v32, 1 }
 0x68b   :  { %4698 = vmatmul.mubr.bf16.vlgmr.msra.gmra.mxu0 %v4663_v38  ;;  %4739 = vmatmul.mubr.bf16.vlgmr.msra.gmra.mxu1 %v4663_v38 }
 0x68c   :  { %5898 = vmatpush3.bf16.msra.mxu0 %v6827_v39  ;;  %5913 = vmatprep.mubr.msk.bf16.mxu0 %vm7189_vm0, %v7188_v33 }
 0x68d   :  { %5899 = vmatprep.subr.bf16.mxu0 %v7188_v33  ;;  %5933 = vmatprep.mubr.msk.bf16.mxu1 %vm7189_vm0, %v7188_v33 }
 0x68e   :  { %5918 = vmatpush3.bf16.msra.mxu1 %v6835_v23  ;;  %v6852_v23 = vld [vmem:[%s7833_s10 + $0x18] sm:$0xff]  }
 0x68f   :  { %5919 = vmatprep.subr.bf16.mxu1 %v7188_v33 }
 0x690   :  { %5900 = vmatpush3.bf16.msra.mxu0 %v6828_v47 }
 0x691   :  { %5901 = vmatprep.subr.bf16.mxu0 %v7188_v33 }
 0x692   :  { %5920 = vmatpush3.bf16.msra.mxu1 %v6836_v52  ;;  %v6854_v52 = vld [vmem:[%s7833_s10 + $0x10] sm:$0xff]  }
 0x693   :  { %5921 = vmatprep.subr.bf16.mxu1 %v7188_v33 }
 0x694   :  { %5902 = vmatpush3.bf16.msra.mxu0 %v6829_v51  ;;  %v6844_v51 = vld [vmem:[%s7833_s10 + $0x38] sm:$0xff]  }
 0x695   :  { %5903 = vmatprep.subr.bf16.mxu0 %v7188_v33 }
 0x696   :  { %5922 = vmatpush3.bf16.msra.mxu1 %v6837_v0  ;;  %v6855_v0 = vld [vmem:[%s7831_s8 + $0x8] sm:$0xff]  }
 0x697   :  { %5923 = vmatprep.subr.bf16.mxu1 %v7188_v33 }
 0x698   :  { %5904 = vmatpush3.bf16.msra.mxu0 %v6830_v41 }
 0x699   :  { %5905 = vmatprep.subr.bf16.mxu0 %v7188_v33 }
 0x69a   :  { %5924 = vmatpush3.bf16.msra.mxu1 %v6838_v60  ;;  %v6856_v60 = vld [vmem:[%s7833_s10 + $0x8] sm:$0xff]  }
 0x69b   :  { %5925 = vmatprep.subr.bf16.mxu1 %v7188_v33 }
 0x69c   :  { %5906 = vmatpush3.bf16.msra.mxu0 %v6831_v42 }
 0x69d   :  { %5907 = vmatprep.subr.bf16.mxu0 %v7188_v33 }
 0x69e   :  { %5926 = vmatpush3.bf16.msra.mxu1 %v6839_v7  ;;  %v6857_v7 = vld [vmem:[%s7831_s8] sm:$0xff]   ;;  %s5227_s8 = sshll.u32 %s7190_s15, 4  ;;  %s5228_s8 = int_to_ptr.vmem [resolvable:$true] %s5227_s8 }
 0x69f   :  { %5927 = vmatprep.subr.bf16.mxu1 %v7188_v33  ;;  %s7124_s20 = scalar_lea.vmem %s5228_s8, 32  ;;  %p7125_p4 = scmp.lt.s32.totalorder %s5228_s8, %s5228_s8 }
 0x6a0   :  { %5908 = vmatpush3.bf16.msra.mxu0 %v6832_v44  ;;  %v6846_v44 = vld [vmem:[%s7833_s10 + $0x30] sm:$0xff]  }
 0x6a1   :  { %5909 = vmatprep.subr.bf16.mxu0 %v7188_v33 }
 0x6a2   :  { %5928 = vmatpush3.bf16.msra.mxu1 %v6840_v29  ;;  %v6858_v29 = vld [vmem:[%s7833_s10] sm:$0xff]  }
 0x6a3   :  { %5929 = vmatprep.subr.bf16.mxu1 %v7188_v33 }
 0x6a4   :  { %5910 = vmatpush3.bf16.msra.mxu0 %v6833_v34  ;;  %v6848_v34 = vld [vmem:[%s7833_s10 + $0x28] sm:$0xff]  }
 0x6a5   :  { %5911 = vmatprep.subr.bf16.mxu0 %v7188_v33 }
 0x6a6   :  { %5930 = vmatpush3.bf16.msra.mxu1 %v6841_v17 }
 0x6a7   :  { %5931 = vmatprep.subr.bf16.mxu1 %v7188_v33 }
 0x6a8   :  { %5912 = vmatpush3.bf16.msra.mxu0 %v6834_v46  ;;  %v6850_v46 = vld [vmem:[%s7833_s10 + $0x20] sm:$0xff]   ;;  %s7120_s10 = scalar_lea.vmem %s5228_s8, 16 }
 0x6a9   :  { %5937 = vmatprep.subr.bf16.mxu0 %v7188_v33  ;;  %p7121_p3 = scmp.ne.s32.totalorder %s5228_s8, %s7120_s10  ;;  %p7126_p5 = scmp.lt.s32.totalorder %s7124_s20, %s7120_s10 }
 0x6aa   :  { %5932 = vmatpush3.bf16.msra.mxu1 %v6842_v20 }
 0x6ab   :  { %5957 = vmatprep.subr.bf16.mxu1 %v7188_v33  ;;  %p7127_p6 = por %p7126_p5, %p7125_p4 }
 0x6ad   :  { %p7128_p7 = pnand %p7127_p6, %p7121_p3 }
 0x74b   :  { %v4699_v36 = vpop.f32.mrf.mxu0  ;;  %v4740_v19 = vpop.f32.mrf.mxu1 }
 0x74c   :  { %v4751_v30 = vrot.slane %v4699_v36, 4  ;;  %v4753_v1 = vrot.slane %v4740_v19, 4  ;;  %v4917_v36 = vld [vmem:[#allocation13] sm:$0x1] }
 0x74d   :  { %v4701_v57 = vpop.f32.mrf.mxu0  ;;  %v4742_v62 = vpop.f32.mrf.mxu1 }
 0x74e   :  { %v4759_v27 = vadd.f32 %v4751_v30, %v7437_v43  ;;  %v4752_v24 = vrot.slane %v4701_v57, 4  ;;  %v4754_v63 = vrot.slane %v4742_v62, 4  ;;  %v4761_v4 = vadd.f32 %v4753_v1, %v7594_v56 }
 0x74f   :  { %v4703_v48 = vpop.f32.mrf.mxu0  ;;  %v4744_v49 = vpop.f32.mrf.mxu1 }
 0x750   :  { %v5826_v59 = vmul.f32 -1.442695, %v4759_v27  ;;  %v4760_v50 = vadd.f32 %v4752_v24, %v7441_v18  ;;  %v4762_v61 = vadd.f32 %v4754_v63, %v7591_v22  ;;  %v5131_v49 = vld [vmem:[#allocation16] sm:$0x1] }
 0x751   :  { %v4704_v54 = vpop.f32.mrf.mxu0  ;;  %v4745_v55 = vpop.f32.mrf.mxu1 }
 0x752   :  { %6923 = vpow2.f32 %v5826_v59  ;;  %v5827_v58 = vmul.f32 -1.442695, %v4760_v50  ;;  %v5828_v2 = vmul.f32 -1.442695, %v4762_v61 }
 0x754   :  { %6925 = vpow2.f32 %v5827_v58 }
 0x755   :  { %6927 = vpow2.f32 %v5828_v2 }
 0x75f   :  { %v6924_v3 = vpop.eup %6923 }
 0x760   :  { %v4766_v43 = vadd.f32 1.0, %v6924_v3 }
 0x761   :  { %v6926_v37 = vpop.eup %6925 }
 0x762   :  { %6929 = vrcp.f32 %v4766_v43  ;;  %v4772_v5 = vadd.f32 1.0, %v6926_v37  ;;  %v6928_v18 = vpop.eup %6927 }
 0x763   :  { %6931 = vtanh.f32 %v4761_v4  ;;  %v4779_v11 = vadd.f32 1.0, %v6928_v18 }
 0x764   :  { %6933 = vrcp.f32 %v4772_v5 }
 0x765   :  { %6935 = vrcp.f32 %v4779_v11 }
 0x76f   :  { %v6930_v8 = vpop.eup %6929 }
 0x770   :  { %v6932_v9 = vpop.eup %6931 }
 0x771   :  { %v6934_v10 = vpop.eup %6933  ;;  %v4786_v22 = vmul.f32 %v6932_v9, %v6930_v8 }
 0x772   :  { %v4785_v40 = vmul.f32 %v6934_v10, %v4783_v35  ;;  %v6936_v56 = vpop.eup %6935 }
 0x774   :  { %v4787_v12 = vadd.f32 %v4786_v22, %v4785_v40 }
 0x776   :  { %6937 = vtanh.f32 %v4787_v12 }
 0x783   :  { %v6938_v13 = vpop.eup %6937 }
 0x784   :  { %v4789_v14 = vmul.f32 %v6938_v13, %v6936_v56 }
 0x786   :  { %v4790_v15 = vpack.c.bf16 %v4789_v14, %v4789_v14 }
 0x788   :  { %v4809_v16 = vrot.slane %v4790_v15, 2 }
 0x78a   :  { %5914 = vmatmul.mubr.bf16.vlgmr.msra.gmra.mxu0 %v4809_v16 }
 0x78b   :  { %5953 = vmatprep.mubr.msk.bf16.mxu0 %vm7189_vm0, %v7188_v33  ;;  %5938 = vmatpush3.bf16.msra.mxu0 %v6843_v21 }
 0x78c   :  { %5939 = vmatprep.subr.bf16.mxu0 %v7188_v33 }
 0x78f   :  { %5940 = vmatpush3.bf16.msra.mxu0 %v6845_v26 }
 0x790   :  { %5941 = vmatprep.subr.bf16.mxu0 %v7188_v33 }
 0x793   :  { %5942 = vmatpush3.bf16.msra.mxu0 %v6847_v28 }
 0x794   :  { %5943 = vmatprep.subr.bf16.mxu0 %v7188_v33 }
 0x797   :  { %5944 = vmatpush3.bf16.msra.mxu0 %v6849_v45 }
 0x798   :  { %5945 = vmatprep.subr.bf16.mxu0 %v7188_v33 }
 0x79b   :  { %5946 = vmatpush3.bf16.msra.mxu0 %v6851_v53 }
 0x79c   :  { %5947 = vmatprep.subr.bf16.mxu0 %v7188_v33 }
 0x79f   :  { %5948 = vmatpush3.bf16.msra.mxu0 %v6853_v6 }
 0x7a0   :  { %5949 = vmatprep.subr.bf16.mxu0 %v7188_v33 }
 0x7a3   :  { %5950 = vmatpush3.bf16.msra.mxu0 %v6855_v0 }
 0x7a4   :  { %5951 = vmatprep.subr.bf16.mxu0 %v7188_v33 }
 0x7a7   :  { %5952 = vmatpush3.bf16.msra.mxu0 %v6857_v7 }
 0x84a   :  { %v4893_v25 = vpop.f32.mrf.mxu0 }
 0x84b   :  { %v4894_v32 = vadd.f32 %v4893_v25, %v4807_v31 }
 0x84c   :  { %v5915_v38 = vpop.f32.mrf.mxu0 }
 0x84d   :  { %v4899_v39 = vmax.f32 %v4894_v32, 0.0 }
 0x84e   :  { %v4896_v47 = vpop.f32.mrf.mxu0 }
 0x84f   :  { %v4900_v41 = vpack.c.bf16 %v4899_v39, %v4899_v39 }
 0x850   :  { %v5916_v42 = vpop.f32.mrf.mxu0 }
 0x851   :  { %5934 = vmatmul.mubr.bf16.vlgmr.msra.gmra.mxu1 %v4900_v41 }
 0x852   :  { %5958 = vmatpush3.bf16.msra.mxu1 %v6844_v51  ;;  %5973 = vmatprep.mubr.msk.bf16.mxu1 %vm7189_vm0, %v7188_v33 }
 0x853   :  { %5959 = vmatprep.subr.bf16.mxu1 %v7188_v33 }
 0x856   :  { %5960 = vmatpush3.bf16.msra.mxu1 %v6846_v44 }
 0x857   :  { %5961 = vmatprep.subr.bf16.mxu1 %v7188_v33 }
 0x85a   :  { %5962 = vmatpush3.bf16.msra.mxu1 %v6848_v34 }
 0x85b   :  { %5963 = vmatprep.subr.bf16.mxu1 %v7188_v33 }
 0x85e   :  { %5964 = vmatpush3.bf16.msra.mxu1 %v6850_v46 }
 0x85f   :  { %5965 = vmatprep.subr.bf16.mxu1 %v7188_v33 }
 0x862   :  { %5966 = vmatpush3.bf16.msra.mxu1 %v6852_v23 }
 0x863   :  { %5967 = vmatprep.subr.bf16.mxu1 %v7188_v33 }
 0x866   :  { %5968 = vmatpush3.bf16.msra.mxu1 %v6854_v52 }
 0x867   :  { %5969 = vmatprep.subr.bf16.mxu1 %v7188_v33 }
 0x86a   :  { %5970 = vmatpush3.bf16.msra.mxu1 %v6856_v60 }
 0x86b   :  { %5971 = vmatprep.subr.bf16.mxu1 %v7188_v33  ;;  %v5024_v33 = vld [vmem:[#allocation14] sm:$0x1] }
 0x86e   :  { %5972 = vmatpush3.bf16.msra.mxu1 %v6858_v29 }
 0x911   :  { %v5000_v19 = vpop.f32.mrf.mxu1 }
 0x912   :  { %v5001_v30 = vadd.f32 %v5000_v19, %v4917_v36 }
 0x913   :  { %v5935_v57 = vpop.f32.mrf.mxu1 }
 0x914   :  { %v5006_v62 = vmax.f32 %v5001_v30, 0.0 }
 0x915   :  { %v5003_v27 = vpop.f32.mrf.mxu1 }
 0x916   :  { %v5007_v24 = vpack.c.bf16 %v5006_v62, %v5006_v62 }
 0x917   :  { %v5936_v48 = vpop.f32.mrf.mxu1 }
 0x918   :  { %5954 = vmatmul.mubr.bf16.vlgmr.msra.gmra.mxu0 %v5007_v24  ;;  %5974 = vmatmul.mubr.bf16.vlgmr.msra.gmra.mxu1 %v5007_v24 }
 0x9d8   :  { %v5107_v59 = vpop.f32.mrf.mxu0  ;;  %v5214_v50 = vpop.f32.mrf.mxu1 }
 0x9d9   :  { %v5108_v54 = vadd.f32 %v5107_v59, %v5024_v33  ;;  %v5215_v55 = vadd.f32 %v5214_v50, %v5131_v49 }
 0x9da   :  { %v5955_v58 = vpop.f32.mrf.mxu0  ;;  %v5975_v63 = vpop.f32.mrf.mxu1 }
 0x9db   :  { %5114 = vst.msk [vmem:[#allocation17] sm:$0x1] %vm5113_vm1, %v5108_v54  ;;  %5220 = vst.msk [vmem:[#allocation18] sm:$0x1] %vm5113_vm1, %v5215_v55 }
 0x9dc   :  { %v5110_v61 = vpop.f32.mrf.mxu0  ;;  %v5217_v1 = vpop.f32.mrf.mxu1 }
 0x9dd   :  { %7131 = shalt.err (!%p7128_p7)
}
 0x9de   :  { %5230 = dma.vmem_to_hbm [thread:$0]  %s5228_s8, 16, %s7835_s12, [#allocation4]  }
 0x9df   :  { %s7140_s7 = scalar_lea.vmem %s5238_s17, 16  ;;  %s7144_s11 = scalar_lea.vmem %s5238_s17, 32 }
 0x9e0   :  { %p7141_p8 = scmp.ne.s32.totalorder %s5238_s17, %s7140_s7  ;;  %p7145_p9 = scmp.lt.s32.totalorder %s5238_s17, %s5238_s17 }
 0x9e1   :  { %p7146_p10 = scmp.lt.s32.totalorder %s7144_s11, %s7140_s7 }
 0x9e3   :  { %p7147_p11 = por %p7146_p10, %p7145_p9 }
 0x9e5   :  { %p7148_p12 = pnand %p7147_p11, %p7141_p8 }
 0x9e7   :  { %7151 = shalt.err (!%p7148_p12)
}
 0x9e8   :  { %5240 = dma.vmem_to_hbm [thread:$0]  %s5238_s17, 16, %s7836_s13, [#allocation19]   ;;  %v5956_v2 = vpop.f32.mrf.mxu0  ;;  %v5976_v3 = vpop.f32.mrf.mxu1 }
 0x9e9   :  { %7170 = dma.done.wait [#allocation4], 16  }
 0x9ea   :  { %7171 = vsyncadd [#allocation4], 4294967280 }
 0x9eb   :  { %7172 = dma.done.wait [#allocation19], 16  }
 0x9ec   :  { %7173 = vsyncadd [#allocation19], 4294967280 }
 0x9ed   :  { %5247 = vsyncpa [#allocation3], 1 }
 0x9ee   :  { %5248 = vsyncpa [#allocation6], 1 }
 0x9ef   :  { %5249 = vsyncpa [#allocation9], 1 }
 0x9f0   :  { %5250 = vsyncpa [#allocation12], 1 }
 0x9f1   :  { %5251 = vsyncpa [#allocation15], 1 }
 0x9f2   :  { %5252 = vsyncpa [#allocation4], 1 }
 0x9f3   :  { %5253 = vsyncpa [#allocation19], 1 }

</bundles_post_ra>
